<compile_context>
chip_gen: v5e
topology: v5e:2x2
jax: 0.10.0
libtpu: 0.0.40
codegen_flags: <defaults>
</compile_context>

<pallas_src>
import jax
import jax.numpy as jnp
import numpy as np
from jax.experimental import pallas as pl
from jax.experimental.pallas import tpu as pltpu


def _mil_kernel(x_ref, wf_ref, bf_ref, wg_ref, bg_ref, ww_ref, bw_ref, y_ref, a_ref):
    Bt, N, F = x_ref.shape
    C, D = ww_ref.shape

    # ---- feature extractor stand-in: bf16 dense projection + ReLU -> (Bt*N, L) ----
    # x arrives as f32 (no standalone wrapper-side cast pass over HBM); cast post-DMA.
    x = x_ref[...].reshape(Bt * N, F).astype(jnp.bfloat16)
    H = jnp.dot(x, wf_ref[...], preferred_element_type=jnp.float32) + bf_ref[...]
    H = jnp.maximum(H, 0.0)                                  # f32 (Bt*N, L)
    # feature_dropout: identity (eval mode)

    # ---- single fused bf16 matmul: [attention_V | attention_U | classifiers^T] ----
    # Full-width MXU occupancy on v6e/v7x; the classifier projection rides along for free.
    G = jnp.dot(H.astype(jnp.bfloat16), wg_ref[...],
                preferred_element_type=jnp.float32) + bg_ref[...]
    A_V = jnp.tanh(G[:, :D])
    A_U = jax.nn.sigmoid(G[:, D:2 * D])
    gated = A_V * A_U                                        # (Bt*N, D) f32
    hwc = G[:, 2 * D:2 * D + C]                              # (Bt*N, C) = H @ Wc.T (bias-free)

    gated3 = gated.reshape(Bt, N, D)
    hwc3 = hwc.reshape(Bt, N, C)

    # ---- per-head attention logits as lane reductions (keeps the width-C GEMV off the
    #      MXU and yields the (bags, heads, N) layout directly -> no wrapper transpose) ----
    rows = []
    for c in range(C):                                       # C is small and static
        w_c = ww_ref[c, :]                                   # (D,)
        rows.append(jnp.sum(gated3 * w_c[None, None, :], axis=-1) + bw_ref[0, c])
    logits = jnp.stack(rows, axis=1)                         # (Bt, C, N)
    # attention_dropout: identity (eval mode)

    # ---- exact softmax over instances (last axis == lanes); A is a prob. distribution ----
    lmax = jnp.max(logits, axis=-1, keepdims=True)
    e = jnp.exp(logits - lmax)
    a = e / jnp.sum(e, axis=-1, keepdims=True)               # (Bt, C, N)

    # ---- Y without materializing M: Y[b,c] = sum_n A[b,c,n] * (H[b,n,:] @ Wc[c,:]) ----
    y = jnp.sum(a * jnp.swapaxes(hwc3, 1, 2), axis=-1)       # (Bt, C), VPU + lane reduce

    y_ref[...] = y
    a_ref[...] = a


def _tpu_vmem_capacity():
    """Physical VMEM bytes of the local TPU (v5e/v6e: 128 MiB, v7x: 64 MiB per core)."""
    try:
        return int(pltpu.get_tpu_info().vmem_capacity_bytes)
    except Exception:
        return 64 << 20            # conservative default (v7x-sized)


def _pick_block_bags(bs, N, per_bag_bytes, fixed_bytes, vmem_budget,
                     min_rows=128, min_steps=4):
    """Pick bags-per-step Bt: fit the honest VMEM budget, fill the MXU (Bt*N >= 128 rows),
    and keep >= min_steps grid steps so DMA/compute overlap survives (>=2 per v7x core)."""
    cands = [d for d in range(1, bs + 1)
             if bs % d == 0 and (d % 8 == 0 or d == bs)]      # keeps the (Bt, C) block legal
    fits = [d for d in cands if fixed_bytes + d * per_bag_bytes <= vmem_budget]
    if not fits:
        fits = cands[:1]

    def score(d):
        return (d * N >= min_rows, bs // d >= min_steps, -d)

    return max(fits, key=score)


def multi_head_gated_attention_mil(x, params, block_bags=None):
    """x: (bs, N, ch, h, w) float32.
    Returns (Y, A, auxiliary_loss=None), matching forward(x, targets=None) in eval mode."""
    Wf, bf, Wv, bv, Wu, bu, Ww, bw, Wc = params
    bs, N, ch, h, w = x.shape
    F = ch * h * w
    L = Wf.shape[1]
    D = Wv.shape[1]
    C = Ww.shape[0]
    CPAD = 128                                   # lane-pad the classifier columns
    assert C <= CPAD
    GW = 2 * D + CPAD

    # bf16 storage for MXU weights (f32 accumulation).  x stays f32 in HBM and is cast
    # after the DMA inside the kernel (avoids a standalone HBM->HBM cast pass on x).
    x_flat = x.reshape(bs, N, F)
    Wf_b = Wf.astype(jnp.bfloat16)
    Wg_b = jnp.concatenate(
        [Wv, Wu, jnp.pad(Wc.T, ((0, 0), (0, CPAD - C)))], axis=1).astype(jnp.bfloat16)
    bg = jnp.concatenate([bv, bu, jnp.zeros((1, CPAD), jnp.float32)], axis=1)

    # ---- generation-aware tiling & explicit VMEM limit ----
    vmem_cap = _tpu_vmem_capacity()
    vmem_limit = int(min(vmem_cap // 2, 64 << 20))
    fixed_bytes = (F * L * 2 + L * GW * 2 + C * D * 4         # single-buffered weights
                   + (L + GW) * 4 + 4096)                     # biases + slack
    per_bag_bytes = (2 * N * F * 4                            # double-buffered f32 x tile
                     + N * (6 * L + 4 * GW + 12 * D)          # H (f32+bf16), G, A_V/A_U/gated
                     + 4 * N * (C + 1) * 4)                   # double-buffered outputs (approx)
    if block_bags is None:
        block_bags = _pick_block_bags(bs, N, per_bag_bytes, fixed_bytes,
                                      vmem_budget=(vmem_limit * 3) // 4)
    Bt = block_bags
    assert bs % Bt == 0, (bs, Bt)
    grid = (bs // Bt,)

    def rep(shape):
        # Constant-index weights: DMA'd once; single-buffer them to save VMEM (esp. v7x).
        return pl.BlockSpec(shape, lambda b: (0,) * len(shape),
                            pipeline_mode=pl.Buffered(1))

    flops = int(2 * bs * N * (F * L + L * GW + D * C) + 2 * bs * C * N)
    transcendentals = int(bs * N * 2 * D + bs * C * N)
    bytes_accessed = int(x_flat.size * 4 + Wf_b.size * 2 + Wg_b.size * 2
                         + 4 * (Ww.size + bf.size + bg.size + bw.size)
                         + 4 * (bs * C + bs * C * N))

    y_out, a_out = pl.pallas_call(
        _mil_kernel,
        out_shape=(
            jax.ShapeDtypeStruct((bs, C), jnp.float32),
            jax.ShapeDtypeStruct((bs, C, N), jnp.float32),
        ),
        grid_spec=pltpu.PrefetchScalarGridSpec(
            num_scalar_prefetch=0,
            grid=grid,
            in_specs=[
                pl.BlockSpec((Bt, N, F), lambda b: (b, 0, 0)),       # x: Bt bags per step (f32)
                rep((F, L)), rep((1, L)),                            # feature projection
                rep((L, GW)), rep((1, GW)),                          # fused [Wv | Wu | Wc.T] weight/bias
                rep((C, D)),                                         # attention_weights (stacked heads)
                pl.BlockSpec(memory_space=pltpu.MemorySpace.SMEM),   # attention biases (scalar reads)
            ],
            out_specs=[
                pl.BlockSpec((Bt, C), lambda b: (b, 0)),             # Y
                pl.BlockSpec((Bt, C, N), lambda b: (b, 0, 0)),       # A already (heads, N): lane-dense
            ],
        ),
        compiler_params=pltpu.CompilerParams(
            dimension_semantics=("parallel",),                       # bags independent -> megacore
            vmem_limit_bytes=vmem_limit),
        cost_estimate=pl.CostEstimate(
            flops=flops, transcendentals=transcendentals,
            bytes_accessed=bytes_accessed),
    )(x_flat, Wf_b, bf, Wg_b, bg, Ww, bw)

    return y_out, a_out, None   # auxiliary_loss only exists when targets is provided


def _ref_forward(x, params):
    """Pure-JAX reference mirroring the PyTorch forward (eval mode, targets=None),
    with the kernel's bf16 weight/activation storage mirrored (accumulation stays f32)."""
    Wf, bf, Wv, bv, Wu, bu, Ww, bw, Wc = params
    bs, N, ch, h, w = x.shape
    xf = x.reshape(bs, N, ch * h * w)
    q = lambda t: t.astype(jnp.bfloat16).astype(jnp.float32)
    with jax.default_matmul_precision("highest"):
        H = jnp.maximum(jnp.einsum('bnf,fl->bnl', q(xf), q(Wf)) + bf, 0.0)     # (bs, N, L)
        Hq = q(H)
        A_V = jnp.tanh(jnp.einsum('bnl,ld->bnd', Hq, q(Wv)) + bv)
        A_U = jax.nn.sigmoid(jnp.einsum('bnl,ld->bnd', Hq, q(Wu)) + bu)
        gated = A_V * A_U
        logits = jnp.einsum('bnd,cd->bcn', gated, Ww) + bw.reshape(1, -1, 1)   # (bs, C, N)
        A = jax.nn.softmax(logits, axis=-1)
        M = jnp.einsum('bcn,bnl->bcl', A, Hq)                                  # (bs, C, L)
        Y = jnp.einsum('bcl,cl->bc', M, q(Wc))                                 # (bs, C)
    return Y, A


def _init_params(key, F, L=512, D=128, num_classes=2):
    ks = jax.random.split(key, 9)
    s = 0.02
    Wf = s * jax.random.normal(ks[0], (F, L), jnp.float32)
    bf = s * jax.random.normal(ks[1], (1, L), jnp.float32)
    Wv = s * jax.random.normal(ks[2], (L, D), jnp.float32)
    bv = s * jax.random.normal(ks[3], (1, D), jnp.float32)
    Wu = s * jax.random.normal(ks[4], (L, D), jnp.float32)
    bu = s * jax.random.normal(ks[5], (1, D), jnp.float32)
    Ww = s * jax.random.normal(ks[6], (num_classes, D), jnp.float32)  # attention_weights[i].weight
    bw = s * jax.random.normal(ks[7], (1, num_classes), jnp.float32)  # attention_weights[i].bias
    Wc = s * jax.random.normal(ks[8], (num_classes, L), jnp.float32)  # classifiers[i].weight (no bias)
    return (Wf, bf, Wv, bv, Wu, bu, Ww, bw, Wc)


if __name__ == "__main__":
    bs, N, ch, h, w = 32, 16, 3, 16, 16
    L, D, num_classes = 512, 128, 2

    key = jax.random.PRNGKey(0)
    kx, kp = jax.random.split(key)
    x = jax.random.normal(kx, (bs, N, ch, h, w), jnp.float32)
    params = _init_params(kp, F=ch * h * w, L=L, D=D, num_classes=num_classes)

    Y, A, aux = multi_head_gated_attention_mil(x, params)
    Y = jax.block_until_ready(Y)
    A = jax.block_until_ready(A)

    Y_ref, A_ref = _ref_forward(x, params)
    assert Y.shape == (bs, num_classes) and A.shape == (bs, num_classes, N)
    assert aux is None
    # bf16 MXU storage (mirrored in the reference); softmax uses an exact divide.
    np.testing.assert_allclose(np.asarray(Y), np.asarray(Y_ref), rtol=1e-2, atol=1e-4)
    np.testing.assert_allclose(np.asarray(A), np.asarray(A_ref), rtol=1e-2, atol=1e-4)

    print("KERNEL_OK")
</pallas_src>

<mosaic_0001>
module attributes {stable_mosaic.version = 11 : i64} {
  func.func @_mil_kernel(%arg0: i32, %arg1: memref<8x16x768xf32, #tpu.memory_space<vmem>>, %arg2: memref<768x512xbf16, #tpu.memory_space<vmem>>, %arg3: memref<1x512xf32, #tpu.memory_space<vmem>>, %arg4: memref<512x384xbf16, #tpu.memory_space<vmem>>, %arg5: memref<1x384xf32, #tpu.memory_space<vmem>>, %arg6: memref<2x128xf32, #tpu.memory_space<vmem>>, %arg7: memref<1x2xf32, #tpu.memory_space<smem>>, %arg8: memref<8x2xf32, #tpu.memory_space<vmem>>, %arg9: memref<8x2x16xf32, #tpu.memory_space<vmem>>) attributes {dimension_semantics = [#tpu.dimension_semantics<parallel>], iteration_bounds = array<i64: 4>, scalar_prefetch = 0 : i64, scratch_operands = 0 : i64, tpu.core_type = #tpu.core_type<tc>, window_params = [{transform_indices = @transform_0, window_bounds = array<i64: 8, 16, 768>}, {pipeline_mode = #tpu.pipeline_mode<synchronous>, transform_indices = @transform_1, window_bounds = array<i64: 768, 512>}, {pipeline_mode = #tpu.pipeline_mode<synchronous>, transform_indices = @transform_2, window_bounds = array<i64: 1, 512>}, {pipeline_mode = #tpu.pipeline_mode<synchronous>, transform_indices = @transform_3, window_bounds = array<i64: 512, 384>}, {pipeline_mode = #tpu.pipeline_mode<synchronous>, transform_indices = @transform_4, window_bounds = array<i64: 1, 384>}, {pipeline_mode = #tpu.pipeline_mode<synchronous>, transform_indices = @transform_5, window_bounds = array<i64: 2, 128>}, {transform_indices = @transform_6, window_bounds = array<i64: 1, 2>}, {transform_indices = @transform_7, window_bounds = array<i64: 8, 2>}, {transform_indices = @transform_8, window_bounds = array<i64: 8, 2, 16>}]} {
    %c0 = arith.constant 0 : index
    %c0_0 = arith.constant 0 : index
    %c0_1 = arith.constant 0 : index
    %0 = vector.load %arg1[%c0, %c0_0, %c0_1] : memref<8x16x768xf32, #tpu.memory_space<vmem>>, vector<8x16x768xf32>
    %1 = vector.shape_cast %0 : vector<8x16x768xf32> to vector<128x768xf32>
    %2 = arith.truncf %1 : vector<128x768xf32> to vector<128x768xbf16>
    %c0_2 = arith.constant 0 : index
    %c0_3 = arith.constant 0 : index
    %3 = vector.load %arg2[%c0_2, %c0_3] : memref<768x512xbf16, #tpu.memory_space<vmem>>, vector<768x512xbf16>
    %cst = arith.constant dense<0.000000e+00> : vector<128x512xf32>
    %4 = tpu.matmul %2, %3, %cst {dimension_numbers = #tpu.dot_dimension_numbers<[1], [0], [0], [1], [0, 0, 1, 1], [], []>} : vector<128x768xbf16>, vector<768x512xbf16>, vector<128x512xf32> -> vector<128x512xf32>
    %c0_4 = arith.constant 0 : index
    %c0_5 = arith.constant 0 : index
    %5 = vector.load %arg3[%c0_4, %c0_5] : memref<1x512xf32, #tpu.memory_space<vmem>>, vector<1x512xf32>
    %6 = vector.broadcast %5 : vector<1x512xf32> to vector<128x512xf32>
    %7 = arith.addf %4, %6 : vector<128x512xf32>
    %cst_6 = arith.constant 0.000000e+00 : f32
    %8 = vector.broadcast %cst_6 : f32 to vector<128x512xf32>
    %9 = arith.maximumf %7, %8 : vector<128x512xf32>
    %10 = arith.truncf %9 : vector<128x512xf32> to vector<128x512xbf16>
    %c0_7 = arith.constant 0 : index
    %c0_8 = arith.constant 0 : index
    %11 = vector.load %arg4[%c0_7, %c0_8] : memref<512x384xbf16, #tpu.memory_space<vmem>>, vector<512x384xbf16>
    %cst_9 = arith.constant dense<0.000000e+00> : vector<128x384xf32>
    %12 = tpu.matmul %10, %11, %cst_9 {dimension_numbers = #tpu.dot_dimension_numbers<[1], [0], [0], [1], [0, 0, 1, 1], [], []>} : vector<128x512xbf16>, vector<512x384xbf16>, vector<128x384xf32> -> vector<128x384xf32>
    %c0_10 = arith.constant 0 : index
    %c0_11 = arith.constant 0 : index
    %13 = vector.load %arg5[%c0_10, %c0_11] : memref<1x384xf32, #tpu.memory_space<vmem>>, vector<1x384xf32>
    %14 = vector.broadcast %13 : vector<1x384xf32> to vector<128x384xf32>
    %15 = arith.addf %12, %14 : vector<128x384xf32>
    %16 = vector.extract_strided_slice %15 {offsets = [0, 0], sizes = [128, 128], strides = [1, 1]} : vector<128x384xf32> to vector<128x128xf32>
    %17 = math.tanh %16 : vector<128x128xf32>
    %18 = vector.extract_strided_slice %15 {offsets = [0, 128], sizes = [128, 128], strides = [1, 1]} : vector<128x384xf32> to vector<128x128xf32>
    %19 = arith.negf %18 : vector<128x128xf32>
    %20 = math.exp %19 : vector<128x128xf32>
    %cst_12 = arith.constant 1.000000e+00 : f32
    %21 = vector.broadcast %cst_12 : f32 to vector<128x128xf32>
    %22 = arith.addf %21, %20 : vector<128x128xf32>
    %23 = arith.divf %21, %22 : vector<128x128xf32>
    %24 = arith.mulf %17, %23 : vector<128x128xf32>
    %25 = vector.extract_strided_slice %15 {offsets = [0, 256], sizes = [128, 2], strides = [1, 1]} : vector<128x384xf32> to vector<128x2xf32>
    %26 = vector.shape_cast %24 : vector<128x128xf32> to vector<8x16x128xf32>
    %27 = vector.shape_cast %25 : vector<128x2xf32> to vector<8x16x2xf32>
    %c0_13 = arith.constant 0 : index
    %c0_14 = arith.constant 0 : index
    %28 = vector.load %arg6[%c0_13, %c0_14] : memref<2x128xf32, #tpu.memory_space<vmem>>, vector<1x128xf32>
    %29 = vector.shape_cast %28 : vector<1x128xf32> to vector<128xf32>
    %30 = vector.shape_cast %29 : vector<128xf32> to vector<1x1x128xf32>
    %31 = vector.broadcast %30 : vector<1x1x128xf32> to vector<8x16x128xf32>
    %32 = arith.mulf %26, %31 : vector<8x16x128xf32>
    %cst_15 = arith.constant dense<0.000000e+00> : vector<8x16xf32>
    %33 = vector.multi_reduction <add>, %32, %cst_15 [2] : vector<8x16x128xf32> to vector<8x16xf32>
    %c0_16 = arith.constant 0 : index
    %c0_17 = arith.constant 0 : index
    %34 = memref.load %arg7[%c0_16, %c0_17] : memref<1x2xf32, #tpu.memory_space<smem>>
    %35 = vector.broadcast %34 : f32 to vector<8x16xf32>
    %36 = arith.addf %33, %35 : vector<8x16xf32>
    %c1 = arith.constant 1 : index
    %c0_18 = arith.constant 0 : index
    %37 = vector.load %arg6[%c1, %c0_18] : memref<2x128xf32, #tpu.memory_space<vmem>>, vector<1x128xf32>
    %38 = vector.shape_cast %37 : vector<1x128xf32> to vector<128xf32>
    %39 = vector.shape_cast %38 : vector<128xf32> to vector<1x1x128xf32>
    %40 = vector.broadcast %39 : vector<1x1x128xf32> to vector<8x16x128xf32>
    %41 = arith.mulf %26, %40 : vector<8x16x128xf32>
    %cst_19 = arith.constant dense<0.000000e+00> : vector<8x16xf32>
    %42 = vector.multi_reduction <add>, %41, %cst_19 [2] : vector<8x16x128xf32> to vector<8x16xf32>
    %c0_20 = arith.constant 0 : index
    %c1_21 = arith.constant 1 : index
    %43 = memref.load %arg7[%c0_20, %c1_21] : memref<1x2xf32, #tpu.memory_space<smem>>
    %44 = vector.broadcast %43 : f32 to vector<8x16xf32>
    %45 = arith.addf %42, %44 : vector<8x16xf32>
    %46 = vector.shape_cast %36 : vector<8x16xf32> to vector<8x1x16xf32>
    %47 = vector.shape_cast %45 : vector<8x16xf32> to vector<8x1x16xf32>
    %48 = tpu.concatenate %46, %47 in 1 : vector<8x1x16xf32>, vector<8x1x16xf32> -> vector<8x2x16xf32>
    %cst_22 = arith.constant dense<0xFF800000> : vector<8x2xf32>
    %49 = vector.multi_reduction <maximumf>, %48, %cst_22 [2] : vector<8x2x16xf32> to vector<8x2xf32>
    %50 = vector.shape_cast %49 : vector<8x2xf32> to vector<8x2x1xf32>
    %51 = vector.broadcast %50 : vector<8x2x1xf32> to vector<8x2x16xf32>
    %52 = arith.subf %48, %51 : vector<8x2x16xf32>
    %53 = math.exp %52 : vector<8x2x16xf32>
    %cst_23 = arith.constant dense<0.000000e+00> : vector<8x2xf32>
    %54 = vector.multi_reduction <add>, %53, %cst_23 [2] : vector<8x2x16xf32> to vector<8x2xf32>
    %55 = vector.shape_cast %54 : vector<8x2xf32> to vector<8x2x1xf32>
    %56 = vector.broadcast %55 : vector<8x2x1xf32> to vector<8x2x16xf32>
    %57 = arith.divf %53, %56 : vector<8x2x16xf32>
    %58 = tpu.transpose %27, [0, 2, 1] : vector<8x16x2xf32> -> vector<8x2x16xf32>
    %59 = arith.mulf %57, %58 : vector<8x2x16xf32>
    %cst_24 = arith.constant dense<0.000000e+00> : vector<8x2xf32>
    %60 = vector.multi_reduction <add>, %59, %cst_24 [2] : vector<8x2x16xf32> to vector<8x2xf32>
    %c0_25 = arith.constant 0 : index
    %c0_26 = arith.constant 0 : index
    %61 = vector.load %arg8[%c0_25, %c0_26] : memref<8x2xf32, #tpu.memory_space<vmem>>, vector<8x2xf32>
    tpu.vector_store %arg8[%c0_25, %c0_26], %60 {strides = array<i32>} : memref<8x2xf32, #tpu.memory_space<vmem>>, vector<8x2xf32>,
    %c0_27 = arith.constant 0 : index
    %c0_28 = arith.constant 0 : index
    %c0_29 = arith.constant 0 : index
    %62 = vector.load %arg9[%c0_27, %c0_28, %c0_29] : memref<8x2x16xf32, #tpu.memory_space<vmem>>, vector<8x2x16xf32>
    tpu.vector_store %arg9[%c0_27, %c0_28, %c0_29], %57 {strides = array<i32>} : memref<8x2x16xf32, #tpu.memory_space<vmem>>, vector<8x2x16xf32>,
    return
  }
  func.func @transform_0(%arg0: i32) -> (i32, i32, i32) {
    %c0_i32 = arith.constant 0 : i32
    %c0_i32_0 = arith.constant 0 : i32
    %c0_i32_1 = arith.constant 0 : i32
    return %arg0, %c0_i32, %c0_i32_0 : i32, i32, i32
  }
  func.func @transform_1(%arg0: i32) -> (i32, i32) {
    %c0_i32 = arith.constant 0 : i32
    %c0_i32_0 = arith.constant 0 : i32
    %c0_i32_1 = arith.constant 0 : i32
    return %c0_i32, %c0_i32_0 : i32, i32
  }
  func.func @transform_2(%arg0: i32) -> (i32, i32) {
    %c0_i32 = arith.constant 0 : i32
    %c0_i32_0 = arith.constant 0 : i32
    %c0_i32_1 = arith.constant 0 : i32
    return %c0_i32, %c0_i32_0 : i32, i32
  }
  func.func @transform_3(%arg0: i32) -> (i32, i32) {
    %c0_i32 = arith.constant 0 : i32
    %c0_i32_0 = arith.constant 0 : i32
    %c0_i32_1 = arith.constant 0 : i32
    return %c0_i32, %c0_i32_0 : i32, i32
  }
  func.func @transform_4(%arg0: i32) -> (i32, i32) {
    %c0_i32 = arith.constant 0 : i32
    %c0_i32_0 = arith.constant 0 : i32
    %c0_i32_1 = arith.constant 0 : i32
    return %c0_i32, %c0_i32_0 : i32, i32
  }
  func.func @transform_5(%arg0: i32) -> (i32, i32) {
    %c0_i32 = arith.constant 0 : i32
    %c0_i32_0 = arith.constant 0 : i32
    %c0_i32_1 = arith.constant 0 : i32
    return %c0_i32, %c0_i32_0 : i32, i32
  }
  func.func @transform_6(%arg0: i32) -> (i32, i32) {
    %c0_i32 = arith.constant 0 : i32
    %c0_i32_0 = arith.constant 0 : i32
    %c0_i32_1 = arith.constant 0 : i32
    return %c0_i32, %c0_i32_0 : i32, i32
  }
  func.func @transform_7(%arg0: i32) -> (i32, i32) {
    %c0_i32 = arith.constant 0 : i32
    %c0_i32_0 = arith.constant 0 : i32
    return %arg0, %c0_i32 : i32, i32
  }
  func.func @transform_8(%arg0: i32) -> (i32, i32, i32) {
    %c0_i32 = arith.constant 0 : i32
    %c0_i32_0 = arith.constant 0 : i32
    %c0_i32_1 = arith.constant 0 : i32
    return %arg0, %c0_i32, %c0_i32_0 : i32, i32, i32
  }
}

</mosaic_0001>

<bundles_post_ra>
// kernel: tpu_custom_call.1
= control target key start
LH: loop header
LB: loop body
LE: loop exit
PB: predicated region body
PF: predicated region fallthrough
CT: control target
= control target key end

     0   :  { %s9269_s0 = inlined_call_operand.hbm [shape: f32[32,16,768], index: 0, kind: input, shape index: {}]   ;;  %s9270_s1 = inlined_call_operand.hbm [shape: bf16[768,512], index: 1, kind: input, shape index: {}]   ;;  %s9271_s2 = inlined_call_operand.hbm [shape: f32[1,512], index: 2, kind: input, shape index: {}]   ;;  %s9272_s3 = inlined_call_operand.hbm [shape: bf16[512,384], index: 3, kind: input, shape index: {}]   ;;  %s9273_s4 = inlined_call_operand.hbm [shape: f32[1,384], index: 4, kind: input, shape index: {}]   ;;  %s9274_s5 = inlined_call_operand.hbm [shape: f32[2,128], index: 5, kind: input, shape index: {}]   ;;  %s9275_s6 = inlined_call_operand.hbm [shape: f32[1,2], index: 6, kind: input, shape index: {}]   ;;  %s9276_s7 = inlined_call_operand.vmem [shape: f32[32,2], index: 7, kind: output, shape index: {0}]   ;;  %s9277_s8 = inlined_call_operand.vmem [shape: f32[32,2,16], index: 8, kind: output, shape index: {1}]  }
   0x1   :  { %9345 = sst [smem:[#allocation52_spill]] %s9270_s1 }
   0x2   :  { %14 = vsyncpa [#allocation3], 0 }
   0x3   :  { %16 = vsyncpa [#allocation3 + $0x1], 0 }
   0x4   :  { %17 = vsyncpa [#allocation6], 0 }
   0x5   :  { %18 = vsyncpa [#allocation9], 0 }
   0x6   :  { %19 = vsyncpa [#allocation12], 0 }
   0x7   :  { %20 = vsyncpa [#allocation4], 0  ;;  %s7538_s27 = smov 0   ;;  %s7540_s28 = smov 0  }
   0x8   :  { %s7542_s29 = smov 0   ;;  %s7544_s30 = smov 0  }
   0x9 LB: > { %s9346_s1 = sld [smem:[#allocation52_spill]]  ;;  %s7562_s12 = sadd.s32 4294967295, %s7479_s30   ;;  %s7479_s30 = sphi %s7544_s30, %s9451_s30   ;;  %s7475_s29 = sphi %s7542_s29, %s9450_s29   ;;  %s7471_s28 = sphi %s7540_s28, %s9449_s28   ;;  %s7467_s27 = sphi %s7538_s27, %s9448_s27  }
   0xa   : > { %p5510_p0 = scmp.ge.s32.totalorder %s7479_s30, 1  ;;  %p47_p1 = scmp.eq.s32.totalorder %s7562_s12, 0 }
   0xb   : > { %p235_p2 = scmp.lt.s32.totalorder %s7479_s30, 5  ;;  %s7481_s14 = smov [#allocation5]  }
   0xc   : > { %s248_s15 = sshll.u32 %s7481_s14, 4  ;;  %s272_s18 = sshll.u32 %s9272_s3, 4  ;;  %s249_s15 = int_to_ptr.vmem [resolvable:$true] %s248_s15  ;;  %s273_s18 = int_to_ptr.hbm [resolvable:$true] %s272_s18 }
   0xd   : > { %p7567_p3 = pnand %p5510_p0, %p235_p2  ;;  %s7482_s20 = smov [#allocation8]  }
   0xe   : > { %s274_s21 = sshll.u32 %s7482_s20, 4  ;;  %s7483_s22 = smov 256   ;;  %s275_s21 = int_to_ptr.vmem [resolvable:$true] %s274_s21 }
   0xf   : > { %s246_s11 = sshll.u32 %s9346_s1, 4  ;;  %p7019_p4 = pneg %p7567_p3  ;;  %s247_s11 = int_to_ptr.hbm [resolvable:$true] %s246_s11 }
  0x10   : > { %s7484_s23 = smov 16   ;;  %s7485_s24 = smov 192  }
  0x11   : > { %p7578_p5 = pnand %p7019_p4, %p47_p1  ;;  %s7486_s25 = smov 12  }
  0x12   : > { %s261_s10 = sshll.u32 %s9271_s2, 4  ;;  %s7487_s14 = smov [#allocation7]   ;;  %s262_s10 = int_to_ptr.hbm [resolvable:$true] %s261_s10 }
  0x13   : > { %7022 = dma.hbm_to_vmem [thread:$0]  (!%p7578_p5), %s247_s11, 24576, %s249_s15, [#allocation6], %s7483_s22, %s7483_s22, %s7484_s23  }
  0x14   : > { %7028 = dma.hbm_to_vmem [thread:$0]  (!%p7578_p5), %s273_s18, 12288, %s275_s21, [#allocation9], %s7485_s24, %s7485_s24, %s7486_s25  }
  0x15   : > { %s263_s16 = sshll.u32 %s7487_s14, 4  ;;  %s287_s1 = sshll.u32 %s9273_s4, 4  ;;  %s264_s16 = int_to_ptr.vmem [resolvable:$true] %s263_s16  ;;  %s288_s1 = int_to_ptr.hbm [resolvable:$true] %s287_s1 }
  0x16   : > { %7025 = dma.hbm_to_vmem [thread:$0]  (!%p7578_p5), %s262_s10, 64, %s264_s16, [#allocation6]  }
  0x17   : > { %s7488_s11 = smov [#allocation10]   ;;  %s299_s22 = sshll.u32 %s9274_s5, 4  ;;  %s300_s22 = int_to_ptr.hbm [resolvable:$true] %s299_s22 }
  0x18   : > { %s289_s15 = sshll.u32 %s7488_s11, 4  ;;  %s311_s25 = sshll.u32 %s9275_s6, 4  ;;  %s290_s15 = int_to_ptr.vmem [resolvable:$true] %s289_s15  ;;  %s312_s25 = int_to_ptr.hbm [resolvable:$true] %s311_s25 }
  0x19   : > { %7031 = dma.hbm_to_vmem [thread:$0]  (!%p7578_p5), %s288_s1, 48, %s290_s15, [#allocation9]  }
  0x1a   : > { %s7489_s26 = smov [#allocation11]   ;;  %s7490_s10 = smov [#allocation13]  }
  0x1b   : > { %s301_s9 = sshll.u32 %s7489_s26, 4  ;;  %s7607_s14 = sadd.s32 1, %s7479_s30   ;;  %s302_s9 = int_to_ptr.vmem [resolvable:$true] %s301_s9 }
  0x1c   : > { %7034 = dma.hbm_to_vmem [thread:$0]  (!%p7578_p5), %s300_s22, 32, %s302_s9, [#allocation12]  }
  0x1d   : > { %7037 = dma.hbm_to_smem (!%p7578_p5), %s312_s25, 16, %s7490_s10, [#allocation4]  }
  0x1e   : > { %s33_s1 = sadd.s32 1, %s7475_s29  ;;  %s30_s16 = ssub.s32 %s7479_s30, %s7607_s14 }
  0x1f   : > { %p40_p6 = scmp.ne.s32.totalorder %s7475_s29, %s7471_s28  ;;  %p31_p7 = scmp.eq.s32.totalorder %s30_s16, 0 }
  0x20   : > { %p41_p8 = scmp.eq.s32.totalorder %s7479_s30, 0  ;;  %p46_p9 = scmp.ne.s32.totalorder %s7471_s28, %s7467_s27 }
  0x21   : > { %p7048_p10 = scmp.lt.s32.totalorder %s7479_s30, 4  ;;  %s322_s19 = sand.u32 1, %s7475_s29  }
  0x22   : > { %s7619_s17 = scalar_select %p31_p7, %s7475_s29, %s33_s1  }
  0x23   : > { %p42_p11 = por %p41_p8, %p40_p6  ;;  %p7623_p12 = por %p47_p1, %p46_p9 }
  0x24   : > { %s6991_s11 = smul.u32 768, %s7479_s30  ;;  %s323_s26 = scalar_lea.sflag [#allocation3], %s322_s19 }
  0x25   : > { %s6990_s15 = smul.u32 768, %s322_s19  ;;  %p7632_p13 = pnand %p7048_p10, %p42_p11 }
  0x26   : > { %s332_s22 = scalar_lea.hbm %s9269_s0, %s6991_s11  ;;  %s7406_s16 = scalar_lea.hbm %s9269_s0, 3072 }
  0x27   : > { %s333_s27 = sshll.u32 %s332_s22, 4  ;;  %s326_s24 = scalar_lea.vmem [#allocation2], %s6990_s15  ;;  %s334_s27 = int_to_ptr.hbm [resolvable:$true] %s333_s27 }
  0x28   : > { %s335_s25 = sshll.u32 %s326_s24, 4  ;;  %s7399_s9 = sshra.s32 %s334_s27, 4  ;;  %s336_s25 = int_to_ptr.vmem [resolvable:$true] %s335_s25  ;;  %s7400_s9 = int_to_ptr.hbm [resolvable:$true] %s7399_s9 }
  0x29   : > { %s7401_s10 = scalar_lea.hbm %s7400_s9, 768  ;;  %p7403_p2 = pneg %p7632_p13 }
  0x2a   : > { %p7402_p0 = scmp.ne.s32.totalorder %s7400_s9, %s7401_s10  ;;  %p7407_p6 = scmp.lt.s32.totalorder %s7400_s9, %s9269_s0 }
  0x2b   : > { %p7408_p7 = scmp.lt.s32.totalorder %s7406_s16, %s7401_s10 }
  0x2c   : > { %p7404_p4 = pnand %p7403_p2, %p7402_p0 }
  0x2d   : > { %p7409_p8 = por %p7408_p7, %p7407_p6 }
  0x2e   : > { %p7405_p5 = pneg %p7404_p4 }
  0x30   : > { %p7410_p9 = pnand %p7409_p8, %p7405_p5 }
  0x32   : > { %7413 = shalt.err (!%p7410_p9)
}
  0x33   : > { %s7491_s19 = smov 768   ;;  %s7492_s15 = smov 48  }
  0x34   : > { %7041 = dma.hbm_to_vmem [thread:$0]  (!%p7632_p13), %s334_s27, 12288, %s336_s25, %s323_s26, %s7491_s19, %s7491_s19, %s7492_s15  }
  0x35   : > { %347 = sbr.rel (%p7567_p3) target bundleno = 2082 (0x822), region = 48 }
  0x3a   : > { %s349_s21 = sand.u32 1, %s7471_s28  }
  0x3b   : > { %s6992_s22 = smul.u32 768, %s349_s21  ;;  %s350_s24 = scalar_lea.sflag [#allocation3], %s349_s21 }
  0x3d   : > { %s7649_s30 = scalar_lea.vmem [#allocation2], %s6992_s22 }
  0x3e   : > { %7446 = dma.done.wait (%p7623_p12), %s350_s24, 12288  }
  0x3f   : > { %7448 = vsyncadd (%p7623_p12), %s350_s24, 4294955008 }
  0x40   : > { %7450 = dma.done.wait (%p47_p1), [#allocation6], 24640  }
  0x41   : > { %7452 = vsyncadd (%p47_p1), [#allocation6], 4294942656 }
  0x42   : > { %7454 = dma.done.wait (%p47_p1), [#allocation9], 12336  }
  0x43   : > { %7456 = vsyncadd (%p47_p1), [#allocation9], 4294954960 }
  0x44   : > { %7458 = dma.done.wait (%p47_p1), [#allocation12], 32  }
  0x45   : > { %7460 = vsyncadd (%p47_p1), [#allocation12], 4294967264 }
  0x46   : > { %7462 = dma.done.wait (%p47_p1), [#allocation4], 16  }
  0x47   : > { %7464 = vsyncadd (%p47_p1), [#allocation4], 4294967280 }
  0x48   : > { %389 = sfence }
  0x49   : > { %v5645_v0 = vld [vmem:[#allocation5 + $0xe0] sm:$0xf]  ;;  %v6732_v1 = vld [vmem:[#allocation5 + $0xec] sm:$0xf0]  ;;  %s6699_s13 = sld [smem:[#allocation13 + $0x1]]  ;;  %s5529_s23 = sshll.u32 %s7562_s12, 3 }
  0x4a   : > { %v5773_v2 = vld [vmem:[#allocation5 + $0x1e0] sm:$0xf]  ;;  %v5646_v3 = vor.u32 %v6732_v1, %v5645_v0  ;;  %v6764_v4 = vld [vmem:[#allocation5 + $0x1ec] sm:$0xf0]  ;;  %s4633_s20 = sld [smem:[#allocation13]]  ;;  %p428_p1 = scmp.lt.s32.totalorder %s5529_s23, 31 }
  0x4b   : > { %v5901_v5 = vld [vmem:[#allocation5 + $0x2e0] sm:$0xf]  ;;  %v6796_v6 = vld [vmem:[#allocation5 + $0x2ec] sm:$0xf0]  ;;  %v5774_v7 = vor.u32 %v6764_v4, %v5773_v2  ;;  %p423_p3 = scmp.lt.s32.totalorder %s7562_s12, 3 }
  0x4c   : > { %v5902_v8 = vor.u32 %v6796_v6, %v5901_v5  ;;  %v6029_v9 = vld [vmem:[#allocation5 + $0x3e0] sm:$0xf]  ;;  %v6828_v10 = vld [vmem:[#allocation5 + $0x3ec] sm:$0xf0]  ;;  %1739 = vmatpush.bf16.msra.mxu0 %v5646_v3  ;;  %s9453_s23 = smov (!%p428_p1, %s5529_s23), 31 }
  0x4d   : > { %v5629_v11 = vld [vmem:[#allocation5 + $0xc0] sm:$0xf]  ;;  %v6030_v12 = vor.u32 %v6828_v10, %v6029_v9  ;;  %v6728_v13 = vld [vmem:[#allocation5 + $0xcc] sm:$0xf0]  ;;  %1788 = vmatpush.bf16.msra.mxu1 %v5774_v7  ;;  %s5530_s27 = sshll.u32 %s9453_s23, 1  ;;  %s9455_s12 = smov (!%p423_p3, %s7562_s12), 3 }
  0x4e   : > { %v5757_v14 = vld [vmem:[#allocation5 + $0x1c0] sm:$0xf]  ;;  %v6760_v15 = vld [vmem:[#allocation5 + $0x1cc] sm:$0xf0]  ;;  %1837 = vmatpush.bf16.msra.mxu2 %v5902_v8  ;;  %v5630_v16 = vor.u32 %v6728_v13, %v5629_v11  ;;  %s9133_s9 = scalar_lea.vmem %s9277_s8, %s5530_s27  ;;  %s5528_s10 = sshll.u32 %s9455_s12, 3 }
  0x4f   : > { %v5758_v17 = vor.u32 %v6760_v15, %v5757_v14  ;;  %v5885_v18 = vld [vmem:[#allocation5 + $0x2c0] sm:$0xf]  ;;  %v6792_v19 = vld [vmem:[#allocation5 + $0x2cc] sm:$0xf0]  ;;  %1886 = vmatpush.bf16.msra.mxu3 %v6030_v12  ;;  %s426_s11 = scalar_lea.vmem %s9276_s7, %s5528_s10 }
  0x50   : > { %v6013_v20 = vld [vmem:[#allocation5 + $0x3c0] sm:$0xf]  ;;  %v5886_v21 = vor.u32 %v6792_v19, %v5885_v18  ;;  %v6824_v22 = vld [vmem:[#allocation5 + $0x3cc] sm:$0xf0]  ;;  %1740 = vmatpush.bf16.msra.mxu0 %v5630_v16 }
  0x51   : > { %v5613_v23 = vld [vmem:[#allocation5 + $0xa0] sm:$0xf]  ;;  %v6724_v24 = vld [vmem:[#allocation5 + $0xac] sm:$0xf0]  ;;  %v6014_v25 = vor.u32 %v6824_v22, %v6013_v20  ;;  %1789 = vmatpush.bf16.msra.mxu1 %v5758_v17 }
  0x52   : > { %v5741_v26 = vld [vmem:[#allocation5 + $0x1a0] sm:$0xf]  ;;  %v6756_v27 = vld [vmem:[#allocation5 + $0x1ac] sm:$0xf0]  ;;  %v5614_v29 = vor.u32 %v6724_v24, %v5613_v23  ;;  %1838 = vmatpush.bf16.msra.mxu2 %v5886_v21 }
  0x53   : > { %v5869_v28 = vld [vmem:[#allocation5 + $0x2a0] sm:$0xf]  ;;  %v6788_v30 = vld [vmem:[#allocation5 + $0x2ac] sm:$0xf0]  ;;  %v5742_v33 = vor.u32 %v6756_v27, %v5741_v26  ;;  %1887 = vmatpush.bf16.msra.mxu3 %v6014_v25 }
  0x54   : > { %v5997_v31 = vld [vmem:[#allocation5 + $0x3a0] sm:$0xf]  ;;  %v6820_v32 = vld [vmem:[#allocation5 + $0x3ac] sm:$0xf0]  ;;  %v5870_v34 = vor.u32 %v6788_v30, %v5869_v28  ;;  %1741 = vmatpush.bf16.msra.mxu0 %v5614_v29  ;;  %v434_v30 = vld [vmem:[%s7649_s30 + $0x8] sm:$0xff] }
  0x55   : > { %v5597_v35 = vld [vmem:[#allocation5 + $0x80] sm:$0xf]  ;;  %v6720_v36 = vld [vmem:[#allocation5 + $0x8c] sm:$0xf0]  ;;  %v5998_v38 = vor.u32 %v6820_v32, %v5997_v31  ;;  %1790 = vmatpush.bf16.msra.mxu1 %v5742_v33  ;;  %v440_v31 = vld [vmem:[%s7649_s30 + $0x38] sm:$0xff] }
  0x56   : > { %v5725_v37 = vld [vmem:[#allocation5 + $0x180] sm:$0xf]  ;;  %v6752_v39 = vld [vmem:[#allocation5 + $0x18c] sm:$0xf0]  ;;  %v5598_v44 = vor.u32 %v6720_v36, %v5597_v35  ;;  %1839 = vmatpush.bf16.msra.mxu2 %v5870_v34  ;;  %v6730_v32 = vld [vmem:[#allocation5 + $0xe4] sm:$0xf] }
  0x57   : > { %v5853_v40 = vld [vmem:[#allocation5 + $0x280] sm:$0xf]  ;;  %v6784_v41 = vld [vmem:[#allocation5 + $0x28c] sm:$0xf0]  ;;  %v5726_v45 = vor.u32 %v6752_v39, %v5725_v37  ;;  %1888 = vmatpush.bf16.msra.mxu3 %v5998_v38  ;;  %v5647_v33 = vld [vmem:[#allocation5 + $0xf0] sm:$0xf0] }
  0x58   : > { %v5981_v42 = vld [vmem:[#allocation5 + $0x380] sm:$0xf]  ;;  %v6816_v43 = vld [vmem:[#allocation5 + $0x38c] sm:$0xf0]  ;;  %v5854_v46 = vor.u32 %v6784_v41, %v5853_v40  ;;  %1742 = vmatpush.bf16.msra.mxu0 %v5598_v44  ;;  %v6762_v36 = vld [vmem:[#allocation5 + $0x1e4] sm:$0xf]  ;;  %v5650_v44 = vor.u32 %v6730_v32, %v5647_v33 }
  0x59   : > { %v5581_v47 = vld [vmem:[#allocation5 + $0x60] sm:$0xf]  ;;  %v6716_v48 = vld [vmem:[#allocation5 + $0x6c] sm:$0xf0]  ;;  %v5982_v50 = vor.u32 %v6816_v43, %v5981_v42  ;;  %1791 = vmatpush.bf16.msra.mxu1 %v5726_v45  ;;  %v5775_v37 = vld [vmem:[#allocation5 + $0x1f0] sm:$0xf0] }
  0x5a   : > { %v5709_v49 = vld [vmem:[#allocation5 + $0x160] sm:$0xf]  ;;  %v6748_v51 = vld [vmem:[#allocation5 + $0x16c] sm:$0xf0]  ;;  %v5582_v56 = vor.u32 %v6716_v48, %v5581_v47  ;;  %1840 = vmatpush.bf16.msra.mxu2 %v5854_v46  ;;  %v436_v41 = vld [vmem:[%s7649_s30 + $0x18] sm:$0xff] }
  0x5b   : > { %v5837_v52 = vld [vmem:[#allocation5 + $0x260] sm:$0xf]  ;;  %v6780_v53 = vld [vmem:[#allocation5 + $0x26c] sm:$0xf0]  ;;  %v5710_v57 = vor.u32 %v6748_v51, %v5709_v49  ;;  %1889 = vmatpush.bf16.msra.mxu3 %v5982_v50  ;;  %v442_v42 = vld [vmem:[%s7649_s30 + $0x48] sm:$0xff]  ;;  %v5778_v49 = vor.u32 %v6762_v36, %v5775_v37 }
  0x5c   : > { %v5965_v54 = vld [vmem:[#allocation5 + $0x360] sm:$0xf]  ;;  %v6812_v55 = vld [vmem:[#allocation5 + $0x36c] sm:$0xf0]  ;;  %v5838_v58 = vor.u32 %v6780_v53, %v5837_v52  ;;  %1743 = vmatpush.bf16.msra.mxu0 %v5582_v56  ;;  %v6726_v51 = vld [vmem:[#allocation5 + $0xc4] sm:$0xf]  ;;  %v7681_v53 = vpack.c.bf16 %v440_v31, %v434_v30 }
  0x5d   : > { %v5565_v59 = vld [vmem:[#allocation5 + $0x40] sm:$0xf]  ;;  %v6712_v60 = vld [vmem:[#allocation5 + $0x4c] sm:$0xf0]  ;;  %v5966_v62 = vor.u32 %v6812_v55, %v5965_v54  ;;  %1792 = vmatpush.bf16.msra.mxu1 %v5710_v57  ;;  %v5631_v52 = vld [vmem:[#allocation5 + $0xd0] sm:$0xf0]  ;;  %v7685_v57 = vpack.c.bf16 %v442_v42, %v436_v41 }
  0x5e   : > { %v5693_v61 = vld [vmem:[#allocation5 + $0x140] sm:$0xf]  ;;  %v6744_v63 = vld [vmem:[#allocation5 + $0x14c] sm:$0xf0]  ;;  %v5566_v4 = vor.u32 %v6712_v60, %v5565_v59  ;;  %1841 = vmatpush.bf16.msra.mxu2 %v5838_v58  ;;  %9352 = vst [vmem:[#allocation20_spill] sm:$0xff] %v7681_v53  ;;  %v5634_v60 = vor.u32 %v6726_v51, %v5631_v52  ;;  %v458_v42 = vld [vmem:[%s7649_s30 + $0xc8] sm:$0xff] }
  0x5f   : > { %v5821_v0 = vld [vmem:[#allocation5 + $0x240] sm:$0xf]  ;;  %v6776_v1 = vld [vmem:[#allocation5 + $0x24c] sm:$0xf0]  ;;  %v5694_v6 = vor.u32 %v6744_v63, %v5693_v61  ;;  %1890 = vmatpush.bf16.msra.mxu3 %v5966_v62  ;;  %v6758_v55 = vld [vmem:[#allocation5 + $0x1c4] sm:$0xf] }
  0x60   : > { %v5949_v2 = vld [vmem:[#allocation5 + $0x340] sm:$0xf]  ;;  %v6808_v3 = vld [vmem:[#allocation5 + $0x34c] sm:$0xf0]  ;;  %v5822_v7 = vor.u32 %v6776_v1, %v5821_v0  ;;  %1744 = vmatpush.bf16.msra.mxu0 %v5566_v4  ;;  %v5759_v56 = vld [vmem:[#allocation5 + $0x1d0] sm:$0xf0] }
  0x61   : > { %v5549_v5 = vld [vmem:[#allocation5 + $0x20] sm:$0xf]  ;;  %v6708_v8 = vld [vmem:[#allocation5 + $0x2c] sm:$0xf0]  ;;  %v5950_v11 = vor.u32 %v6808_v3, %v5949_v2  ;;  %1793 = vmatpush.bf16.msra.mxu1 %v5694_v6  ;;  %9353 = vst [vmem:[#allocation21_spill] sm:$0xff] %v7685_v57  ;;  %v5762_v63 = vor.u32 %v6758_v55, %v5759_v56 }
  0x62   : > { %v5677_v9 = vld [vmem:[#allocation5 + $0x120] sm:$0xf]  ;;  %v6740_v10 = vld [vmem:[#allocation5 + $0x12c] sm:$0xf0]  ;;  %v5550_v17 = vor.u32 %v6708_v8, %v5549_v5  ;;  %1842 = vmatpush.bf16.msra.mxu2 %v5822_v7  ;;  %v6722_v3 = vld [vmem:[#allocation5 + $0xa4] sm:$0xf] }
  0x63   : > { %v5805_v12 = vld [vmem:[#allocation5 + $0x220] sm:$0xf]  ;;  %v6772_v13 = vld [vmem:[#allocation5 + $0x22c] sm:$0xf0]  ;;  %v5678_v21 = vor.u32 %v6740_v10, %v5677_v9  ;;  %1891 = vmatpush.bf16.msra.mxu3 %v5950_v11  ;;  %v5615_v4 = vld [vmem:[#allocation5 + $0xb0] sm:$0xf0] }
  0x64   : > { %v5933_v14 = vld [vmem:[#allocation5 + $0x320] sm:$0xf]  ;;  %v6804_v15 = vld [vmem:[#allocation5 + $0x32c] sm:$0xf0]  ;;  %v5806_v22 = vor.u32 %v6772_v13, %v5805_v12  ;;  %1745 = vmatpush.bf16.msra.mxu0 %v5550_v17  ;;  %v5618_v7 = vor.u32 %v6722_v3, %v5615_v4  ;;  %v6754_v9 = vld [vmem:[#allocation5 + $0x1a4] sm:$0xf] }
  0x65   : > { %v5533_v16 = vld [vmem:[#allocation5] sm:$0xf]  ;;  %v6704_v18 = vld [vmem:[#allocation5 + $0xc] sm:$0xf0]  ;;  %v5934_v26 = vor.u32 %v6804_v15, %v5933_v14  ;;  %1794 = vmatpush.bf16.msra.mxu1 %v5678_v21  ;;  %v5743_v10 = vld [vmem:[#allocation5 + $0x1b0] sm:$0xf0] }
  0x66   : > { %v5661_v19 = vld [vmem:[#allocation5 + $0x100] sm:$0xf]  ;;  %v6736_v20 = vld [vmem:[#allocation5 + $0x10c] sm:$0xf0]  ;;  %v5534_v34 = vor.u32 %v6704_v18, %v5533_v16  ;;  %1843 = vmatpush.bf16.msra.mxu2 %v5806_v22  ;;  %v5746_v11 = vor.u32 %v6754_v9, %v5743_v10  ;;  %v446_v18 = vld [vmem:[%s7649_s30 + $0x68] sm:$0xff] }
  0x67   : > { %v5789_v23 = vld [vmem:[#allocation5 + $0x200] sm:$0xf]  ;;  %v6768_v24 = vld [vmem:[#allocation5 + $0x20c] sm:$0xf0]  ;;  %v5662_v38 = vor.u32 %v6736_v20, %v5661_v19  ;;  %1892 = vmatpush.bf16.msra.mxu3 %v5934_v26  ;;  %v452_v19 = vld [vmem:[%s7649_s30 + $0x98] sm:$0xff] }
  0x68   : > { %v5917_v25 = vld [vmem:[#allocation5 + $0x300] sm:$0xf]  ;;  %v6800_v27 = vld [vmem:[#allocation5 + $0x30c] sm:$0xf0]  ;;  %v5790_v39 = vor.u32 %v6768_v24, %v5789_v23  ;;  %1746 = vmatpush.bf16.msra.mxu0 %v5534_v34  ;;  %v448_v22 = vld [vmem:[%s7649_s30 + $0x78] sm:$0xff] }
  0x69   : > { %v433_v28 = vld [vmem:[%s7649_s30] sm:$0xff]  ;;  %v439_v29 = vld [vmem:[%s7649_s30 + $0x30] sm:$0xff]  ;;  %v5918_v43 = vor.u32 %v6800_v27, %v5917_v25  ;;  %1795 = vmatpush.bf16.msra.mxu1 %v5662_v38  ;;  %v454_v23 = vld [vmem:[%s7649_s30 + $0xa8] sm:$0xff]  ;;  %v7701_v25 = vpack.c.bf16 %v452_v19, %v446_v18 }
  0x6a   : > { %v435_v35 = vld [vmem:[%s7649_s30 + $0x10] sm:$0xff]  ;;  %v441_v40 = vld [vmem:[%s7649_s30 + $0x40] sm:$0xff]  ;;  %v7679_v48 = vpack.c.bf16 %v439_v29, %v433_v28  ;;  %1844 = vmatpush.bf16.msra.mxu2 %v5790_v39  ;;  %v7705_v27 = vpack.c.bf16 %v454_v23, %v448_v22  ;;  %v472_v10 = vld [vmem:[%s7649_s30 + $0x138] sm:$0xff] }
  0x6b   : > { %v6157_v45 = vld [vmem:[#allocation5 + $0x4e0] sm:$0xf]  ;;  %v6860_v46 = vld [vmem:[#allocation5 + $0x4ec] sm:$0xf0]  ;;  %v7683_v54 = vpack.c.bf16 %v441_v40, %v435_v35  ;;  %1893 = vmatpush.bf16.msra.mxu3 %v5918_v43  ;;  %9355 = vst [vmem:[#allocation23_spill] sm:$0xff] %v7701_v25  ;;  %v464_v43 = vld [vmem:[%s7649_s30 + $0xf8] sm:$0xff] }
  0x6c   : > { %v6285_v47 = vld [vmem:[#allocation5 + $0x5e0] sm:$0xf]  ;;  %9351 = vst [vmem:[#allocation19_spill] sm:$0xff] %v7679_v48  ;;  %v6892_v50 = vld [vmem:[#allocation5 + $0x5ec] sm:$0xf0]  ;;  %v6158_v58 = vor.u32 %v6860_v46, %v6157_v45  ;;  %1747 = vmatmul.bf16.vlgmr.msra.gmra.mxu0 %v7679_v48  ;;  %1796 = vmatmul.bf16.vlgmr.msra.gmra.mxu1 %v7681_v53  ;;  %v460_v46 = vld [vmem:[%s7649_s30 + $0xd8] sm:$0xff] }
  0x6d   : > { %v6286_v59 = vor.u32 %v6892_v50, %v6285_v47  ;;  %v6141_v61 = vld [vmem:[#allocation5 + $0x4c0] sm:$0xf]  ;;  %v6856_v62 = vld [vmem:[#allocation5 + $0x4cc] sm:$0xf0]  ;;  %1845 = vmatmul.bf16.vlgmr.msra.gmra.mxu2 %v7683_v54  ;;  %v6718_v28 = vld [vmem:[#allocation5 + $0x84] sm:$0xf]  ;;  %v7721_v50 = vpack.c.bf16 %v464_v43, %v458_v42 }
  0x6e   : > { %2033 = vmatpush.bf16.msrb.mxu2 %v5650_v44  ;;  %v6269_v0 = vld [vmem:[#allocation5 + $0x5c0] sm:$0xf]  ;;  %v6888_v1 = vld [vmem:[#allocation5 + $0x5cc] sm:$0xf0]  ;;  %1894 = vmatmul.bf16.vlgmr.msra.gmra.mxu3 %v7685_v57  ;;  %v6142_v2 = vor.u32 %v6856_v62, %v6141_v61  ;;  %v5599_v29 = vld [vmem:[#allocation5 + $0x90] sm:$0xf0] }
  0x6f   : > { %2082 = vmatpush.bf16.msrb.mxu3 %v5778_v49  ;;  %1935 = vmatpush.bf16.msrb.mxu0 %v6158_v58  ;;  %v6125_v5 = vld [vmem:[#allocation5 + $0x4a0] sm:$0xf]  ;;  %v6270_v6 = vor.u32 %v6888_v1, %v6269_v0  ;;  %v6852_v8 = vld [vmem:[#allocation5 + $0x4ac] sm:$0xf0]  ;;  %v5602_v31 = vor.u32 %v6718_v28, %v5599_v29  ;;  %v6750_v33 = vld [vmem:[#allocation5 + $0x184] sm:$0xf] }
  0x70   : > { %1984 = vmatpush.bf16.msrb.mxu1 %v6286_v59  ;;  %v6253_v12 = vld [vmem:[#allocation5 + $0x5a0] sm:$0xf]  ;;  %v6884_v13 = vld [vmem:[#allocation5 + $0x5ac] sm:$0xf0]  ;;  %v6126_v14 = vor.u32 %v6852_v8, %v6125_v5  ;;  %v5727_v34 = vld [vmem:[#allocation5 + $0x190] sm:$0xf0] }
  0x71   : > { %v6254_v15 = vor.u32 %v6884_v13, %v6253_v12  ;;  %v445_v16 = vld [vmem:[%s7649_s30 + $0x60] sm:$0xff]  ;;  %v451_v17 = vld [vmem:[%s7649_s30 + $0x90] sm:$0xff]  ;;  %v5730_v36 = vor.u32 %v6750_v33, %v5727_v34  ;;  %v466_v47 = vld [vmem:[%s7649_s30 + $0x108] sm:$0xff]  ;;  %9357 = vst [vmem:[#allocation25_spill] sm:$0xff] %v7721_v50 }
  0x72   : > { %2034 = vmatpush.bf16.msrb.mxu2 %v5634_v60  ;;  %v447_v20 = vld [vmem:[%s7649_s30 + $0x70] sm:$0xff]  ;;  %v453_v21 = vld [vmem:[%s7649_s30 + $0xa0] sm:$0xff]  ;;  %v7699_v24 = vpack.c.bf16 %v451_v17, %v445_v16  ;;  %v7725_v52 = vpack.c.bf16 %v466_v47, %v460_v46  ;;  %v482_v34 = vld [vmem:[%s7649_s30 + $0x188] sm:$0xff] }
  0x73   : > { %2083 = vmatpush.bf16.msrb.mxu3 %v5762_v63  ;;  %1936 = vmatpush.bf16.msrb.mxu0 %v6142_v2  ;;  %v7703_v26 = vpack.c.bf16 %v453_v21, %v447_v20  ;;  %v6109_v30 = vld [vmem:[#allocation5 + $0x480] sm:$0xf]  ;;  %v6848_v32 = vld [vmem:[#allocation5 + $0x48c] sm:$0xf0]  ;;  %v6714_v55 = vld [vmem:[#allocation5 + $0x64] sm:$0xf] }
  0x74   : > { %1985 = vmatpush.bf16.msrb.mxu1 %v6270_v6  ;;  %9354 = vst [vmem:[#allocation22_spill] sm:$0xff] %v7699_v24  ;;  %v6110_v35 = vor.u32 %v6848_v32, %v6109_v30  ;;  %v6237_v37 = vld [vmem:[#allocation5 + $0x580] sm:$0xf]  ;;  %v6880_v38 = vld [vmem:[#allocation5 + $0x58c] sm:$0xf0]  ;;  %v470_v6 = vld [vmem:[%s7649_s30 + $0x128] sm:$0xff] }
  0x75   : > { %v6238_v39 = vor.u32 %v6880_v38, %v6237_v37  ;;  %v457_v40 = vld [vmem:[%s7649_s30 + $0xc0] sm:$0xff]  ;;  %v463_v41 = vld [vmem:[%s7649_s30 + $0xf0] sm:$0xff]  ;;  %9358 = vst [vmem:[#allocation26_spill] sm:$0xff] %v7725_v52  ;;  %v484_v38 = vld [vmem:[%s7649_s30 + $0x198] sm:$0xff] }
  0x76   : > { %2035 = vmatpush.bf16.msrb.mxu2 %v5618_v7  ;;  %v459_v44 = vld [vmem:[%s7649_s30 + $0xd0] sm:$0xff]  ;;  %v465_v45 = vld [vmem:[%s7649_s30 + $0x100] sm:$0xff]  ;;  %v7719_v49 = vpack.c.bf16 %v463_v41, %v457_v40  ;;  %v476_v7 = vld [vmem:[%s7649_s30 + $0x158] sm:$0xff] }
  0x77   : > { %2084 = vmatpush.bf16.msrb.mxu3 %v5746_v11  ;;  %1937 = vmatpush.bf16.msrb.mxu0 %v6126_v14  ;;  %v7723_v51 = vpack.c.bf16 %v465_v45, %v459_v44  ;;  %v5583_v56 = vld [vmem:[#allocation5 + $0x70] sm:$0xf0]  ;;  %v6093_v58 = vld [vmem:[#allocation5 + $0x460] sm:$0xf]  ;;  %v6844_v60 = vld [vmem:[#allocation5 + $0x46c] sm:$0xf0]  ;;  %v7741_v13 = vpack.c.bf16 %v476_v7, %v470_v6 }
  0x78   : > { %1986 = vmatpush.bf16.msrb.mxu1 %v6254_v15  ;;  %9356 = vst [vmem:[#allocation24_spill] sm:$0xff] %v7719_v49  ;;  %v5586_v59 = vor.u32 %v6714_v55, %v5583_v56  ;;  %v6746_v61 = vld [vmem:[#allocation5 + $0x164] sm:$0xf]  ;;  %v5711_v62 = vld [vmem:[#allocation5 + $0x170] sm:$0xf0]  ;;  %v6094_v63 = vor.u32 %v6844_v60, %v6093_v58  ;;  %v478_v11 = vld [vmem:[%s7649_s30 + $0x168] sm:$0xff] }
  0x79   : > { %v5714_v0 = vor.u32 %v6746_v61, %v5711_v62  ;;  %v6221_v1 = vld [vmem:[#allocation5 + $0x560] sm:$0xf]  ;;  %v6876_v2 = vld [vmem:[#allocation5 + $0x56c] sm:$0xf0]  ;;  %9360 = vst [vmem:[#allocation28_spill] sm:$0xff] %v7741_v13  ;;  %v7745_v15 = vpack.c.bf16 %v478_v11, %v472_v10  ;;  %v496_v6 = vld [vmem:[%s7649_s30 + $0x1f8] sm:$0xff] }
  0x7a   : > { %2036 = vmatpush.bf16.msrb.mxu2 %v5602_v31  ;;  %v6222_v3 = vor.u32 %v6876_v2, %v6221_v1  ;;  %v469_v4 = vld [vmem:[%s7649_s30 + $0x120] sm:$0xff]  ;;  %v475_v5 = vld [vmem:[%s7649_s30 + $0x150] sm:$0xff]  ;;  %v494_v2 = vld [vmem:[%s7649_s30 + $0x1e8] sm:$0xff] }
  0x7b   : > { %1938 = vmatpush.bf16.msrb.mxu0 %v6110_v35  ;;  %2085 = vmatpush.bf16.msrb.mxu3 %v5730_v36  ;;  %v471_v8 = vld [vmem:[%s7649_s30 + $0x130] sm:$0xff]  ;;  %v477_v9 = vld [vmem:[%s7649_s30 + $0x160] sm:$0xff]  ;;  %v7739_v12 = vpack.c.bf16 %v475_v5, %v469_v4  ;;  %v488_v35 = vld [vmem:[%s7649_s30 + $0x1b8] sm:$0xff] }
  0x7c   : > { %1752 = vmatmul.bf16.gmra.mxu0 %v7699_v24  ;;  %1801 = vmatmul.bf16.gmra.mxu1 %v7701_v25  ;;  %v7743_v14 = vpack.c.bf16 %v477_v9, %v471_v8  ;;  %v6710_v16 = vld [vmem:[#allocation5 + $0x44] sm:$0xf]  ;;  %v5567_v17 = vld [vmem:[#allocation5 + $0x50] sm:$0xf0]  ;;  %v6077_v18 = vld [vmem:[#allocation5 + $0x440] sm:$0xf]  ;;  %v7761_v41 = vpack.c.bf16 %v488_v35, %v482_v34 }
  0x7d   : > { %1850 = vmatmul.bf16.gmra.mxu2 %v7703_v26  ;;  %1987 = vmatpush.bf16.msrb.mxu1 %v6238_v39  ;;  %9359 = vst [vmem:[#allocation27_spill] sm:$0xff] %v7739_v12  ;;  %v5570_v19 = vor.u32 %v6710_v16, %v5567_v17  ;;  %v6840_v20 = vld [vmem:[#allocation5 + $0x44c] sm:$0xf0]  ;;  %v6742_v21 = vld [vmem:[#allocation5 + $0x144] sm:$0xf]  ;;  %v490_v39 = vld [vmem:[%s7649_s30 + $0x1c8] sm:$0xff] }
  0x7e   : > { %1899 = vmatmul.bf16.gmra.mxu3 %v7705_v27  ;;  %2037 = vmatpush.bf16.msrb.mxu2 %v5586_v59  ;;  %v5695_v22 = vld [vmem:[#allocation5 + $0x150] sm:$0xf0]  ;;  %v6078_v23 = vor.u32 %v6840_v20, %v6077_v18  ;;  %v6205_v29 = vld [vmem:[#allocation5 + $0x540] sm:$0xf]  ;;  %v6872_v30 = vld [vmem:[#allocation5 + $0x54c] sm:$0xf0]  ;;  %v7765_v43 = vpack.c.bf16 %v490_v39, %v484_v38 }
  0x7f   : > { %1939 = vmatpush.bf16.msrb.mxu0 %v6094_v63  ;;  %2086 = vmatpush.bf16.msrb.mxu3 %v5714_v0  ;;  %v5698_v28 = vor.u32 %v6742_v21, %v5695_v22  ;;  %v6206_v31 = vor.u32 %v6872_v30, %v6205_v29  ;;  %v481_v32 = vld [vmem:[%s7649_s30 + $0x180] sm:$0xff]  ;;  %v487_v33 = vld [vmem:[%s7649_s30 + $0x1b0] sm:$0xff]  ;;  %9362 = vst [vmem:[#allocation30_spill] sm:$0xff] %v7761_v41  ;;  %v502_v7 = vld [vmem:[%s7649_s30 + $0x228] sm:$0xff] }
  0x80   : > { %v483_v36 = vld [vmem:[%s7649_s30 + $0x190] sm:$0xff]  ;;  %v489_v37 = vld [vmem:[%s7649_s30 + $0x1c0] sm:$0xff]  ;;  %v7759_v40 = vpack.c.bf16 %v487_v33, %v481_v32  ;;  %v7785_v11 = vpack.c.bf16 %v502_v7, %v496_v6  ;;  %v506_v34 = vld [vmem:[%s7649_s30 + $0x248] sm:$0xff] }
  0x81   : > { %1988 = vmatpush.bf16.msrb.mxu1 %v6222_v3  ;;  %v7763_v42 = vpack.c.bf16 %v489_v37, %v483_v36  ;;  %v6706_v44 = vld [vmem:[#allocation5 + $0x24] sm:$0xf]  ;;  %v5551_v45 = vld [vmem:[#allocation5 + $0x30] sm:$0xf0]  ;;  %v6061_v46 = vld [vmem:[#allocation5 + $0x420] sm:$0xf] }
  0x82   : > { %2038 = vmatpush.bf16.msrb.mxu2 %v5570_v19  ;;  %9361 = vst [vmem:[#allocation29_spill] sm:$0xff] %v7759_v40  ;;  %v5554_v47 = vor.u32 %v6706_v44, %v5551_v45  ;;  %v6836_v55 = vld [vmem:[#allocation5 + $0x42c] sm:$0xf0]  ;;  %v6738_v56 = vld [vmem:[#allocation5 + $0x124] sm:$0xf]  ;;  %v500_v3 = vld [vmem:[%s7649_s30 + $0x218] sm:$0xff] }
  0x83   : > { %1940 = vmatpush.bf16.msrb.mxu0 %v6078_v23  ;;  %2087 = vmatpush.bf16.msrb.mxu3 %v5698_v28  ;;  %v5679_v58 = vld [vmem:[#allocation5 + $0x130] sm:$0xf0]  ;;  %v6062_v59 = vor.u32 %v6836_v55, %v6061_v46  ;;  %v6189_v61 = vld [vmem:[#allocation5 + $0x520] sm:$0xf]  ;;  %v6868_v62 = vld [vmem:[#allocation5 + $0x52c] sm:$0xf0]  ;;  %v7781_v9 = vpack.c.bf16 %v500_v3, %v494_v2 }
  0x84   : > { %v5682_v60 = vor.u32 %v6738_v56, %v5679_v58  ;;  %v6190_v63 = vor.u32 %v6868_v62, %v6189_v61  ;;  %v493_v0 = vld [vmem:[%s7649_s30 + $0x1e0] sm:$0xff]  ;;  %v499_v1 = vld [vmem:[%s7649_s30 + $0x210] sm:$0xff]  ;;  %v512_v35 = vld [vmem:[%s7649_s30 + $0x278] sm:$0xff] }
  0x85   : > { %1989 = vmatpush.bf16.msrb.mxu1 %v6206_v31  ;;  %v495_v4 = vld [vmem:[%s7649_s30 + $0x1f0] sm:$0xff]  ;;  %v501_v5 = vld [vmem:[%s7649_s30 + $0x220] sm:$0xff]  ;;  %v7779_v8 = vpack.c.bf16 %v499_v1, %v493_v0  ;;  %9364 = vst [vmem:[#allocation32_spill] sm:$0xff] %v7781_v9  ;;  %v508_v38 = vld [vmem:[%s7649_s30 + $0x258] sm:$0xff]  ;;  %v7801_v45 = vpack.c.bf16 %v512_v35, %v506_v34 }
  0x86   : > { %2039 = vmatpush.bf16.msrb.mxu2 %v5554_v47  ;;  %v7783_v10 = vpack.c.bf16 %v501_v5, %v495_v4  ;;  %v6702_v16 = vld [vmem:[#allocation5 + $0x4] sm:$0xf]  ;;  %v5535_v17 = vld [vmem:[#allocation5 + $0x10] sm:$0xf0]  ;;  %v6045_v18 = vld [vmem:[#allocation5 + $0x400] sm:$0xf] }
  0x87   : > { %1941 = vmatpush.bf16.msrb.mxu0 %v6062_v59  ;;  %2088 = vmatpush.bf16.msrb.mxu3 %v5682_v60  ;;  %9363 = vst [vmem:[#allocation31_spill] sm:$0xff] %v7779_v8  ;;  %v5538_v19 = vor.u32 %v6702_v16, %v5535_v17  ;;  %v6832_v20 = vld [vmem:[#allocation5 + $0x40c] sm:$0xf0]  ;;  %v6734_v21 = vld [vmem:[#allocation5 + $0x104] sm:$0xf]  ;;  %v514_v39 = vld [vmem:[%s7649_s30 + $0x288] sm:$0xff] }
  0x88   : > { %v5663_v22 = vld [vmem:[#allocation5 + $0x110] sm:$0xf0]  ;;  %v6046_v23 = vor.u32 %v6832_v20, %v6045_v18  ;;  %v6173_v29 = vld [vmem:[#allocation5 + $0x500] sm:$0xf]  ;;  %v6864_v30 = vld [vmem:[#allocation5 + $0x50c] sm:$0xf0]  ;;  %v7805_v47 = vpack.c.bf16 %v514_v39, %v508_v38 }
  0x89   : > { %1990 = vmatpush.bf16.msrb.mxu1 %v6190_v63  ;;  %v5666_v28 = vor.u32 %v6734_v21, %v5663_v22  ;;  %v6174_v31 = vor.u32 %v6864_v30, %v6173_v29  ;;  %v505_v32 = vld [vmem:[%s7649_s30 + $0x240] sm:$0xff]  ;;  %v511_v33 = vld [vmem:[%s7649_s30 + $0x270] sm:$0xff]  ;;  %9366 = vst [vmem:[#allocation34_spill] sm:$0xff] %v7801_v45  ;;  %v518_v6 = vld [vmem:[%s7649_s30 + $0x2a8] sm:$0xff] }
  0x8a   : > { %2040 = vmatpush.bf16.msrb.mxu2 %v5538_v19  ;;  %v507_v36 = vld [vmem:[%s7649_s30 + $0x250] sm:$0xff]  ;;  %v513_v37 = vld [vmem:[%s7649_s30 + $0x280] sm:$0xff]  ;;  %v7799_v44 = vpack.c.bf16 %v511_v33, %v505_v32  ;;  %v524_v7 = vld [vmem:[%s7649_s30 + $0x2d8] sm:$0xff] }
  0x8b   : > { %1942 = vmatpush.bf16.msrb.mxu0 %v6046_v23  ;;  %2089 = vmatpush.bf16.msrb.mxu3 %v5666_v28  ;;  %v7803_v46 = vpack.c.bf16 %v513_v37, %v507_v36  ;;  %v6858_v55 = vld [vmem:[#allocation5 + $0x4e4] sm:$0xf]  ;;  %v6159_v56 = vld [vmem:[#allocation5 + $0x4f0] sm:$0xf0]  ;;  %v520_v18 = vld [vmem:[%s7649_s30 + $0x2b8] sm:$0xff]  ;;  %v7821_v21 = vpack.c.bf16 %v524_v7, %v518_v6 }
  0x8c   : > { %1757 = vmatmul.bf16.gmra.mxu0 %v7719_v49  ;;  %1806 = vmatmul.bf16.gmra.mxu1 %v7721_v50  ;;  %9365 = vst [vmem:[#allocation33_spill] sm:$0xff] %v7799_v44  ;;  %v6794_v58 = vld [vmem:[#allocation5 + $0x2e4] sm:$0xf]  ;;  %v6162_v59 = vor.u32 %v6858_v55, %v6159_v56  ;;  %v5903_v60 = vld [vmem:[#allocation5 + $0x2f0] sm:$0xf0]  ;;  %v526_v19 = vld [vmem:[%s7649_s30 + $0x2e8] sm:$0xff] }
  0x8d   : > { %1855 = vmatmul.bf16.gmra.mxu2 %v7723_v51  ;;  %1991 = vmatpush.bf16.msrb.mxu1 %v6174_v31  ;;  %v6890_v61 = vld [vmem:[#allocation5 + $0x5e4] sm:$0xf]  ;;  %v6287_v62 = vld [vmem:[#allocation5 + $0x5f0] sm:$0xf0]  ;;  %v5906_v63 = vor.u32 %v6794_v58, %v5903_v60  ;;  %9368 = vst [vmem:[#allocation36_spill] sm:$0xff] %v7821_v21  ;;  %v7825_v23 = vpack.c.bf16 %v526_v19, %v520_v18  ;;  %v438_v60 = vld [vmem:[%s7649_s30 + $0x28] sm:$0xff] }
  0x8e   : > { %1904 = vmatmul.bf16.gmra.mxu3 %v7725_v52  ;;  %v6290_v0 = vor.u32 %v6890_v61, %v6287_v62  ;;  %2229 = vmatpush.bf16.msra.mxu2 %v6162_v59  ;;  %v6826_v1 = vld [vmem:[#allocation5 + $0x3e4] sm:$0xf]  ;;  %v6031_v2 = vld [vmem:[#allocation5 + $0x3f0] sm:$0xf0]  ;;  %v7831_v37 = vld [vmem:[#allocation7] sm:$0xf] }
  0x8f   : > { %2131 = vmatpush.bf16.msra.mxu0 %v5906_v63  ;;  %v6034_v3 = vor.u32 %v6826_v1, %v6031_v2  ;;  %v517_v4 = vld [vmem:[%s7649_s30 + $0x2a0] sm:$0xff]  ;;  %v523_v5 = vld [vmem:[%s7649_s30 + $0x2d0] sm:$0xff]  ;;  %9370 = vst [vmem:[#allocation38_spill] sm:$0xff] %v7825_v23  ;;  %v7836_v59 = vperm.slane %v7831_v37, 0  ;;  %v444_v61 = vld [vmem:[%s7649_s30 + $0x58] sm:$0xff] }
  0x90   : > { %2278 = vmatpush.bf16.msra.mxu3 %v6290_v0  ;;  %v519_v16 = vld [vmem:[%s7649_s30 + $0x2b0] sm:$0xff]  ;;  %v525_v17 = vld [vmem:[%s7649_s30 + $0x2e0] sm:$0xff]  ;;  %v7819_v20 = vpack.c.bf16 %v523_v5, %v517_v4  ;;  %v7842_v0 = vpack.c.bf16 %v444_v61, %v438_v60  ;;  %v450_v60 = vld [vmem:[%s7649_s30 + $0x88] sm:$0xff] }
  0x91   : > { %2180 = vmatpush.bf16.msra.mxu1 %v6034_v3  ;;  %v7823_v22 = vpack.c.bf16 %v525_v17, %v519_v16  ;;  %v6854_v28 = vld [vmem:[#allocation5 + $0x4c4] sm:$0xf]  ;;  %v6143_v29 = vld [vmem:[#allocation5 + $0x4d0] sm:$0xf0]  ;;  %v456_v61 = vld [vmem:[%s7649_s30 + $0xb8] sm:$0xff] }
  0x92   : > { %9367 = vst [vmem:[#allocation35_spill] sm:$0xff] %v7819_v20  ;;  %v6790_v30 = vld [vmem:[#allocation5 + $0x2c4] sm:$0xf]  ;;  %v6146_v31 = vor.u32 %v6854_v28, %v6143_v29  ;;  %v5887_v32 = vld [vmem:[#allocation5 + $0x2d0] sm:$0xf0] }
  0x93   : > { %9369 = vst [vmem:[#allocation37_spill] sm:$0xff] %v7823_v22  ;;  %v6886_v33 = vld [vmem:[#allocation5 + $0x5c4] sm:$0xf]  ;;  %v6271_v34 = vld [vmem:[#allocation5 + $0x5d0] sm:$0xf0]  ;;  %v5890_v35 = vor.u32 %v6790_v30, %v5887_v32 }
  0x94   : > { %v6274_v36 = vor.u32 %v6886_v33, %v6271_v34  ;;  %2230 = vmatpush.bf16.msra.mxu2 %v6146_v31  ;;  %v6822_v38 = vld [vmem:[#allocation5 + $0x3c4] sm:$0xf]  ;;  %v6015_v39 = vld [vmem:[#allocation5 + $0x3d0] sm:$0xf0] }
  0x95   : > { %2132 = vmatpush.bf16.msra.mxu0 %v5890_v35  ;;  %v6018_v55 = vor.u32 %v6822_v38, %v6015_v39  ;;  %v437_v56 = vld [vmem:[%s7649_s30 + $0x20] sm:$0xff]  ;;  %v443_v58 = vld [vmem:[%s7649_s30 + $0x50] sm:$0xff] }
  0x96   : > { %2279 = vmatpush.bf16.msra.mxu3 %v6274_v36  ;;  %v7840_v62 = vpack.c.bf16 %v443_v58, %v437_v56  ;;  %v6850_v4 = vld [vmem:[#allocation5 + $0x4a4] sm:$0xf]  ;;  %v6127_v5 = vld [vmem:[#allocation5 + $0x4b0] sm:$0xf0] }
  0x97   : > { %2181 = vmatpush.bf16.msra.mxu1 %v6018_v55  ;;  %v6786_v6 = vld [vmem:[#allocation5 + $0x2a4] sm:$0xf]  ;;  %v6130_v7 = vor.u32 %v6850_v4, %v6127_v5  ;;  %v5871_v16 = vld [vmem:[#allocation5 + $0x2b0] sm:$0xf0]  ;;  %v7858_v5 = vpack.c.bf16 %v456_v61, %v450_v60 }
  0x98   : > { %v6882_v17 = vld [vmem:[#allocation5 + $0x5a4] sm:$0xf]  ;;  %v6255_v18 = vld [vmem:[#allocation5 + $0x5b0] sm:$0xf0]  ;;  %v5874_v28 = vor.u32 %v6786_v6, %v5871_v16 }
  0x99   : > { %v6258_v29 = vor.u32 %v6882_v17, %v6255_v18  ;;  %2231 = vmatpush.bf16.msra.mxu2 %v6130_v7  ;;  %v6818_v36 = vld [vmem:[#allocation5 + $0x3a4] sm:$0xf]  ;;  %v5999_v38 = vld [vmem:[#allocation5 + $0x3b0] sm:$0xf0] }
  0x9a   : > { %2133 = vmatpush.bf16.msra.mxu0 %v5874_v28  ;;  %v6002_v55 = vor.u32 %v6818_v36, %v5999_v38  ;;  %v449_v56 = vld [vmem:[%s7649_s30 + $0x80] sm:$0xff]  ;;  %v455_v58 = vld [vmem:[%s7649_s30 + $0xb0] sm:$0xff] }
  0x9b   : > { %2280 = vmatpush.bf16.msra.mxu3 %v6258_v29  ;;  %v6846_v18 = vld [vmem:[#allocation5 + $0x484] sm:$0xf] }
  0x9c   : > { %1762 = vmatmul.bf16.gmra.mxu0 %v7739_v12  ;;  %1811 = vmatmul.bf16.gmra.mxu1 %v7741_v13  ;;  %v6782_v28 = vld [vmem:[#allocation5 + $0x284] sm:$0xf] }
  0x9d   : > { %1860 = vmatmul.bf16.gmra.mxu2 %v7743_v14  ;;  %2182 = vmatpush.bf16.msra.mxu1 %v6002_v55  ;;  %v6814_v61 = vld [vmem:[#allocation5 + $0x384] sm:$0xf] }
  0x9e   : > { %1909 = vmatmul.bf16.gmra.mxu3 %v7745_v15 }
  0xac   : > { %1767 = vmatmul.bf16.gmra.mxu0 %v7759_v40  ;;  %1816 = vmatmul.bf16.gmra.mxu1 %v7761_v41 }
  0xad   : > { %1865 = vmatmul.bf16.gmra.mxu2 %v7763_v42 }
  0xae   : > { %1914 = vmatmul.bf16.gmra.mxu3 %v7765_v43 }
  0xbc   : > { %1772 = vmatmul.bf16.gmra.mxu0 %v7779_v8  ;;  %1821 = vmatmul.bf16.gmra.mxu1 %v7781_v9 }
  0xbd   : > { %1870 = vmatmul.bf16.gmra.mxu2 %v7783_v10 }
  0xbe   : > { %1919 = vmatmul.bf16.gmra.mxu3 %v7785_v11 }
  0xcc   : > { %1777 = vmatmul.bf16.gmra.mxu0 %v7799_v44  ;;  %1826 = vmatmul.bf16.gmra.mxu1 %v7801_v45 }
  0xcd   : > { %1875 = vmatmul.bf16.gmra.mxu2 %v7803_v46 }
  0xce   : > { %1924 = vmatmul.bf16.gmra.mxu3 %v7805_v47 }
  0xdc   : > { %1782 = vmatmul.bf16.gmra.mxu0 %v7819_v20  ;;  %1831 = vmatmul.bf16.gmra.mxu1 %v7821_v21 }
  0xdd   : > { %1880 = vmatmul.bf16.gmra.mxu2 %v7823_v22 }
  0xde   : > { %1929 = vmatmul.bf16.gmra.mxu3 %v7825_v23 }
  0xe9   : > { %v1748_v63 = vpop.f32.mrf.mxu0  ;;  %v1797_v2 = vpop.f32.mrf.mxu1 }
  0xea   : > { %v1749_v1 = vadd.f32 %v1748_v63, %v7836_v59 }
  0xec   : > { %v1798_v3 = vadd.f32 %v1797_v2, %v1749_v1  ;;  %1943 = vmatmul.bf16.vlgmr.msrb.gmra.mxu0 %v7840_v62  ;;  %1992 = vmatmul.bf16.vlgmr.msrb.gmra.mxu1 %v7842_v0  ;;  %v7856_v1 = vpack.c.bf16 %v455_v58, %v449_v56 }
  0xed   : > { %2041 = vmatmul.bf16.vlgmr.msrb.gmra.mxu2 %v7679_v48 }
  0xee   : > { %2090 = vmatmul.bf16.vlgmr.msrb.gmra.mxu3 %v7681_v53 }
  0xf0   : > { %v1846_v19 = vpop.f32.mrf.mxu2 }
  0xf1   : > { %v1847_v30 = vadd.f32 %v1846_v19, %v1798_v3  ;;  %v1895_v31 = vpop.f32.mrf.mxu3  ;;  %v1750_v32 = vpop.f32.mrf.mxu0  ;;  %v6111_v19 = vld [vmem:[#allocation5 + $0x490] sm:$0xf0] }
  0xf2   : > { %v1751_v33 = vadd.f32 %v1750_v32, %v7836_v59  ;;  %v1799_v34 = vpop.f32.mrf.mxu1  ;;  %v6114_v29 = vor.u32 %v6846_v18, %v6111_v19  ;;  %v6239_v32 = vld [vmem:[#allocation5 + $0x590] sm:$0xf0]  ;;  %v468_v18 = vld [vmem:[%s7649_s30 + $0x118] sm:$0xff] }
  0xf3   : > { %v7850_v35 = vadd.f32 %v1895_v31, %v1847_v30  ;;  %v5855_v30 = vld [vmem:[#allocation5 + $0x290] sm:$0xf0]  ;;  %v6878_v31 = vld [vmem:[#allocation5 + $0x584] sm:$0xf] }
  0xf4   : > { %v1800_v39 = vadd.f32 %v1799_v34, %v1751_v33  ;;  %v5858_v34 = vor.u32 %v6782_v28, %v5855_v30  ;;  %v6242_v36 = vor.u32 %v6878_v31, %v6239_v32  ;;  %2232 = vmatpush.bf16.msra.mxu2 %v6114_v29 }
  0xf6   : > { %2134 = vmatpush.bf16.msra.mxu0 %v5858_v34  ;;  %2281 = vmatpush.bf16.msra.mxu3 %v6242_v36 }
  0xf8   : > { %v1848_v63 = vpop.f32.mrf.mxu2 }
  0xf9   : > { %v1849_v2 = vadd.f32 %v1848_v63, %v1800_v39  ;;  %v1897_v3 = vpop.f32.mrf.mxu3  ;;  %v1753_v4 = vpop.f32.mrf.mxu0  ;;  %v5983_v63 = vld [vmem:[#allocation5 + $0x390] sm:$0xf0] }
  0xfa   : > { %v1754_v6 = vadd.f32 %v1753_v4, %v7836_v59  ;;  %v1802_v7 = vpop.f32.mrf.mxu1  ;;  %v461_v4 = vld [vmem:[%s7649_s30 + $0xe0] sm:$0xff] }
  0xfb   : > { %v7861_v16 = vadd.f32 %v1897_v3, %v1849_v2  ;;  %v5986_v3 = vor.u32 %v6814_v61, %v5983_v63  ;;  %v6874_v61 = vld [vmem:[#allocation5 + $0x564] sm:$0xf]  ;;  %v6223_v63 = vld [vmem:[#allocation5 + $0x570] sm:$0xf0] }
  0xfc   : > { %v1803_v17 = vadd.f32 %v1802_v7, %v1754_v6  ;;  %1948 = vmatmul.bf16.gmra.mxu0 %v7856_v1  ;;  %1997 = vmatmul.bf16.gmra.mxu1 %v7858_v5  ;;  %v467_v6 = vld [vmem:[%s7649_s30 + $0x110] sm:$0xff]  ;;  %v462_v7 = vld [vmem:[%s7649_s30 + $0xe8] sm:$0xff] }
  0xfd   : > { %2046 = vmatmul.bf16.gmra.mxu2 %v7699_v24  ;;  %2183 = vmatpush.bf16.msra.mxu1 %v5986_v3  ;;  %v7874_v19 = vpack.c.bf16 %v467_v6, %v461_v4  ;;  %v7876_v31 = vpack.c.bf16 %v468_v18, %v462_v7  ;;  %v6226_v4 = vor.u32 %v6874_v61, %v6223_v63  ;;  %v480_v61 = vld [vmem:[%s7649_s30 + $0x178] sm:$0xff] }
  0xfe   : > { %2095 = vmatmul.bf16.gmra.mxu3 %v7701_v25 }
  0xff   : > { %2282 = vmatpush.bf16.msra.mxu3 %v6226_v4 }
 0x100   : > { %v1851_v33 = vpop.f32.mrf.mxu2 }
 0x101   : > { %v1852_v38 = vadd.f32 %v1851_v33, %v1803_v17  ;;  %v1900_v39 = vpop.f32.mrf.mxu3  ;;  %v1755_v55 = vpop.f32.mrf.mxu0 }
 0x102   : > { %v1756_v56 = vadd.f32 %v1755_v55, %v7836_v59  ;;  %v1804_v58 = vpop.f32.mrf.mxu1  ;;  %v6778_v55 = vld [vmem:[#allocation5 + $0x264] sm:$0xf] }
 0x103   : > { %v7868_v60 = vadd.f32 %v1900_v39, %v1852_v38  ;;  %v6842_v38 = vld [vmem:[#allocation5 + $0x464] sm:$0xf]  ;;  %v6095_v39 = vld [vmem:[#allocation5 + $0x470] sm:$0xf0] }
 0x104   : > { %v1805_v2 = vadd.f32 %v1804_v58, %v1756_v56  ;;  %v6098_v56 = vor.u32 %v6842_v38, %v6095_v39  ;;  %v5839_v58 = vld [vmem:[#allocation5 + $0x270] sm:$0xf0]  ;;  %v473_v39 = vld [vmem:[%s7649_s30 + $0x140] sm:$0xff] }
 0x105   : > { %v5842_v3 = vor.u32 %v6778_v55, %v5839_v58  ;;  %v479_v55 = vld [vmem:[%s7649_s30 + $0x170] sm:$0xff]  ;;  %v474_v58 = vld [vmem:[%s7649_s30 + $0x148] sm:$0xff] }
 0x106   : > { %2233 = vmatpush.bf16.msra.mxu2 %v6098_v56  ;;  %v7892_v63 = vpack.c.bf16 %v479_v55, %v473_v39  ;;  %v6207_v39 = vld [vmem:[#allocation5 + $0x550] sm:$0xf0] }
 0x107   : > { %2135 = vmatpush.bf16.msra.mxu0 %v5842_v3 }
 0x108   : > { %v1853_v17 = vpop.f32.mrf.mxu2 }
 0x109   : > { %v1854_v28 = vadd.f32 %v1853_v17, %v1805_v2  ;;  %v1902_v29 = vpop.f32.mrf.mxu3  ;;  %v1758_v30 = vpop.f32.mrf.mxu0 }
 0x10a   : > { %v1759_v32 = vadd.f32 %v1758_v30, %v7836_v59  ;;  %v1807_v33 = vpop.f32.mrf.mxu1  ;;  %v6810_v30 = vld [vmem:[#allocation5 + $0x364] sm:$0xf] }
 0x10b   : > { %v7879_v34 = vadd.f32 %v1902_v29, %v1854_v28 }
 0x10c   : > { %v1808_v36 = vadd.f32 %v1807_v33, %v1759_v32  ;;  %1953 = vmatmul.bf16.gmra.mxu0 %v7874_v19  ;;  %2002 = vmatmul.bf16.gmra.mxu1 %v7876_v31  ;;  %v5967_v32 = vld [vmem:[#allocation5 + $0x370] sm:$0xf0] }
 0x10d   : > { %2051 = vmatmul.bf16.gmra.mxu2 %v7719_v49  ;;  %v5970_v38 = vor.u32 %v6810_v30, %v5967_v32  ;;  %v6774_v30 = vld [vmem:[#allocation5 + $0x244] sm:$0xf] }
 0x10e   : > { %2100 = vmatmul.bf16.gmra.mxu3 %v7721_v50  ;;  %v7894_v50 = vpack.c.bf16 %v480_v61, %v474_v58 }
 0x10f   : > { %2184 = vmatpush.bf16.msra.mxu1 %v5970_v38  ;;  %v6870_v38 = vld [vmem:[#allocation5 + $0x544] sm:$0xf] }
 0x110   : > { %v1856_v2 = vpop.f32.mrf.mxu2  ;;  %v6210_v61 = vor.u32 %v6870_v38, %v6207_v39  ;;  %v486_v38 = vld [vmem:[%s7649_s30 + $0x1a8] sm:$0xff]  ;;  %v492_v39 = vld [vmem:[%s7649_s30 + $0x1d8] sm:$0xff] }
 0x111   : > { %v1857_v6 = vadd.f32 %v1856_v2, %v1808_v36  ;;  %v1905_v7 = vpop.f32.mrf.mxu3  ;;  %v1760_v18 = vpop.f32.mrf.mxu0  ;;  %v7912_v25 = vpack.c.bf16 %v492_v39, %v486_v38 }
 0x112   : > { %v1761_v17 = vadd.f32 %v1760_v18, %v7836_v59  ;;  %v1809_v28 = vpop.f32.mrf.mxu1  ;;  %2283 = vmatpush.bf16.msra.mxu3 %v6210_v61 }
 0x113   : > { %v7886_v29 = vadd.f32 %v1905_v7, %v1857_v6 }
 0x114   : > { %v1810_v33 = vadd.f32 %v1809_v28, %v1761_v17  ;;  %v6838_v17 = vld [vmem:[#allocation5 + $0x444] sm:$0xf]  ;;  %v6079_v28 = vld [vmem:[#allocation5 + $0x450] sm:$0xf0] }
 0x115   : > { %v6082_v32 = vor.u32 %v6838_v17, %v6079_v28  ;;  %v6806_v17 = vld [vmem:[#allocation5 + $0x344] sm:$0xf]  ;;  %v5951_v28 = vld [vmem:[#allocation5 + $0x350] sm:$0xf0] }
 0x117   : > { %2234 = vmatpush.bf16.msra.mxu2 %v6082_v32 }
 0x118   : > { %v1858_v36 = vpop.f32.mrf.mxu2 }
 0x119   : > { %v1859_v56 = vadd.f32 %v1858_v36, %v1810_v33  ;;  %v1907_v2 = vpop.f32.mrf.mxu3  ;;  %v1763_v18 = vpop.f32.mrf.mxu0  ;;  %v5823_v33 = vld [vmem:[#allocation5 + $0x250] sm:$0xf0] }
 0x11a   : > { %v1764_v3 = vadd.f32 %v1763_v18, %v7836_v59  ;;  %v1812_v4 = vpop.f32.mrf.mxu1  ;;  %v5826_v58 = vor.u32 %v6774_v30, %v5823_v33  ;;  %v485_v30 = vld [vmem:[%s7649_s30 + $0x1a0] sm:$0xff]  ;;  %v491_v33 = vld [vmem:[%s7649_s30 + $0x1d0] sm:$0xff] }
 0x11b   : > { %v7897_v6 = vadd.f32 %v1907_v2, %v1859_v56 }
 0x11c   : > { %v1813_v7 = vadd.f32 %v1812_v4, %v1764_v3  ;;  %1958 = vmatmul.bf16.gmra.mxu0 %v7892_v63  ;;  %2007 = vmatmul.bf16.gmra.mxu1 %v7894_v50 }
 0x11d   : > { %2056 = vmatmul.bf16.gmra.mxu2 %v7739_v12  ;;  %2136 = vmatpush.bf16.msra.mxu0 %v5826_v58  ;;  %v5954_v12 = vor.u32 %v6806_v17, %v5951_v28  ;;  %v5807_v17 = vld [vmem:[#allocation5 + $0x230] sm:$0xf0]  ;;  %v6866_v28 = vld [vmem:[#allocation5 + $0x524] sm:$0xf] }
 0x11e   : > { %2105 = vmatmul.bf16.gmra.mxu3 %v7741_v13 }
 0x11f   : > { %2185 = vmatpush.bf16.msra.mxu1 %v5954_v12  ;;  %v6834_v12 = vld [vmem:[#allocation5 + $0x424] sm:$0xf] }
 0x120   : > { %v1861_v55 = vpop.f32.mrf.mxu2 }
 0x121   : > { %v1862_v36 = vadd.f32 %v1861_v55, %v1813_v7  ;;  %v1910_v56 = vpop.f32.mrf.mxu3  ;;  %v1765_v2 = vpop.f32.mrf.mxu0  ;;  %v7910_v55 = vpack.c.bf16 %v491_v33, %v485_v30  ;;  %v6191_v30 = vld [vmem:[#allocation5 + $0x530] sm:$0xf0] }
 0x122   : > { %v1766_v18 = vadd.f32 %v1765_v2, %v7836_v59  ;;  %v1814_v3 = vpop.f32.mrf.mxu1  ;;  %v6194_v38 = vor.u32 %v6866_v28, %v6191_v30  ;;  %v498_v28 = vld [vmem:[%s7649_s30 + $0x208] sm:$0xff]  ;;  %v504_v30 = vld [vmem:[%s7649_s30 + $0x238] sm:$0xff] }
 0x123   : > { %v7904_v4 = vadd.f32 %v1910_v56, %v1862_v36  ;;  %v7930_v53 = vpack.c.bf16 %v504_v30, %v498_v28 }
 0x124   : > { %v1815_v13 = vadd.f32 %v1814_v3, %v1766_v18  ;;  %v6770_v18 = vld [vmem:[#allocation5 + $0x224] sm:$0xf]  ;;  %2284 = vmatpush.bf16.msra.mxu3 %v6194_v38 }
 0x125   : > { %9372 = vst [vmem:[#allocation40_spill] sm:$0xff] %v7930_v53 }
 0x128   : > { %v1863_v7 = vpop.f32.mrf.mxu2 }
 0x129   : > { %v1864_v32 = vadd.f32 %v1863_v7, %v1815_v13  ;;  %v1912_v49 = vpop.f32.mrf.mxu3  ;;  %v1768_v2 = vpop.f32.mrf.mxu0  ;;  %v6063_v13 = vld [vmem:[#allocation5 + $0x430] sm:$0xf0] }
 0x12a   : > { %v1769_v58 = vadd.f32 %v1768_v2, %v7836_v59  ;;  %v1817_v61 = vpop.f32.mrf.mxu1  ;;  %v6066_v3 = vor.u32 %v6834_v12, %v6063_v13  ;;  %v6802_v12 = vld [vmem:[#allocation5 + $0x324] sm:$0xf]  ;;  %v5935_v13 = vld [vmem:[#allocation5 + $0x330] sm:$0xf0] }
 0x12b   : > { %v7915_v36 = vadd.f32 %v1912_v49, %v1864_v32  ;;  %v5810_v49 = vor.u32 %v6770_v18, %v5807_v17  ;;  %v497_v18 = vld [vmem:[%s7649_s30 + $0x200] sm:$0xff]  ;;  %v503_v17 = vld [vmem:[%s7649_s30 + $0x230] sm:$0xff] }
 0x12c   : > { %v1818_v56 = vadd.f32 %v1817_v61, %v1769_v58  ;;  %1963 = vmatmul.bf16.gmra.mxu0 %v7910_v55  ;;  %2012 = vmatmul.bf16.gmra.mxu1 %v7912_v25 }
 0x12d   : > { %2061 = vmatmul.bf16.gmra.mxu2 %v7759_v40  ;;  %2137 = vmatpush.bf16.msra.mxu0 %v5810_v49  ;;  %v5938_v40 = vor.u32 %v6802_v12, %v5935_v13  ;;  %v5791_v12 = vld [vmem:[#allocation5 + $0x210] sm:$0xf0]  ;;  %v6862_v13 = vld [vmem:[#allocation5 + $0x504] sm:$0xf] }
 0x12e   : > { %2110 = vmatmul.bf16.gmra.mxu3 %v7761_v41  ;;  %2235 = vmatpush.bf16.msra.mxu2 %v6066_v3 }
 0x12f   : > { %2186 = vmatpush.bf16.msra.mxu1 %v5938_v40  ;;  %v6830_v40 = vld [vmem:[#allocation5 + $0x404] sm:$0xf] }
 0x130   : > { %v1866_v33 = vpop.f32.mrf.mxu2 }
 0x131   : > { %v1867_v39 = vadd.f32 %v1866_v33, %v1818_v56  ;;  %v1915_v7 = vpop.f32.mrf.mxu3  ;;  %v1770_v32 = vpop.f32.mrf.mxu0  ;;  %v7928_v33 = vpack.c.bf16 %v503_v17, %v497_v18  ;;  %v6175_v18 = vld [vmem:[#allocation5 + $0x510] sm:$0xf0] }
 0x132   : > { %v1771_v2 = vadd.f32 %v1770_v32, %v7836_v59  ;;  %v1819_v58 = vpop.f32.mrf.mxu1  ;;  %v6178_v28 = vor.u32 %v6862_v13, %v6175_v18  ;;  %v510_v13 = vld [vmem:[%s7649_s30 + $0x268] sm:$0xff]  ;;  %v516_v18 = vld [vmem:[%s7649_s30 + $0x298] sm:$0xff] }
 0x133   : > { %v7922_v61 = vadd.f32 %v1915_v7, %v1867_v39  ;;  %9371 = vst [vmem:[#allocation39_spill] sm:$0xff] %v7928_v33  ;;  %v7948_v23 = vpack.c.bf16 %v516_v18, %v510_v13 }
 0x134   : > { %v1820_v41 = vadd.f32 %v1819_v58, %v1771_v2  ;;  %v6766_v2 = vld [vmem:[#allocation5 + $0x204] sm:$0xf]  ;;  %2285 = vmatpush.bf16.msra.mxu3 %v6178_v28 }
 0x135   : > { %9374 = vst [vmem:[#allocation42_spill] sm:$0xff] %v7948_v23 }
 0x138   : > { %v1868_v56 = vpop.f32.mrf.mxu2 }
 0x139   : > { %v1869_v3 = vadd.f32 %v1868_v56, %v1820_v41  ;;  %v1917_v24 = vpop.f32.mrf.mxu3  ;;  %v1773_v32 = vpop.f32.mrf.mxu0  ;;  %v6047_v41 = vld [vmem:[#allocation5 + $0x410] sm:$0xf0] }
 0x13a   : > { %v1774_v49 = vadd.f32 %v1773_v32, %v7836_v59  ;;  %v1822_v38 = vpop.f32.mrf.mxu1  ;;  %v6050_v58 = vor.u32 %v6830_v40, %v6047_v41  ;;  %v6798_v40 = vld [vmem:[#allocation5 + $0x304] sm:$0xf]  ;;  %v5919_v41 = vld [vmem:[#allocation5 + $0x310] sm:$0xf0] }
 0x13b   : > { %v7933_v39 = vadd.f32 %v1917_v24, %v1869_v3  ;;  %v5794_v24 = vor.u32 %v6766_v2, %v5791_v12  ;;  %v509_v2 = vld [vmem:[%s7649_s30 + $0x260] sm:$0xff]  ;;  %v515_v12 = vld [vmem:[%s7649_s30 + $0x290] sm:$0xff] }
 0x13c   : > { %v1823_v7 = vadd.f32 %v1822_v38, %v1774_v49  ;;  %1968 = vmatmul.bf16.gmra.mxu0 %v7928_v33  ;;  %2017 = vmatmul.bf16.gmra.mxu1 %v7930_v53 }
 0x13d   : > { %2066 = vmatmul.bf16.gmra.mxu2 %v7779_v8  ;;  %2138 = vmatpush.bf16.msra.mxu0 %v5794_v24  ;;  %v5922_v8 = vor.u32 %v6798_v40, %v5919_v41  ;;  %v6733_v40 = vld [vmem:[#allocation5 + $0xf4] sm:$0xf0]  ;;  %v6037_v41 = vld [vmem:[#allocation5 + $0x3e8] sm:$0xf] }
 0x13e   : > { %2115 = vmatmul.bf16.gmra.mxu3 %v7781_v9  ;;  %2236 = vmatpush.bf16.msra.mxu2 %v6050_v58 }
 0x13f   : > { %2187 = vmatpush.bf16.msra.mxu1 %v5922_v8  ;;  %v5909_v8 = vld [vmem:[#allocation5 + $0x2e8] sm:$0xf] }
 0x140   : > { %v1871_v17 = vpop.f32.mrf.mxu2 }
 0x141   : > { %v1872_v30 = vadd.f32 %v1871_v17, %v1823_v7  ;;  %v1920_v56 = vpop.f32.mrf.mxu3  ;;  %v1775_v3 = vpop.f32.mrf.mxu0  ;;  %v7946_v17 = vpack.c.bf16 %v515_v12, %v509_v2  ;;  %v6829_v2 = vld [vmem:[#allocation5 + $0x3f4] sm:$0xf0] }
 0x142   : > { %v1776_v32 = vadd.f32 %v1775_v3, %v7836_v59  ;;  %v1824_v49 = vpop.f32.mrf.mxu1  ;;  %v6038_v13 = vor.u32 %v6829_v2, %v6037_v41  ;;  %v522_v41 = vld [vmem:[%s7649_s30 + $0x2c8] sm:$0xff]  ;;  %v528_v2 = vld [vmem:[%s7649_s30 + $0x2f8] sm:$0xff] }
 0x143   : > { %v7940_v38 = vadd.f32 %v1920_v56, %v1872_v30  ;;  %9373 = vst [vmem:[#allocation41_spill] sm:$0xff] %v7946_v17 }
 0x144   : > { %v1825_v9 = vadd.f32 %v1824_v49, %v1776_v32  ;;  %v5653_v32 = vld [vmem:[#allocation5 + $0xe8] sm:$0xf]  ;;  %2474 = vmatpush.bf16.msrb.mxu3 %v6038_v13 }
 0x148   : > { %v1873_v7 = vpop.f32.mrf.mxu2 }
 0x149   : > { %v1874_v58 = vadd.f32 %v1873_v7, %v1825_v9  ;;  %v1922_v48 = vpop.f32.mrf.mxu3  ;;  %v1778_v3 = vpop.f32.mrf.mxu0  ;;  %v6797_v9 = vld [vmem:[#allocation5 + $0x2f4] sm:$0xf0] }
 0x14a   : > { %v1779_v24 = vadd.f32 %v1778_v3, %v7836_v59  ;;  %v1827_v28 = vpop.f32.mrf.mxu1  ;;  %v5910_v49 = vor.u32 %v6797_v9, %v5909_v8  ;;  %v5781_v8 = vld [vmem:[#allocation5 + $0x1e8] sm:$0xf]  ;;  %v6765_v9 = vld [vmem:[#allocation5 + $0x1f4] sm:$0xf0] }
 0x14b   : > { %v7951_v30 = vadd.f32 %v1922_v48, %v1874_v58  ;;  %v5654_v48 = vor.u32 %v6733_v40, %v5653_v32  ;;  %v521_v32 = vld [vmem:[%s7649_s30 + $0x2c0] sm:$0xff]  ;;  %v527_v40 = vld [vmem:[%s7649_s30 + $0x2f0] sm:$0xff] }
 0x14c   : > { %v1828_v56 = vadd.f32 %v1827_v28, %v1779_v24  ;;  %1973 = vmatmul.bf16.gmra.mxu0 %v7946_v17  ;;  %2022 = vmatmul.bf16.gmra.mxu1 %v7948_v23  ;;  %v7966_v23 = vpack.c.bf16 %v528_v2, %v522_v41 }
 0x14d   : > { %2071 = vmatmul.bf16.gmra.mxu2 %v7799_v44  ;;  %2327 = vmatpush.bf16.msrb.mxu0 %v5654_v48  ;;  %v5782_v44 = vor.u32 %v6765_v9, %v5781_v8  ;;  %v6729_v8 = vld [vmem:[#allocation5 + $0xd4] sm:$0xf0]  ;;  %v6021_v9 = vld [vmem:[#allocation5 + $0x3c8] sm:$0xf] }
 0x14e   : > { %2120 = vmatmul.bf16.gmra.mxu3 %v7801_v45  ;;  %2425 = vmatpush.bf16.msrb.mxu2 %v5910_v49  ;;  %9376 = vst [vmem:[#allocation44_spill] sm:$0xff] %v7966_v23 }
 0x14f   : > { %2376 = vmatpush.bf16.msrb.mxu1 %v5782_v44  ;;  %v5893_v44 = vld [vmem:[#allocation5 + $0x2c8] sm:$0xf] }
 0x150   : > { %v1876_v12 = vpop.f32.mrf.mxu2 }
 0x151   : > { %v1877_v18 = vadd.f32 %v1876_v12, %v1828_v56  ;;  %v1925_v7 = vpop.f32.mrf.mxu3  ;;  %v1780_v58 = vpop.f32.mrf.mxu0  ;;  %v7964_v12 = vpack.c.bf16 %v527_v40, %v521_v32  ;;  %v6825_v32 = vld [vmem:[#allocation5 + $0x3d4] sm:$0xf0] }
 0x152   : > { %v1781_v3 = vadd.f32 %v1780_v58, %v7836_v59  ;;  %v1829_v24 = vpop.f32.mrf.mxu1 }
 0x153   : > { %v7958_v28 = vadd.f32 %v1925_v7, %v1877_v18  ;;  %9375 = vst [vmem:[#allocation43_spill] sm:$0xff] %v7964_v12 }
 0x154   : > { %v1830_v45 = vadd.f32 %v1829_v24, %v1781_v3  ;;  %v5637_v3 = vld [vmem:[#allocation5 + $0xc8] sm:$0xf] }
 0x155   : > { %v5638_v41 = vor.u32 %v6729_v8, %v5637_v3 }
 0x157   : > { %2328 = vmatpush.bf16.msrb.mxu0 %v5638_v41  ;;  %v6005_v41 = vld [vmem:[#allocation5 + $0x3a8] sm:$0xf] }
 0x158   : > { %v1878_v56 = vpop.f32.mrf.mxu2 }
 0x159   : > { %v1879_v49 = vadd.f32 %v1878_v56, %v1830_v45  ;;  %v1927_v22 = vpop.f32.mrf.mxu3  ;;  %v1783_v58 = vpop.f32.mrf.mxu0  ;;  %v6793_v45 = vld [vmem:[#allocation5 + $0x2d4] sm:$0xf0] }
 0x15a   : > { %v1784_v48 = vadd.f32 %v1783_v58, %v7836_v59  ;;  %v1832_v13 = vpop.f32.mrf.mxu1  ;;  %v5894_v24 = vor.u32 %v6793_v45, %v5893_v44 }
 0x15b   : > { %v7969_v18 = vadd.f32 %v1927_v22, %v1879_v49  ;;  %v6022_v22 = vor.u32 %v6825_v32, %v6021_v9  ;;  %v7985_v32 = vperm.slane %v7831_v37, 1 }
 0x15c   : > { %v1833_v7 = vadd.f32 %v1832_v13, %v1784_v48  ;;  %1978 = vmatmul.bf16.gmra.mxu0 %v7964_v12  ;;  %2027 = vmatmul.bf16.gmra.mxu1 %v7966_v23 }
 0x15d   : > { %2076 = vmatmul.bf16.gmra.mxu2 %v7819_v20  ;;  %2475 = vmatpush.bf16.msrb.mxu3 %v6022_v22  ;;  %v6761_v20 = vld [vmem:[#allocation5 + $0x1d4] sm:$0xf0] }
 0x15e   : > { %2125 = vmatmul.bf16.gmra.mxu3 %v7821_v21  ;;  %2426 = vmatpush.bf16.msrb.mxu2 %v5894_v24  ;;  %v5765_v21 = vld [vmem:[#allocation5 + $0x1c8] sm:$0xf] }
 0x15f   : > { %v5766_v45 = vor.u32 %v6761_v20, %v5765_v21  ;;  %v5877_v20 = vld [vmem:[#allocation5 + $0x2a8] sm:$0xf]  ;;  %v6789_v21 = vld [vmem:[#allocation5 + $0x2b4] sm:$0xf0] }
 0x160   : > { %v1881_v40 = vpop.f32.mrf.mxu2 }
 0x161   : > { %v1882_v2 = vadd.f32 %v1881_v40, %v1833_v7  ;;  %v1930_v56 = vpop.f32.mrf.mxu3  ;;  %v1785_v49 = vpop.f32.mrf.mxu0  ;;  %2377 = vmatpush.bf16.msrb.mxu1 %v5766_v45  ;;  %v5621_v40 = vld [vmem:[#allocation5 + $0xa8] sm:$0xf] }
 0x162   : > { %v1786_v58 = vadd.f32 %v1785_v49, %v7836_v59  ;;  %v1834_v48 = vpop.f32.mrf.mxu1 }
 0x163   : > { %v7976_v13 = vadd.f32 %v1930_v56, %v1882_v2  ;;  %v6821_v2 = vld [vmem:[#allocation5 + $0x3b4] sm:$0xf0] }
 0x164   : > { %v1835_v44 = vadd.f32 %v1834_v48, %v1786_v58  ;;  %v6006_v48 = vor.u32 %v6821_v2, %v6005_v41 }
 0x166   : > { %2476 = vmatpush.bf16.msrb.mxu3 %v6006_v48  ;;  %v5605_v48 = vld [vmem:[#allocation5 + $0x88] sm:$0xf] }
 0x168   : > { %v1883_v23 = vpop.f32.mrf.mxu2 }
 0x169   : > { %v1884_v12 = vadd.f32 %v1883_v23, %v1835_v44  ;;  %v1932_v3 = vpop.f32.mrf.mxu3  ;;  %v1944_v8 = vpop.f32.mrf.mxu0  ;;  %v5878_v23 = vor.u32 %v6789_v21, %v5877_v20 }
 0x16a   : > { %v1945_v7 = vadd.f32 %v1944_v8, %v7850_v35  ;;  %v1993_v9 = vpop.f32.mrf.mxu1  ;;  %v6725_v35 = vld [vmem:[#allocation5 + $0xb4] sm:$0xf0] }
 0x16b   : > { %v7979_v24 = vadd.f32 %v1932_v3, %v1884_v12  ;;  %v5622_v22 = vor.u32 %v6725_v35, %v5621_v40  ;;  %2427 = vmatpush.bf16.msrb.mxu2 %v5878_v23  ;;  %v5749_v3 = vld [vmem:[#allocation5 + $0x1a8] sm:$0xf]  ;;  %v6757_v8 = vld [vmem:[#allocation5 + $0x1b4] sm:$0xf0] }
 0x16c   : > { %v1994_v59 = vadd.f32 %v1993_v9, %v1945_v7  ;;  %2139 = vmatmul.bf16.vlgmr.msra.gmra.mxu0 %v7683_v54  ;;  %2188 = vmatmul.bf16.vlgmr.msra.gmra.mxu1 %v7685_v57  ;;  %v5750_v9 = vor.u32 %v6757_v8, %v5749_v3  ;;  %v6817_v8 = vld [vmem:[#allocation5 + $0x394] sm:$0xf0] }
 0x16d   : > { %2237 = vmatmul.bf16.vlgmr.msra.gmra.mxu2 %v7840_v62  ;;  %2329 = vmatpush.bf16.msrb.mxu0 %v5622_v22 }
 0x16e   : > { %2286 = vmatmul.bf16.vlgmr.msra.gmra.mxu3 %v7842_v0  ;;  %v2915_v20 = vmax.f32 %v1994_v59, 0.0  ;;  %2378 = vmatpush.bf16.msrb.mxu1 %v5750_v9  ;;  %v5861_v59 = vld [vmem:[#allocation5 + $0x288] sm:$0xf] }
 0x170   : > { %v2042_v12 = vpop.f32.mrf.mxu2 }
 0x171   : > { %v2043_v56 = vadd.f32 %v2042_v12, %v7985_v32  ;;  %v2091_v49 = vpop.f32.mrf.mxu3  ;;  %v1946_v58 = vpop.f32.mrf.mxu0 }
 0x172   : > { %v1947_v37 = vadd.f32 %v1946_v58, %v7861_v16  ;;  %v1995_v44 = vpop.f32.mrf.mxu1 }
 0x173   : > { %v7990_v45 = vadd.f32 %v2091_v49, %v2043_v56  ;;  %v6785_v49 = vld [vmem:[#allocation5 + $0x294] sm:$0xf0] }
 0x174   : > { %v1996_v7 = vadd.f32 %v1995_v44, %v1947_v37  ;;  %v5862_v58 = vor.u32 %v6785_v49, %v5861_v59  ;;  %v6721_v37 = vld [vmem:[#allocation5 + $0x94] sm:$0xf0]  ;;  %v5989_v44 = vld [vmem:[#allocation5 + $0x388] sm:$0xf] }
 0x176   : > { %v2919_v21 = vmax.f32 %v1996_v7, 0.0  ;;  %2428 = vmatpush.bf16.msrb.mxu2 %v5862_v58 }
 0x178   : > { %v7992_v40 = vpack.c.bf16 %v2919_v21, %v2915_v20  ;;  %v2044_v35 = vpop.f32.mrf.mxu2  ;;  %v5990_v21 = vor.u32 %v6817_v8, %v5989_v44 }
 0x179   : > { %v2045_v23 = vadd.f32 %v2044_v35, %v7985_v32  ;;  %v2093_v41 = vpop.f32.mrf.mxu3  ;;  %v1949_v12 = vpop.f32.mrf.mxu0 }
 0x17a   : > { %9377 = vst [vmem:[#allocation45_spill] sm:$0xff] %v7992_v40  ;;  %v1950_v16 = vadd.f32 %v1949_v12, %v7868_v60  ;;  %v1998_v22 = vpop.f32.mrf.mxu1  ;;  %v5606_v60 = vor.u32 %v6721_v37, %v5605_v48  ;;  %2477 = vmatpush.bf16.msrb.mxu3 %v5990_v21  ;;  %v5733_v12 = vld [vmem:[#allocation5 + $0x188] sm:$0xf] }
 0x17b   : > { %v7996_v2 = vadd.f32 %v2093_v41, %v2045_v23 }
 0x17c   : > { %v1999_v56 = vadd.f32 %v1998_v22, %v1950_v16  ;;  %2144 = vmatmul.bf16.gmra.mxu0 %v7703_v26  ;;  %2193 = vmatmul.bf16.gmra.mxu1 %v7705_v27  ;;  %v6753_v16 = vld [vmem:[#allocation5 + $0x194] sm:$0xf0] }
 0x17d   : > { %2242 = vmatmul.bf16.gmra.mxu2 %v7856_v1  ;;  %2330 = vmatpush.bf16.msrb.mxu0 %v5606_v60  ;;  %v5734_v59 = vor.u32 %v6753_v16, %v5733_v12  ;;  %v5973_v12 = vld [vmem:[#allocation5 + $0x368] sm:$0xf] }
 0x17e   : > { %2291 = vmatmul.bf16.gmra.mxu3 %v7858_v5  ;;  %v2923_v49 = vmax.f32 %v1999_v56, 0.0  ;;  %v5845_v56 = vld [vmem:[#allocation5 + $0x268] sm:$0xf] }
 0x17f   : > { %2379 = vmatpush.bf16.msrb.mxu1 %v5734_v59 }
 0x180   : > { %v2047_v3 = vpop.f32.mrf.mxu2 }
 0x181   : > { %v2048_v7 = vadd.f32 %v2047_v3, %v7985_v32  ;;  %v2096_v9 = vpop.f32.mrf.mxu3  ;;  %v1951_v20 = vpop.f32.mrf.mxu0 }
 0x182   : > { %v1952_v35 = vadd.f32 %v1951_v20, %v7879_v34  ;;  %v2000_v23 = vpop.f32.mrf.mxu1  ;;  %v6781_v20 = vld [vmem:[#allocation5 + $0x274] sm:$0xf0] }
 0x183   : > { %v8004_v41 = vadd.f32 %v2096_v9, %v2048_v7  ;;  %v5846_v21 = vor.u32 %v6781_v20, %v5845_v56 }
 0x184   : > { %v2001_v22 = vadd.f32 %v2000_v23, %v1952_v35  ;;  %v5589_v35 = vld [vmem:[#allocation5 + $0x68] sm:$0xf]  ;;  %v6717_v23 = vld [vmem:[#allocation5 + $0x74] sm:$0xf0] }
 0x185   : > { %2429 = vmatpush.bf16.msrb.mxu2 %v5846_v21 }
 0x186   : > { %v2927_v48 = vmax.f32 %v2001_v22, 0.0  ;;  %v6813_v22 = vld [vmem:[#allocation5 + $0x374] sm:$0xf0] }
 0x188   : > { %v2049_v37 = vpop.f32.mrf.mxu2  ;;  %v8006_v3 = vpack.c.bf16 %v2927_v48, %v2923_v49 }
 0x189   : > { %v2050_v58 = vadd.f32 %v2049_v37, %v7985_v32  ;;  %v2098_v44 = vpop.f32.mrf.mxu3  ;;  %v1954_v8 = vpop.f32.mrf.mxu0  ;;  %v5974_v37 = vor.u32 %v6813_v22, %v5973_v12 }
 0x18a   : > { %9378 = vst [vmem:[#allocation46_spill] sm:$0xff] %v8006_v3  ;;  %v1955_v34 = vadd.f32 %v1954_v8, %v7886_v29  ;;  %v2003_v60 = vpop.f32.mrf.mxu1  ;;  %v5590_v29 = vor.u32 %v6717_v23, %v5589_v35 }
 0x18b   : > { %v8010_v7 = vadd.f32 %v2098_v44, %v2050_v58  ;;  %2478 = vmatpush.bf16.msrb.mxu3 %v5974_v37  ;;  %v5573_v37 = vld [vmem:[#allocation5 + $0x48] sm:$0xf] }
 0x18c   : > { %v2004_v9 = vadd.f32 %v2003_v60, %v1955_v34  ;;  %2149 = vmatmul.bf16.gmra.mxu0 %v7723_v51  ;;  %2198 = vmatmul.bf16.gmra.mxu1 %v7725_v52  ;;  %v5717_v34 = vld [vmem:[#allocation5 + $0x168] sm:$0xf]  ;;  %v6749_v60 = vld [vmem:[#allocation5 + $0x174] sm:$0xf0] }
 0x18d   : > { %2247 = vmatmul.bf16.gmra.mxu2 %v7874_v19  ;;  %2331 = vmatpush.bf16.msrb.mxu0 %v5590_v29  ;;  %v5718_v20 = vor.u32 %v6749_v60, %v5717_v34  ;;  %v6809_v60 = vld [vmem:[#allocation5 + $0x354] sm:$0xf0] }
 0x18e   : > { %2296 = vmatmul.bf16.gmra.mxu3 %v7876_v31  ;;  %v2931_v3 = vmax.f32 %v2004_v9, 0.0  ;;  %v6777_v9 = vld [vmem:[#allocation5 + $0x254] sm:$0xf0] }
 0x18f   : > { %2380 = vmatpush.bf16.msrb.mxu1 %v5718_v20 }
 0x190   : > { %v2052_v16 = vpop.f32.mrf.mxu2 }
 0x191   : > { %v2053_v59 = vadd.f32 %v2052_v16, %v7985_v32  ;;  %v2101_v49 = vpop.f32.mrf.mxu3  ;;  %v1956_v48 = vpop.f32.mrf.mxu0 }
 0x192   : > { %v1957_v58 = vadd.f32 %v1956_v48, %v7897_v6  ;;  %v2005_v44 = vpop.f32.mrf.mxu1 }
 0x193   : > { %v8018_v8 = vadd.f32 %v2101_v49, %v2053_v59 }
 0x194   : > { %v2006_v56 = vadd.f32 %v2005_v44, %v1957_v58  ;;  %v6713_v58 = vld [vmem:[#allocation5 + $0x54] sm:$0xf0]  ;;  %v5957_v44 = vld [vmem:[#allocation5 + $0x348] sm:$0xf] }
 0x196   : > { %v2935_v35 = vmax.f32 %v2006_v56, 0.0 }
 0x198   : > { %v2054_v23 = vpop.f32.mrf.mxu2  ;;  %v8020_v16 = vpack.c.bf16 %v2935_v35, %v2931_v3  ;;  %v5829_v3 = vld [vmem:[#allocation5 + $0x248] sm:$0xf] }
 0x199   : > { %v2055_v21 = vadd.f32 %v2054_v23, %v7985_v32  ;;  %v2103_v12 = vpop.f32.mrf.mxu3  ;;  %v1959_v22 = vpop.f32.mrf.mxu0  ;;  %v5830_v48 = vor.u32 %v6777_v9, %v5829_v3  ;;  %v5958_v23 = vor.u32 %v6809_v60, %v5957_v44 }
 0x19a   : > { %9379 = vst [vmem:[#allocation47_spill] sm:$0xff] %v8020_v16  ;;  %v1960_v6 = vadd.f32 %v1959_v22, %v7904_v4  ;;  %v2008_v29 = vpop.f32.mrf.mxu1  ;;  %v5574_v4 = vor.u32 %v6713_v58, %v5573_v37 }
 0x19b   : > { %v8024_v59 = vadd.f32 %v2103_v12, %v2055_v21  ;;  %2430 = vmatpush.bf16.msrb.mxu2 %v5830_v48  ;;  %2479 = vmatpush.bf16.msrb.mxu3 %v5958_v23  ;;  %v5557_v23 = vld [vmem:[#allocation5 + $0x28] sm:$0xf] }
 0x19c   : > { %v2009_v49 = vadd.f32 %v2008_v29, %v1960_v6  ;;  %2154 = vmatmul.bf16.gmra.mxu0 %v7743_v14  ;;  %2203 = vmatmul.bf16.gmra.mxu1 %v7745_v15  ;;  %v5701_v6 = vld [vmem:[#allocation5 + $0x148] sm:$0xf]  ;;  %v6745_v29 = vld [vmem:[#allocation5 + $0x154] sm:$0xf0] }
 0x19d   : > { %2252 = vmatmul.bf16.gmra.mxu2 %v7892_v63  ;;  %2332 = vmatpush.bf16.msrb.mxu0 %v5574_v4  ;;  %v5702_v9 = vor.u32 %v6745_v29, %v5701_v6  ;;  %v6805_v29 = vld [vmem:[#allocation5 + $0x334] sm:$0xf0] }
 0x19e   : > { %2301 = vmatmul.bf16.gmra.mxu3 %v7894_v50  ;;  %v2939_v16 = vmax.f32 %v2009_v49, 0.0  ;;  %v6773_v49 = vld [vmem:[#allocation5 + $0x234] sm:$0xf0] }
 0x19f   : > { %2381 = vmatpush.bf16.msrb.mxu1 %v5702_v9 }
 0x1a0   : > { %v2057_v34 = vpop.f32.mrf.mxu2 }
 0x1a1   : > { %v2058_v56 = vadd.f32 %v2057_v34, %v7985_v32  ;;  %v2106_v20 = vpop.f32.mrf.mxu3  ;;  %v1961_v35 = vpop.f32.mrf.mxu0 }
 0x1a2   : > { %v1962_v21 = vadd.f32 %v1961_v35, %v7915_v36  ;;  %v2010_v12 = vpop.f32.mrf.mxu1 }
 0x1a3   : > { %v8032_v22 = vadd.f32 %v2106_v20, %v2058_v56 }
 0x1a4   : > { %v2011_v3 = vadd.f32 %v2010_v12, %v1962_v21  ;;  %v6709_v21 = vld [vmem:[#allocation5 + $0x34] sm:$0xf0]  ;;  %v5941_v12 = vld [vmem:[#allocation5 + $0x328] sm:$0xf] }
 0x1a6   : > { %v2943_v37 = vmax.f32 %v2011_v3, 0.0 }
 0x1a8   : > { %v2059_v58 = vpop.f32.mrf.mxu2  ;;  %v8034_v34 = vpack.c.bf16 %v2943_v37, %v2939_v16  ;;  %v5813_v16 = vld [vmem:[#allocation5 + $0x228] sm:$0xf] }
 0x1a9   : > { %v2060_v48 = vadd.f32 %v2059_v58, %v7985_v32  ;;  %v2108_v44 = vpop.f32.mrf.mxu3  ;;  %v1964_v60 = vpop.f32.mrf.mxu0  ;;  %v5814_v35 = vor.u32 %v6773_v49, %v5813_v16  ;;  %v5942_v58 = vor.u32 %v6805_v29, %v5941_v12 }
 0x1aa   : > { %9380 = vst [vmem:[#allocation48_spill] sm:$0xff] %v8034_v34  ;;  %v1965_v36 = vadd.f32 %v1964_v60, %v7922_v61  ;;  %v2013_v4 = vpop.f32.mrf.mxu1  ;;  %v5558_v61 = vor.u32 %v6709_v21, %v5557_v23 }
 0x1ab   : > { %v8038_v56 = vadd.f32 %v2108_v44, %v2060_v48  ;;  %2431 = vmatpush.bf16.msrb.mxu2 %v5814_v35  ;;  %2480 = vmatpush.bf16.msrb.mxu3 %v5942_v58  ;;  %v5541_v58 = vld [vmem:[#allocation5 + $0x8] sm:$0xf] }
 0x1ac   : > { %v2014_v20 = vadd.f32 %v2013_v4, %v1965_v36  ;;  %2159 = vmatmul.bf16.gmra.mxu0 %v7763_v42  ;;  %2208 = vmatmul.bf16.gmra.mxu1 %v7765_v43  ;;  %v5685_v36 = vld [vmem:[#allocation5 + $0x128] sm:$0xf]  ;;  %v6741_v4 = vld [vmem:[#allocation5 + $0x134] sm:$0xf0] }
 0x1ad   : > { %2257 = vmatmul.bf16.gmra.mxu2 %v7910_v55  ;;  %2333 = vmatpush.bf16.msrb.mxu0 %v5558_v61  ;;  %v5686_v49 = vor.u32 %v6741_v4, %v5685_v36  ;;  %v6801_v4 = vld [vmem:[#allocation5 + $0x314] sm:$0xf0] }
 0x1ae   : > { %2306 = vmatmul.bf16.gmra.mxu3 %v7912_v25  ;;  %v2947_v34 = vmax.f32 %v2014_v20, 0.0  ;;  %v6769_v20 = vld [vmem:[#allocation5 + $0x214] sm:$0xf0] }
 0x1af   : > { %2382 = vmatpush.bf16.msrb.mxu1 %v5686_v49 }
 0x1b0   : > { %v2062_v6 = vpop.f32.mrf.mxu2 }
 0x1b1   : > { %v2063_v3 = vadd.f32 %v2062_v6, %v7985_v32  ;;  %v2111_v9 = vpop.f32.mrf.mxu3  ;;  %v1966_v37 = vpop.f32.mrf.mxu0 }
 0x1b2   : > { %v1967_v48 = vadd.f32 %v1966_v37, %v7933_v39  ;;  %v2015_v44 = vpop.f32.mrf.mxu1 }
 0x1b3   : > { %v8046_v60 = vadd.f32 %v2111_v9, %v2063_v3 }
 0x1b4   : > { %v2016_v16 = vadd.f32 %v2015_v44, %v1967_v48  ;;  %v6705_v48 = vld [vmem:[#allocation5 + $0x14] sm:$0xf0]  ;;  %v5925_v44 = vld [vmem:[#allocation5 + $0x308] sm:$0xf] }
 0x1b6   : > { %v2951_v23 = vmax.f32 %v2016_v16, 0.0 }
 0x1b8   : > { %v2064_v21 = vpop.f32.mrf.mxu2  ;;  %v8048_v6 = vpack.c.bf16 %v2951_v23, %v2947_v34  ;;  %v5797_v34 = vld [vmem:[#allocation5 + $0x208] sm:$0xf] }
 0x1b9   : > { %v2065_v35 = vadd.f32 %v2064_v21, %v7985_v32  ;;  %v2113_v12 = vpop.f32.mrf.mxu3  ;;  %v1969_v29 = vpop.f32.mrf.mxu0  ;;  %v5798_v37 = vor.u32 %v6769_v20, %v5797_v34  ;;  %v5926_v21 = vor.u32 %v6801_v4, %v5925_v44 }
 0x1ba   : > { %9381 = vst [vmem:[#allocation49_spill] sm:$0xff] %v8048_v6  ;;  %v1970_v39 = vadd.f32 %v1969_v29, %v7940_v38  ;;  %v2018_v61 = vpop.f32.mrf.mxu1  ;;  %v5542_v38 = vor.u32 %v6705_v48, %v5541_v58 }
 0x1bb   : > { %v8052_v3 = vadd.f32 %v2113_v12, %v2065_v35  ;;  %2432 = vmatpush.bf16.msrb.mxu2 %v5798_v37  ;;  %2481 = vmatpush.bf16.msrb.mxu3 %v5926_v21 }
 0x1bc   : > { %v2019_v9 = vadd.f32 %v2018_v61, %v1970_v39  ;;  %2164 = vmatmul.bf16.gmra.mxu0 %v7783_v10  ;;  %2213 = vmatmul.bf16.gmra.mxu1 %v7785_v11  ;;  %v5669_v39 = vld [vmem:[#allocation5 + $0x108] sm:$0xf]  ;;  %v6737_v61 = vld [vmem:[#allocation5 + $0x114] sm:$0xf0] }
 0x1bd   : > { %2262 = vmatmul.bf16.gmra.mxu2 %v7928_v33  ;;  %2334 = vmatpush.bf16.msrb.mxu0 %v5542_v38  ;;  %v5670_v20 = vor.u32 %v6737_v61, %v5669_v39  ;;  %v6763_v39 = vld [vmem:[#allocation5 + $0x1ec] sm:$0xf] }
 0x1be   : > { %2311 = vmatmul.bf16.gmra.mxu3 %v7930_v53  ;;  %v2955_v6 = vmax.f32 %v2019_v9, 0.0  ;;  %v9383_v9 = vld [vmem:[#allocation42_spill] sm:$0xff] }
 0x1bf   : > { %2383 = vmatpush.bf16.msrb.mxu1 %v5670_v20 }
 0x1c0   : > { %v2067_v36 = vpop.f32.mrf.mxu2 }
 0x1c1   : > { %v2068_v16 = vadd.f32 %v2067_v36, %v7985_v32  ;;  %v2116_v49 = vpop.f32.mrf.mxu3  ;;  %v1971_v23 = vpop.f32.mrf.mxu0 }
 0x1c2   : > { %v1972_v35 = vadd.f32 %v1971_v23, %v7951_v30  ;;  %v2020_v12 = vpop.f32.mrf.mxu1  ;;  %v5655_v23 = vld [vmem:[#allocation5 + $0xf8] sm:$0xf0] }
 0x1c3   : > { %v8060_v29 = vadd.f32 %v2116_v49, %v2068_v16 }
 0x1c4   : > { %v2021_v34 = vadd.f32 %v2020_v12, %v1972_v35  ;;  %v6165_v35 = vld [vmem:[#allocation5 + $0x4e8] sm:$0xf]  ;;  %v6861_v12 = vld [vmem:[#allocation5 + $0x4f4] sm:$0xf0] }
 0x1c6   : > { %v2959_v58 = vmax.f32 %v2021_v34, 0.0  ;;  %v5783_v34 = vld [vmem:[#allocation5 + $0x1f8] sm:$0xf0] }
 0x1c8   : > { %v2069_v48 = vpop.f32.mrf.mxu2  ;;  %v8062_v36 = vpack.c.bf16 %v2959_v58, %v2955_v6  ;;  %v6731_v6 = vld [vmem:[#allocation5 + $0xec] sm:$0xf] }
 0x1c9   : > { %v2070_v37 = vadd.f32 %v2069_v48, %v7985_v32  ;;  %v2118_v44 = vpop.f32.mrf.mxu3  ;;  %v1974_v4 = vpop.f32.mrf.mxu0  ;;  %v5658_v21 = vor.u32 %v6731_v6, %v5655_v23  ;;  %v6293_v6 = vld [vmem:[#allocation5 + $0x5e8] sm:$0xf]  ;;  %v6893_v23 = vld [vmem:[#allocation5 + $0x5f4] sm:$0xf0] }
 0x1ca   : > { %9382 = vst [vmem:[#allocation50_spill] sm:$0xff] %v8062_v36  ;;  %v1975_v30 = vadd.f32 %v1974_v4, %v7958_v28  ;;  %v2023_v38 = vpop.f32.mrf.mxu1  ;;  %v6166_v28 = vor.u32 %v6861_v12, %v6165_v35  ;;  %v6294_v35 = vor.u32 %v6893_v23, %v6293_v6  ;;  %v6857_v23 = vld [vmem:[#allocation5 + $0x4d4] sm:$0xf0] }
 0x1cb   : > { %v8066_v16 = vadd.f32 %v2118_v44, %v2070_v37  ;;  %2621 = vmatpush.bf16.msra.mxu2 %v5658_v21  ;;  %v5786_v37 = vor.u32 %v6763_v39, %v5783_v34 }
 0x1cc   : > { %v2024_v49 = vadd.f32 %v2023_v38, %v1975_v30  ;;  %2169 = vmatmul.bf16.gmra.mxu0 %v7803_v46  ;;  %2218 = vmatmul.bf16.gmra.mxu1 %v7805_v47 }
 0x1cd   : > { %2267 = vmatmul.bf16.gmra.mxu2 %v7946_v17  ;;  %2523 = vmatpush.bf16.msra.mxu0 %v6166_v28 }
 0x1ce   : > { %2316 = vmatmul.bf16.gmra.mxu3 %v9383_v9  ;;  %v2963_v36 = vmax.f32 %v2024_v49, 0.0  ;;  %2572 = vmatpush.bf16.msra.mxu1 %v6294_v35  ;;  %v9387_v49 = vld [vmem:[#allocation43_spill] sm:$0xff] }
 0x1cf   : > { %2670 = vmatpush.bf16.msra.mxu3 %v5786_v37  ;;  %v9386_v37 = vld [vmem:[#allocation38_spill] sm:$0xff]  ;;  %v6759_v35 = vld [vmem:[#allocation5 + $0x1cc] sm:$0xf] }
 0x1d0   : > { %v2072_v61 = vpop.f32.mrf.mxu2  ;;  %v6277_v9 = vld [vmem:[#allocation5 + $0x5c8] sm:$0xf] }
 0x1d1   : > { %v2073_v20 = vadd.f32 %v2072_v61, %v7985_v32  ;;  %v2121_v58 = vpop.f32.mrf.mxu3  ;;  %v1976_v48 = vpop.f32.mrf.mxu0 }
 0x1d2   : > { %v1977_v44 = vadd.f32 %v1976_v48, %v7969_v18  ;;  %v2025_v4 = vpop.f32.mrf.mxu1  ;;  %v9385_v48 = vld [vmem:[#allocation37_spill] sm:$0xff] }
 0x1d3   : > { %v8074_v30 = vadd.f32 %v2121_v58, %v2073_v20 }
 0x1d4   : > { %v2026_v38 = vadd.f32 %v2025_v4, %v1977_v44  ;;  %v9388_v44 = vld [vmem:[#allocation44_spill] sm:$0xff]  ;;  %v6149_v4 = vld [vmem:[#allocation5 + $0x4c8] sm:$0xf] }
 0x1d6   : > { %v2967_v40 = vmax.f32 %v2026_v38, 0.0 }
 0x1d8   : > { %v2074_v12 = vpop.f32.mrf.mxu2  ;;  %v8076_v61 = vpack.c.bf16 %v2967_v40, %v2963_v36  ;;  %v6727_v40 = vld [vmem:[#allocation5 + $0xcc] sm:$0xf]  ;;  %v5639_v36 = vld [vmem:[#allocation5 + $0xd8] sm:$0xf0] }
 0x1d9   : > { %v2075_v21 = vadd.f32 %v2074_v12, %v7985_v32  ;;  %v2123_v39 = vpop.f32.mrf.mxu3  ;;  %v1979_v34 = vpop.f32.mrf.mxu0  ;;  %v5642_v6 = vor.u32 %v6727_v40, %v5639_v36  ;;  %v6889_v40 = vld [vmem:[#allocation5 + $0x5d4] sm:$0xf0] }
 0x1da   : > { %9384 = vst [vmem:[#allocation51_spill] sm:$0xff] %v8076_v61  ;;  %v1980_v18 = vadd.f32 %v1979_v34, %v7976_v13  ;;  %v2028_v28 = vpop.f32.mrf.mxu1  ;;  %v5767_v13 = vld [vmem:[#allocation5 + $0x1d8] sm:$0xf0]  ;;  %v6150_v34 = vor.u32 %v6857_v23, %v6149_v4  ;;  %v6278_v53 = vor.u32 %v6889_v40, %v6277_v9  ;;  %v6133_v9 = vld [vmem:[#allocation5 + $0x4a8] sm:$0xf] }
 0x1db   : > { %v8080_v20 = vadd.f32 %v2123_v39, %v2075_v21  ;;  %2622 = vmatpush.bf16.msra.mxu2 %v5642_v6 }
 0x1dc   : > { %v2029_v58 = vadd.f32 %v2028_v28, %v1980_v18  ;;  %2174 = vmatmul.bf16.gmra.mxu0 %v9385_v48  ;;  %2223 = vmatmul.bf16.gmra.mxu1 %v9386_v37  ;;  %v5770_v18 = vor.u32 %v6759_v35, %v5767_v13 }
 0x1dd   : > { %2272 = vmatmul.bf16.gmra.mxu2 %v9387_v49  ;;  %2524 = vmatpush.bf16.msra.mxu0 %v6150_v34 }
 0x1de   : > { %2321 = vmatmul.bf16.gmra.mxu3 %v9388_v44  ;;  %v2971_v36 = vmax.f32 %v2029_v58, 0.0  ;;  %2573 = vmatpush.bf16.msra.mxu1 %v6278_v53  ;;  %v6723_v53 = vld [vmem:[#allocation5 + $0xac] sm:$0xf] }
 0x1df   : > { %2671 = vmatpush.bf16.msra.mxu3 %v5770_v18  ;;  %v6755_v58 = vld [vmem:[#allocation5 + $0x1ac] sm:$0xf] }
 0x1e0   : > { %v2077_v38 = vpop.f32.mrf.mxu2 }
 0x1e1   : > { %v2078_v12 = vadd.f32 %v2077_v38, %v7985_v32  ;;  %v2126_v21 = vpop.f32.mrf.mxu3  ;;  %v1981_v39 = vpop.f32.mrf.mxu0 }
 0x1e2   : > { %v1982_v28 = vadd.f32 %v1981_v39, %v7979_v24  ;;  %v2030_v61 = vpop.f32.mrf.mxu1 }
 0x1e3   : > { %v8088_v49 = vadd.f32 %v2126_v21, %v2078_v12  ;;  %v9391_v21 = vld [vmem:[#allocation20_spill] sm:$0xff] }
 0x1e4   : > { %v2031_v44 = vadd.f32 %v2030_v61, %v1982_v28  ;;  %v9390_v61 = vld [vmem:[#allocation19_spill] sm:$0xff] }
 0x1e6   : > { %v2975_v17 = vmax.f32 %v2031_v44, 0.0  ;;  %v5751_v44 = vld [vmem:[#allocation5 + $0x1b8] sm:$0xf0] }
 0x1e7   : > { %v5754_v34 = vor.u32 %v6755_v58, %v5751_v44  ;;  %v9392_v44 = vld [vmem:[#allocation22_spill] sm:$0xff] }
 0x1e8   : > { %v2079_v33 = vpop.f32.mrf.mxu2  ;;  %v8090_v38 = vpack.c.bf16 %v2975_v17, %v2971_v36  ;;  %v5623_v17 = vld [vmem:[#allocation5 + $0xb8] sm:$0xf0] }
 0x1e9   : > { %v2080_v4 = vadd.f32 %v2079_v33, %v7985_v32  ;;  %v2128_v23 = vpop.f32.mrf.mxu3  ;;  %v2140_v24 = vpop.f32.mrf.mxu0  ;;  %v5626_v33 = vor.u32 %v6723_v53, %v5623_v17  ;;  %v6853_v32 = vld [vmem:[#allocation5 + $0x4b4] sm:$0xf0]  ;;  %2672 = vmatpush.bf16.msra.mxu3 %v5754_v34  ;;  %v6719_v34 = vld [vmem:[#allocation5 + $0x8c] sm:$0xf] }
 0x1ea   : > { %9389 = vst [vmem:[#allocation37_spill] sm:$0xff] %v8090_v38  ;;  %v2141_v6 = vadd.f32 %v2140_v24, %v7990_v45  ;;  %v2189_v35 = vpop.f32.mrf.mxu1  ;;  %v6134_v39 = vor.u32 %v6853_v32, %v6133_v9 }
 0x1eb   : > { %v8094_v13 = vadd.f32 %v2128_v23, %v2080_v4  ;;  %2623 = vmatpush.bf16.msra.mxu2 %v5626_v33 }
 0x1ec   : > { %v2190_v12 = vadd.f32 %v2189_v35, %v2141_v6  ;;  %2335 = vmatmul.bf16.vlgmr.msrb.gmra.mxu0 %v9390_v61  ;;  %2384 = vmatmul.bf16.vlgmr.msrb.gmra.mxu1 %v9391_v21  ;;  %v6261_v6 = vld [vmem:[#allocation5 + $0x5a8] sm:$0xf]  ;;  %v6885_v35 = vld [vmem:[#allocation5 + $0x5b4] sm:$0xf0] }
 0x1ed   : > { %2433 = vmatmul.bf16.vlgmr.msrb.gmra.mxu2 %v7683_v54  ;;  %2525 = vmatpush.bf16.msra.mxu0 %v6134_v39  ;;  %v6262_v53 = vor.u32 %v6885_v35, %v6261_v6  ;;  %v9393_v39 = vld [vmem:[#allocation23_spill] sm:$0xff] }
 0x1ee   : > { %2482 = vmatmul.bf16.vlgmr.msrb.gmra.mxu3 %v7685_v57 }
 0x1ef   : > { %2574 = vmatpush.bf16.msra.mxu1 %v6262_v53 }
 0x1f0   : > { %v2238_v45 = vpop.f32.mrf.mxu2 }
 0x1f1   : > { %v2239_v18 = vadd.f32 %v2238_v45, %v2190_v12  ;;  %v2287_v28 = vpop.f32.mrf.mxu3  ;;  %v2142_v40 = vpop.f32.mrf.mxu0 }
 0x1f2   : > { %v2143_v36 = vadd.f32 %v2142_v40, %v7996_v2  ;;  %v2191_v4 = vpop.f32.mrf.mxu1 }
 0x1f3   : > { %v2288_v23 = vadd.f32 %v2287_v28, %v2239_v18  ;;  %v5607_v18 = vld [vmem:[#allocation5 + $0x98] sm:$0xf0]  ;;  %v6117_v28 = vld [vmem:[#allocation5 + $0x488] sm:$0xf] }
 0x1f4   : > { %v2192_v24 = vadd.f32 %v2191_v4, %v2143_v36  ;;  %v5610_v36 = vor.u32 %v6719_v34, %v5607_v18  ;;  %v6751_v4 = vld [vmem:[#allocation5 + $0x18c] sm:$0xf] }
 0x1f5   : > { %v2916_v2 = vmax.f32 %v2288_v23, 0.0 }
 0x1f6   : > { %2624 = vmatpush.bf16.msra.mxu2 %v5610_v36 }
 0x1f8   : > { %v2240_v17 = vpop.f32.mrf.mxu2 }
 0x1f9   : > { %v2241_v38 = vadd.f32 %v2240_v17, %v2192_v24  ;;  %v2289_v57 = vpop.f32.mrf.mxu3  ;;  %v2145_v9 = vpop.f32.mrf.mxu0 }
 0x1fa   : > { %v2146_v12 = vadd.f32 %v2145_v9, %v8004_v41  ;;  %v2194_v32 = vpop.f32.mrf.mxu1  ;;  %v6849_v41 = vld [vmem:[#allocation5 + $0x494] sm:$0xf0] }
 0x1fb   : > { %v2290_v58 = vadd.f32 %v2289_v57, %v2241_v38  ;;  %v5735_v57 = vld [vmem:[#allocation5 + $0x198] sm:$0xf0]  ;;  %v6118_v24 = vor.u32 %v6849_v41, %v6117_v28 }
 0x1fc   : > { %v2195_v33 = vadd.f32 %v2194_v32, %v2146_v12  ;;  %2340 = vmatmul.bf16.gmra.mxu0 %v9392_v44  ;;  %2389 = vmatmul.bf16.gmra.mxu1 %v9393_v39  ;;  %v5738_v6 = vor.u32 %v6751_v4, %v5735_v57  ;;  %v9395_v57 = vld [vmem:[#allocation24_spill] sm:$0xff] }
 0x1fd   : > { %v2920_v45 = vmax.f32 %v2290_v58, 0.0  ;;  %2438 = vmatmul.bf16.gmra.mxu2 %v7703_v26  ;;  %2526 = vmatpush.bf16.msra.mxu0 %v6118_v24  ;;  %v6245_v58 = vld [vmem:[#allocation5 + $0x588] sm:$0xf]  ;;  %v9396_v24 = vld [vmem:[#allocation25_spill] sm:$0xff] }
 0x1fe   : > { %2487 = vmatmul.bf16.gmra.mxu3 %v7705_v27 }
 0x1ff   : > { %v8106_v40 = vpack.c.bf16 %v2920_v45, %v2916_v2  ;;  %2673 = vmatpush.bf16.msra.mxu3 %v5738_v6  ;;  %v6881_v2 = vld [vmem:[#allocation5 + $0x594] sm:$0xf0]  ;;  %v6715_v6 = vld [vmem:[#allocation5 + $0x6c] sm:$0xf] }
 0x200   : > { %v2243_v38 = vpop.f32.mrf.mxu2  ;;  %v6246_v45 = vor.u32 %v6881_v2, %v6245_v58 }
 0x201   : > { %9394 = vst [vmem:[#allocation38_spill] sm:$0xff] %v8106_v40  ;;  %v2244_v23 = vadd.f32 %v2243_v38, %v2195_v33  ;;  %v2292_v35 = vpop.f32.mrf.mxu3  ;;  %v2147_v53 = vpop.f32.mrf.mxu0 }
 0x202   : > { %v2148_v17 = vadd.f32 %v2147_v53, %v8010_v7  ;;  %v2196_v9 = vpop.f32.mrf.mxu1  ;;  %2575 = vmatpush.bf16.msra.mxu1 %v6246_v45 }
 0x203   : > { %v2293_v12 = vadd.f32 %v2292_v35, %v2244_v23  ;;  %v5591_v23 = vld [vmem:[#allocation5 + $0x78] sm:$0xf0]  ;;  %v6101_v35 = vld [vmem:[#allocation5 + $0x468] sm:$0xf] }
 0x204   : > { %v2197_v32 = vadd.f32 %v2196_v9, %v2148_v17  ;;  %v5594_v53 = vor.u32 %v6715_v6, %v5591_v23  ;;  %v6845_v17 = vld [vmem:[#allocation5 + $0x474] sm:$0xf0]  ;;  %v6747_v9 = vld [vmem:[#allocation5 + $0x16c] sm:$0xf] }
 0x205   : > { %v2924_v7 = vmax.f32 %v2293_v12, 0.0  ;;  %v6102_v58 = vor.u32 %v6845_v17, %v6101_v35  ;;  %v6877_v6 = vld [vmem:[#allocation5 + $0x574] sm:$0xf0] }
 0x206   : > { %2625 = vmatpush.bf16.msra.mxu2 %v5594_v53 }
 0x207   : > { %2527 = vmatpush.bf16.msra.mxu0 %v6102_v58  ;;  %v9399_v58 = vld [vmem:[#allocation28_spill] sm:$0xff] }
 0x208   : > { %v2245_v34 = vpop.f32.mrf.mxu2 }
 0x209   : > { %v2246_v18 = vadd.f32 %v2245_v34, %v2197_v32  ;;  %v2294_v40 = vpop.f32.mrf.mxu3  ;;  %v2150_v28 = vpop.f32.mrf.mxu0 }
 0x20a   : > { %v2151_v33 = vadd.f32 %v2150_v28, %v8018_v8  ;;  %v2199_v41 = vpop.f32.mrf.mxu1  ;;  %v5719_v8 = vld [vmem:[#allocation5 + $0x178] sm:$0xf0] }
 0x20b   : > { %v2295_v4 = vadd.f32 %v2294_v40, %v2246_v18  ;;  %v5722_v2 = vor.u32 %v6747_v9, %v5719_v8  ;;  %v9398_v8 = vld [vmem:[#allocation27_spill] sm:$0xff] }
 0x20c   : > { %v2200_v36 = vadd.f32 %v2199_v41, %v2151_v33  ;;  %2345 = vmatmul.bf16.gmra.mxu0 %v9395_v57  ;;  %2394 = vmatmul.bf16.gmra.mxu1 %v9396_v24 }
 0x20d   : > { %v2928_v38 = vmax.f32 %v2295_v4, 0.0  ;;  %2443 = vmatmul.bf16.gmra.mxu2 %v7723_v51  ;;  %2674 = vmatpush.bf16.msra.mxu3 %v5722_v2  ;;  %v6229_v4 = vld [vmem:[#allocation5 + $0x568] sm:$0xf]  ;;  %v6711_v2 = vld [vmem:[#allocation5 + $0x4c] sm:$0xf] }
 0x20e   : > { %2492 = vmatmul.bf16.gmra.mxu3 %v7725_v52  ;;  %v6230_v23 = vor.u32 %v6877_v6, %v6229_v4 }
 0x20f   : > { %v8114_v32 = vpack.c.bf16 %v2928_v38, %v2924_v7 }
 0x210   : > { %v2248_v40 = vpop.f32.mrf.mxu2  ;;  %2576 = vmatpush.bf16.msra.mxu1 %v6230_v23 }
 0x211   : > { %9397 = vst [vmem:[#allocation19_spill] sm:$0xff] %v8114_v32  ;;  %v2249_v12 = vadd.f32 %v2248_v40, %v2200_v36  ;;  %v2297_v45 = vpop.f32.mrf.mxu3  ;;  %v2152_v34 = vpop.f32.mrf.mxu0 }
 0x212   : > { %v2153_v18 = vadd.f32 %v2152_v34, %v8024_v59  ;;  %v2201_v28 = vpop.f32.mrf.mxu1  ;;  %v6841_v34 = vld [vmem:[#allocation5 + $0x454] sm:$0xf0] }
 0x213   : > { %v2298_v33 = vadd.f32 %v2297_v45, %v2249_v12  ;;  %v5575_v12 = vld [vmem:[#allocation5 + $0x58] sm:$0xf0] }
 0x214   : > { %v2202_v41 = vadd.f32 %v2201_v28, %v2153_v18  ;;  %v5578_v45 = vor.u32 %v6711_v2, %v5575_v12  ;;  %v6743_v18 = vld [vmem:[#allocation5 + $0x14c] sm:$0xf]  ;;  %v6873_v2 = vld [vmem:[#allocation5 + $0x554] sm:$0xf0] }
 0x215   : > { %v2932_v59 = vmax.f32 %v2298_v33, 0.0 }
 0x216   : > { %2626 = vmatpush.bf16.msra.mxu2 %v5578_v45 }
 0x218   : > { %v2250_v52 = vpop.f32.mrf.mxu2 }
 0x219   : > { %v2251_v7 = vadd.f32 %v2250_v52, %v2202_v41  ;;  %v2299_v38 = vpop.f32.mrf.mxu3  ;;  %v2155_v35 = vpop.f32.mrf.mxu0  ;;  %v6085_v52 = vld [vmem:[#allocation5 + $0x448] sm:$0xf] }
 0x21a   : > { %v2156_v36 = vadd.f32 %v2155_v35, %v8032_v22  ;;  %v2204_v17 = vpop.f32.mrf.mxu1  ;;  %v5703_v22 = vld [vmem:[#allocation5 + $0x158] sm:$0xf0]  ;;  %v6086_v4 = vor.u32 %v6841_v34, %v6085_v52 }
 0x21b   : > { %v2300_v9 = vadd.f32 %v2299_v38, %v2251_v7  ;;  %v5706_v6 = vor.u32 %v6743_v18, %v5703_v22  ;;  %v9401_v22 = vld [vmem:[#allocation29_spill] sm:$0xff] }
 0x21c   : > { %v2205_v53 = vadd.f32 %v2204_v17, %v2156_v36  ;;  %2350 = vmatmul.bf16.gmra.mxu0 %v9398_v8  ;;  %2399 = vmatmul.bf16.gmra.mxu1 %v9399_v58 }
 0x21d   : > { %v2936_v40 = vmax.f32 %v2300_v9, 0.0  ;;  %2448 = vmatmul.bf16.gmra.mxu2 %v7743_v14  ;;  %2528 = vmatpush.bf16.msra.mxu0 %v6086_v4  ;;  %v6213_v9 = vld [vmem:[#allocation5 + $0x548] sm:$0xf] }
 0x21e   : > { %2497 = vmatmul.bf16.gmra.mxu3 %v7745_v15  ;;  %v6214_v12 = vor.u32 %v6873_v2, %v6213_v9  ;;  %v9402_v4 = vld [vmem:[#allocation30_spill] sm:$0xff] }
 0x21f   : > { %v8122_v28 = vpack.c.bf16 %v2936_v40, %v2932_v59  ;;  %2675 = vmatpush.bf16.msra.mxu3 %v5706_v6  ;;  %v6707_v6 = vld [vmem:[#allocation5 + $0x2c] sm:$0xf] }
 0x220   : > { %v2253_v41 = vpop.f32.mrf.mxu2  ;;  %2577 = vmatpush.bf16.msra.mxu1 %v6214_v12 }
 0x221   : > { %9400 = vst [vmem:[#allocation20_spill] sm:$0xff] %v8122_v28  ;;  %v2254_v33 = vadd.f32 %v2253_v41, %v2205_v53  ;;  %v2302_v23 = vpop.f32.mrf.mxu3  ;;  %v2157_v7 = vpop.f32.mrf.mxu0 }
 0x222   : > { %v2158_v38 = vadd.f32 %v2157_v7, %v8038_v56  ;;  %v2206_v35 = vpop.f32.mrf.mxu1  ;;  %v6837_v7 = vld [vmem:[#allocation5 + $0x434] sm:$0xf0] }
 0x223   : > { %v2303_v36 = vadd.f32 %v2302_v23, %v2254_v33  ;;  %v5559_v33 = vld [vmem:[#allocation5 + $0x38] sm:$0xf0] }
 0x224   : > { %v2207_v17 = vadd.f32 %v2206_v35, %v2158_v38  ;;  %v5562_v23 = vor.u32 %v6707_v6, %v5559_v33  ;;  %v6739_v38 = vld [vmem:[#allocation5 + $0x12c] sm:$0xf]  ;;  %v6869_v6 = vld [vmem:[#allocation5 + $0x534] sm:$0xf0] }
 0x225   : > { %v2940_v56 = vmax.f32 %v2303_v36, 0.0 }
 0x226   : > { %2627 = vmatpush.bf16.msra.mxu2 %v5562_v23 }
 0x228   : > { %v2255_v32 = vpop.f32.mrf.mxu2 }
 0x229   : > { %v2256_v59 = vadd.f32 %v2255_v32, %v2207_v17  ;;  %v2304_v40 = vpop.f32.mrf.mxu3  ;;  %v2160_v52 = vpop.f32.mrf.mxu0  ;;  %v6069_v32 = vld [vmem:[#allocation5 + $0x428] sm:$0xf] }
 0x22a   : > { %v2161_v53 = vadd.f32 %v2160_v52, %v8046_v60  ;;  %v2209_v34 = vpop.f32.mrf.mxu1  ;;  %v5687_v60 = vld [vmem:[#allocation5 + $0x138] sm:$0xf0]  ;;  %v6070_v9 = vor.u32 %v6837_v7, %v6069_v32 }
 0x22b   : > { %v2305_v18 = vadd.f32 %v2304_v40, %v2256_v59  ;;  %v5690_v2 = vor.u32 %v6739_v38, %v5687_v60  ;;  %v9404_v60 = vld [vmem:[#allocation31_spill] sm:$0xff] }
 0x22c   : > { %v2210_v45 = vadd.f32 %v2209_v34, %v2161_v53  ;;  %2355 = vmatmul.bf16.gmra.mxu0 %v9401_v22  ;;  %2404 = vmatmul.bf16.gmra.mxu1 %v9402_v4 }
 0x22d   : > { %v2944_v41 = vmax.f32 %v2305_v18, 0.0  ;;  %2453 = vmatmul.bf16.gmra.mxu2 %v7763_v42  ;;  %2529 = vmatpush.bf16.msra.mxu0 %v6070_v9  ;;  %v6197_v18 = vld [vmem:[#allocation5 + $0x528] sm:$0xf]  ;;  %v9405_v9 = vld [vmem:[#allocation32_spill] sm:$0xff] }
 0x22e   : > { %2502 = vmatmul.bf16.gmra.mxu3 %v7765_v43  ;;  %v6198_v33 = vor.u32 %v6869_v6, %v6197_v18 }
 0x22f   : > { %v8130_v35 = vpack.c.bf16 %v2944_v41, %v2940_v56  ;;  %2676 = vmatpush.bf16.msra.mxu3 %v5690_v2  ;;  %v6703_v2 = vld [vmem:[#allocation5 + $0xc] sm:$0xf] }
 0x230   : > { %v2258_v17 = vpop.f32.mrf.mxu2  ;;  %2578 = vmatpush.bf16.msra.mxu1 %v6198_v33 }
 0x231   : > { %9403 = vst [vmem:[#allocation22_spill] sm:$0xff] %v8130_v35  ;;  %v2259_v36 = vadd.f32 %v2258_v17, %v2210_v45  ;;  %v2307_v12 = vpop.f32.mrf.mxu3  ;;  %v2162_v59 = vpop.f32.mrf.mxu0 }
 0x232   : > { %v2163_v40 = vadd.f32 %v2162_v59, %v8052_v3  ;;  %v2211_v52 = vpop.f32.mrf.mxu1  ;;  %v6833_v59 = vld [vmem:[#allocation5 + $0x414] sm:$0xf0] }
 0x233   : > { %v2308_v53 = vadd.f32 %v2307_v12, %v2259_v36  ;;  %v5543_v36 = vld [vmem:[#allocation5 + $0x18] sm:$0xf0] }
 0x234   : > { %v2212_v34 = vadd.f32 %v2211_v52, %v2163_v40  ;;  %v5546_v12 = vor.u32 %v6703_v2, %v5543_v36  ;;  %v6735_v40 = vld [vmem:[#allocation5 + $0x10c] sm:$0xf]  ;;  %v6865_v2 = vld [vmem:[#allocation5 + $0x514] sm:$0xf0] }
 0x235   : > { %v2948_v3 = vmax.f32 %v2308_v53, 0.0 }
 0x236   : > { %2628 = vmatpush.bf16.msra.mxu2 %v5546_v12 }
 0x238   : > { %v2260_v28 = vpop.f32.mrf.mxu2 }
 0x239   : > { %v2261_v56 = vadd.f32 %v2260_v28, %v2212_v34  ;;  %v2309_v41 = vpop.f32.mrf.mxu3  ;;  %v2165_v32 = vpop.f32.mrf.mxu0  ;;  %v6053_v28 = vld [vmem:[#allocation5 + $0x408] sm:$0xf] }
 0x23a   : > { %v2166_v45 = vadd.f32 %v2165_v32, %v8060_v29  ;;  %v2214_v7 = vpop.f32.mrf.mxu1  ;;  %v5671_v29 = vld [vmem:[#allocation5 + $0x118] sm:$0xf0]  ;;  %v6054_v18 = vor.u32 %v6833_v59, %v6053_v28 }
 0x23b   : > { %v2310_v38 = vadd.f32 %v2309_v41, %v2261_v56  ;;  %v5674_v6 = vor.u32 %v6735_v40, %v5671_v29  ;;  %v9407_v29 = vld [vmem:[#allocation33_spill] sm:$0xff] }
 0x23c   : > { %v2215_v23 = vadd.f32 %v2214_v7, %v2166_v45  ;;  %2360 = vmatmul.bf16.gmra.mxu0 %v9404_v60  ;;  %2409 = vmatmul.bf16.gmra.mxu1 %v9405_v9 }
 0x23d   : > { %v2952_v17 = vmax.f32 %v2310_v38, 0.0  ;;  %2458 = vmatmul.bf16.gmra.mxu2 %v7783_v10  ;;  %2530 = vmatpush.bf16.msra.mxu0 %v6054_v18  ;;  %v6181_v38 = vld [vmem:[#allocation5 + $0x508] sm:$0xf] }
 0x23e   : > { %2507 = vmatmul.bf16.gmra.mxu3 %v7785_v11  ;;  %v6182_v36 = vor.u32 %v6865_v2, %v6181_v38  ;;  %v9408_v18 = vld [vmem:[#allocation34_spill] sm:$0xff] }
 0x23f   : > { %v8138_v52 = vpack.c.bf16 %v2952_v17, %v2948_v3  ;;  %2677 = vmatpush.bf16.msra.mxu3 %v5674_v6  ;;  %v6859_v6 = vld [vmem:[#allocation5 + $0x4ec] sm:$0xf] }
 0x240   : > { %v2263_v34 = vpop.f32.mrf.mxu2  ;;  %2579 = vmatpush.bf16.msra.mxu1 %v6182_v36 }
 0x241   : > { %9406 = vst [vmem:[#allocation23_spill] sm:$0xff] %v8138_v52  ;;  %v2264_v53 = vadd.f32 %v2263_v34, %v2215_v23  ;;  %v2312_v33 = vpop.f32.mrf.mxu3  ;;  %v2167_v56 = vpop.f32.mrf.mxu0  ;;  %v8157_v52 = vld [vmem:[#allocation7] sm:$0xf] }
 0x242   : > { %v2168_v41 = vadd.f32 %v2167_v56, %v8066_v16  ;;  %v2216_v32 = vpop.f32.mrf.mxu1  ;;  %v5911_v56 = vld [vmem:[#allocation5 + $0x2f8] sm:$0xf0] }
 0x243   : > { %v2313_v45 = vadd.f32 %v2312_v33, %v2264_v53  ;;  %v6167_v53 = vld [vmem:[#allocation5 + $0x4f8] sm:$0xf0] }
 0x244   : > { %v2217_v7 = vadd.f32 %v2216_v32, %v2168_v41  ;;  %v6170_v33 = vor.u32 %v6859_v6, %v6167_v53  ;;  %v6891_v41 = vld [vmem:[#allocation5 + $0x5ec] sm:$0xf] }
 0x245   : > { %v2956_v16 = vmax.f32 %v2313_v45, 0.0 }
 0x246   : > { %2817 = vmatpush.bf16.msrb.mxu2 %v6170_v33 }
 0x248   : > { %v2265_v35 = vpop.f32.mrf.mxu2 }
 0x249   : > { %v2266_v3 = vadd.f32 %v2265_v35, %v2217_v7  ;;  %v2314_v17 = vpop.f32.mrf.mxu3  ;;  %v2170_v28 = vpop.f32.mrf.mxu0  ;;  %v6795_v35 = vld [vmem:[#allocation5 + $0x2ec] sm:$0xf] }
 0x24a   : > { %v2171_v23 = vadd.f32 %v2170_v28, %v8074_v30  ;;  %v2219_v59 = vpop.f32.mrf.mxu1  ;;  %v6295_v30 = vld [vmem:[#allocation5 + $0x5f8] sm:$0xf0]  ;;  %v5914_v38 = vor.u32 %v6795_v35, %v5911_v56 }
 0x24b   : > { %v2315_v40 = vadd.f32 %v2314_v17, %v2266_v3  ;;  %v6298_v2 = vor.u32 %v6891_v41, %v6295_v30  ;;  %v9410_v30 = vld [vmem:[#allocation35_spill] sm:$0xff] }
 0x24c   : > { %v2220_v12 = vadd.f32 %v2219_v59, %v2171_v23  ;;  %2365 = vmatmul.bf16.gmra.mxu0 %v9407_v29  ;;  %2414 = vmatmul.bf16.gmra.mxu1 %v9408_v18  ;;  %v6827_v59 = vld [vmem:[#allocation5 + $0x3ec] sm:$0xf] }
 0x24d   : > { %v2960_v34 = vmax.f32 %v2315_v40, 0.0  ;;  %2463 = vmatmul.bf16.gmra.mxu2 %v7803_v46  ;;  %2719 = vmatpush.bf16.msrb.mxu0 %v5914_v38  ;;  %v6039_v40 = vld [vmem:[#allocation5 + $0x3f8] sm:$0xf0]  ;;  %v9411_v38 = vld [vmem:[#allocation36_spill] sm:$0xff] }
 0x24e   : > { %2512 = vmatmul.bf16.gmra.mxu3 %v7805_v47  ;;  %v6042_v53 = vor.u32 %v6827_v59, %v6039_v40 }
 0x24f   : > { %v8146_v32 = vpack.c.bf16 %v2960_v34, %v2956_v16  ;;  %2866 = vmatpush.bf16.msrb.mxu3 %v6298_v2  ;;  %v6855_v2 = vld [vmem:[#allocation5 + $0x4cc] sm:$0xf] }
 0x250   : > { %v2268_v7 = vpop.f32.mrf.mxu2  ;;  %2768 = vmatpush.bf16.msrb.mxu1 %v6042_v53 }
 0x251   : > { %9409 = vst [vmem:[#allocation24_spill] sm:$0xff] %v8146_v32  ;;  %v2269_v45 = vadd.f32 %v2268_v7, %v2220_v12  ;;  %v2317_v36 = vpop.f32.mrf.mxu3  ;;  %v2172_v3 = vpop.f32.mrf.mxu0 }
 0x252   : > { %v2173_v17 = vadd.f32 %v2172_v3, %v8080_v20  ;;  %v2221_v28 = vpop.f32.mrf.mxu1 }
 0x253   : > { %v2318_v23 = vadd.f32 %v2317_v36, %v2269_v45  ;;  %v6151_v45 = vld [vmem:[#allocation5 + $0x4d8] sm:$0xf0]  ;;  %v6791_v36 = vld [vmem:[#allocation5 + $0x2cc] sm:$0xf] }
 0x254   : > { %v2222_v6 = vadd.f32 %v2221_v28, %v2173_v17  ;;  %v6154_v3 = vor.u32 %v6855_v2, %v6151_v45  ;;  %v5895_v17 = vld [vmem:[#allocation5 + $0x2d8] sm:$0xf0]  ;;  %v6887_v28 = vld [vmem:[#allocation5 + $0x5cc] sm:$0xf] }
 0x255   : > { %v2964_v20 = vmax.f32 %v2318_v23, 0.0  ;;  %v5898_v40 = vor.u32 %v6791_v36, %v5895_v17 }
 0x256   : > { %2818 = vmatpush.bf16.msrb.mxu2 %v6154_v3 }
 0x257   : > { %2720 = vmatpush.bf16.msrb.mxu0 %v5898_v40 }
 0x258   : > { %v2270_v16 = vpop.f32.mrf.mxu2 }
 0x259   : > { %v2271_v34 = vadd.f32 %v2270_v16, %v2222_v6  ;;  %v2319_v32 = vpop.f32.mrf.mxu3  ;;  %v2175_v35 = vpop.f32.mrf.mxu0 }
 0x25a   : > { %v2176_v12 = vadd.f32 %v2175_v35, %v8088_v49  ;;  %v2224_v56 = vpop.f32.mrf.mxu1  ;;  %v6279_v49 = vld [vmem:[#allocation5 + $0x5d8] sm:$0xf0] }
 0x25b   : > { %v2320_v41 = vadd.f32 %v2319_v32, %v2271_v34  ;;  %v6282_v6 = vor.u32 %v6887_v28, %v6279_v49 }
 0x25c   : > { %v2225_v33 = vadd.f32 %v2224_v56, %v2176_v12  ;;  %2370 = vmatmul.bf16.gmra.mxu0 %v9410_v30  ;;  %2419 = vmatmul.bf16.gmra.mxu1 %v9411_v38  ;;  %v6823_v56 = vld [vmem:[#allocation5 + $0x3cc] sm:$0xf] }
 0x25d   : > { %v2968_v7 = vmax.f32 %v2320_v41, 0.0  ;;  %2468 = vmatmul.bf16.gmra.mxu2 %v9385_v48  ;;  %2867 = vmatpush.bf16.msrb.mxu3 %v6282_v6  ;;  %v6023_v41 = vld [vmem:[#allocation5 + $0x3d8] sm:$0xf0]  ;;  %v6851_v6 = vld [vmem:[#allocation5 + $0x4ac] sm:$0xf] }
 0x25e   : > { %2517 = vmatmul.bf16.gmra.mxu3 %v9386_v37  ;;  %v6026_v45 = vor.u32 %v6823_v56, %v6023_v41  ;;  %v6263_v56 = vld [vmem:[#allocation5 + $0x5b8] sm:$0xf0] }
 0x25f   : > { %v8154_v59 = vpack.c.bf16 %v2968_v7, %v2964_v20  ;;  %v8160_v20 = vperm.slane %v8157_v52, 2 }
 0x260   : > { %v2273_v32 = vpop.f32.mrf.mxu2  ;;  %2769 = vmatpush.bf16.msrb.mxu1 %v6026_v45 }
 0x261   : > { %9412 = vst [vmem:[#allocation25_spill] sm:$0xff] %v8154_v59  ;;  %v2274_v23 = vadd.f32 %v2273_v32, %v2225_v33  ;;  %v2322_v53 = vpop.f32.mrf.mxu3  ;;  %v2177_v16 = vpop.f32.mrf.mxu0  ;;  %v6988_v59 = vld [vmem:[#allocation8 + $0x2f0] sm:$0xf0] }
 0x262   : > { %v2178_v34 = vadd.f32 %v2177_v16, %v8094_v13  ;;  %v2226_v35 = vpop.f32.mrf.mxu1 }
 0x263   : > { %v2323_v12 = vadd.f32 %v2322_v53, %v2274_v23  ;;  %v6135_v23 = vld [vmem:[#allocation5 + $0x4b8] sm:$0xf0]  ;;  %v6787_v53 = vld [vmem:[#allocation5 + $0x2ac] sm:$0xf] }
 0x264   : > { %v2227_v2 = vadd.f32 %v2226_v35, %v2178_v34  ;;  %v6138_v16 = vor.u32 %v6851_v6, %v6135_v23  ;;  %v5879_v34 = vld [vmem:[#allocation5 + $0x2b8] sm:$0xf0]  ;;  %v6883_v35 = vld [vmem:[#allocation5 + $0x5ac] sm:$0xf] }
 0x265   : > { %v2972_v32 = vmax.f32 %v2323_v12, 0.0  ;;  %v5882_v45 = vor.u32 %v6787_v53, %v5879_v34 }
 0x266   : > { %2819 = vmatpush.bf16.msrb.mxu2 %v6138_v16 }
 0x267   : > { %2721 = vmatpush.bf16.msrb.mxu0 %v5882_v45  ;;  %v6783_v45 = vld [vmem:[#allocation5 + $0x28c] sm:$0xf] }
 0x268   : > { %v2275_v33 = vpop.f32.mrf.mxu2 }
 0x269   : > { %v2276_v7 = vadd.f32 %v2275_v33, %v2227_v2  ;;  %v2324_v36 = vpop.f32.mrf.mxu3  ;;  %v2336_v3 = vpop.f32.mrf.mxu0  ;;  %v6266_v33 = vor.u32 %v6883_v35, %v6263_v56  ;;  %v6847_v56 = vld [vmem:[#allocation5 + $0x48c] sm:$0xf] }
 0x26a   : > { %v2337_v13 = vadd.f32 %v2336_v3, %v8160_v20  ;;  %v2385_v17 = vpop.f32.mrf.mxu1 }
 0x26b   : > { %v2325_v28 = vadd.f32 %v2324_v36, %v2276_v7  ;;  %2868 = vmatpush.bf16.msrb.mxu3 %v6266_v33 }
 0x26c   : > { %v2386_v49 = vadd.f32 %v2385_v17, %v2337_v13  ;;  %2531 = vmatmul.bf16.vlgmr.msra.gmra.mxu0 %v7840_v62  ;;  %2580 = vmatmul.bf16.vlgmr.msra.gmra.mxu1 %v7842_v0  ;;  %v6819_v13 = vld [vmem:[#allocation5 + $0x3ac] sm:$0xf]  ;;  %v6007_v17 = vld [vmem:[#allocation5 + $0x3b8] sm:$0xf0] }
 0x26d   : > { %v2976_v40 = vmax.f32 %v2325_v28, 0.0  ;;  %2629 = vmatmul.bf16.vlgmr.msra.gmra.mxu2 %v9390_v61  ;;  %v6010_v6 = vor.u32 %v6819_v13, %v6007_v17 }
 0x26e   : > { %2678 = vmatmul.bf16.vlgmr.msra.gmra.mxu3 %v9391_v21 }
 0x26f   : > { %v8167_v41 = vpack.c.bf16 %v2976_v40, %v2972_v32  ;;  %2770 = vmatpush.bf16.msrb.mxu1 %v6010_v6 }
 0x270   : > { %v2434_v2 = vpop.f32.mrf.mxu2 }
 0x271   : > { %9413 = vst [vmem:[#allocation27_spill] sm:$0xff] %v8167_v41  ;;  %v2435_v12 = vadd.f32 %v2434_v2, %v2386_v49  ;;  %v2483_v7 = vpop.f32.mrf.mxu3  ;;  %v2338_v36 = vpop.f32.mrf.mxu0  ;;  %v6119_v2 = vld [vmem:[#allocation5 + $0x498] sm:$0xf0] }
 0x272   : > { %v2339_v61 = vadd.f32 %v2338_v36, %v8160_v20  ;;  %v2387_v3 = vpop.f32.mrf.mxu1  ;;  %v6122_v33 = vor.u32 %v6847_v56, %v6119_v2  ;;  %v6247_v36 = vld [vmem:[#allocation5 + $0x598] sm:$0xf0] }
 0x273   : > { %v8170_v21 = vadd.f32 %v2483_v7, %v2435_v12  ;;  %v5863_v12 = vld [vmem:[#allocation5 + $0x298] sm:$0xf0]  ;;  %v6879_v7 = vld [vmem:[#allocation5 + $0x58c] sm:$0xf] }
 0x274   : > { %v2388_v28 = vadd.f32 %v2387_v3, %v2339_v61  ;;  %v5866_v3 = vor.u32 %v6783_v45, %v5863_v12  ;;  %v6250_v13 = vor.u32 %v6879_v7, %v6247_v36  ;;  %2820 = vmatpush.bf16.msrb.mxu2 %v6122_v33  ;;  %v6843_v36 = vld [vmem:[#allocation5 + $0x46c] sm:$0xf] }
 0x276   : > { %2722 = vmatpush.bf16.msrb.mxu0 %v5866_v3  ;;  %2869 = vmatpush.bf16.msrb.mxu3 %v6250_v13  ;;  %v6779_v3 = vld [vmem:[#allocation5 + $0x26c] sm:$0xf] }
 0x278   : > { %v2436_v32 = vpop.f32.mrf.mxu2 }
 0x279   : > { %v2437_v40 = vadd.f32 %v2436_v32, %v2388_v28  ;;  %v2485_v23 = vpop.f32.mrf.mxu3  ;;  %v2341_v53 = vpop.f32.mrf.mxu0 }
 0x27a   : > { %v2342_v49 = vadd.f32 %v2341_v53, %v8160_v20  ;;  %v2390_v34 = vpop.f32.mrf.mxu1 }
 0x27b   : > { %v8173_v16 = vadd.f32 %v2485_v23, %v2437_v40  ;;  %v5991_v23 = vld [vmem:[#allocation5 + $0x398] sm:$0xf0] }
 0x27c   : > { %v2391_v35 = vadd.f32 %v2390_v34, %v2342_v49  ;;  %2536 = vmatmul.bf16.gmra.mxu0 %v7856_v1  ;;  %2585 = vmatmul.bf16.gmra.mxu1 %v7858_v5 }
 0x27d   : > { %2634 = vmatmul.bf16.gmra.mxu2 %v9392_v44 }
 0x27e   : > { %2683 = vmatmul.bf16.gmra.mxu3 %v9393_v39  ;;  %v6815_v39 = vld [vmem:[#allocation5 + $0x38c] sm:$0xf] }
 0x27f   : > { %v5994_v49 = vor.u32 %v6815_v39, %v5991_v23 }
 0x280   : > { %v2439_v61 = vpop.f32.mrf.mxu2 }
 0x281   : > { %v2440_v17 = vadd.f32 %v2439_v61, %v2391_v35  ;;  %v2488_v28 = vpop.f32.mrf.mxu3  ;;  %v2343_v6 = vpop.f32.mrf.mxu0  ;;  %2771 = vmatpush.bf16.msrb.mxu1 %v5994_v49  ;;  %v6103_v61 = vld [vmem:[#allocation5 + $0x478] sm:$0xf0] }
 0x282   : > { %v2344_v32 = vadd.f32 %v2343_v6, %v8160_v20  ;;  %v2392_v40 = vpop.f32.mrf.mxu1  ;;  %v6106_v13 = vor.u32 %v6843_v36, %v6103_v61  ;;  %v6231_v6 = vld [vmem:[#allocation5 + $0x578] sm:$0xf0] }
 0x283   : > { %v8180_v44 = vadd.f32 %v2488_v28, %v2440_v17  ;;  %v5847_v17 = vld [vmem:[#allocation5 + $0x278] sm:$0xf0]  ;;  %v6875_v28 = vld [vmem:[#allocation5 + $0x56c] sm:$0xf] }
 0x284   : > { %v2393_v53 = vadd.f32 %v2392_v40, %v2344_v32  ;;  %v5850_v40 = vor.u32 %v6779_v3, %v5847_v17  ;;  %v6234_v39 = vor.u32 %v6875_v28, %v6231_v6  ;;  %2821 = vmatpush.bf16.msrb.mxu2 %v6106_v13  ;;  %v6839_v6 = vld [vmem:[#allocation5 + $0x44c] sm:$0xf] }
 0x286   : > { %2723 = vmatpush.bf16.msrb.mxu0 %v5850_v40  ;;  %2870 = vmatpush.bf16.msrb.mxu3 %v6234_v39  ;;  %v6775_v40 = vld [vmem:[#allocation5 + $0x24c] sm:$0xf] }
 0x288   : > { %v2441_v34 = vpop.f32.mrf.mxu2 }
 0x289   : > { %v2442_v56 = vadd.f32 %v2441_v34, %v2393_v53  ;;  %v2490_v2 = vpop.f32.mrf.mxu3  ;;  %v2346_v45 = vpop.f32.mrf.mxu0 }
 0x28a   : > { %v2347_v35 = vadd.f32 %v2346_v45, %v8160_v20  ;;  %v2395_v12 = vpop.f32.mrf.mxu1 }
 0x28b   : > { %v8183_v33 = vadd.f32 %v2490_v2, %v2442_v56  ;;  %v5975_v2 = vld [vmem:[#allocation5 + $0x378] sm:$0xf0] }
 0x28c   : > { %v2396_v7 = vadd.f32 %v2395_v12, %v2347_v35  ;;  %2541 = vmatmul.bf16.gmra.mxu0 %v7874_v19  ;;  %2590 = vmatmul.bf16.gmra.mxu1 %v7876_v31 }
 0x28d   : > { %2639 = vmatmul.bf16.gmra.mxu2 %v9395_v57 }
 0x28e   : > { %2688 = vmatmul.bf16.gmra.mxu3 %v9396_v24  ;;  %v6811_v24 = vld [vmem:[#allocation5 + $0x36c] sm:$0xf] }
 0x28f   : > { %v5978_v35 = vor.u32 %v6811_v24, %v5975_v2 }
 0x290   : > { %v2444_v32 = vpop.f32.mrf.mxu2 }
 0x291   : > { %v2445_v23 = vadd.f32 %v2444_v32, %v2396_v7  ;;  %v2493_v53 = vpop.f32.mrf.mxu3  ;;  %v2348_v49 = vpop.f32.mrf.mxu0  ;;  %2772 = vmatpush.bf16.msrb.mxu1 %v5978_v35  ;;  %v6087_v32 = vld [vmem:[#allocation5 + $0x458] sm:$0xf0] }
 0x292   : > { %v2349_v34 = vadd.f32 %v2348_v49, %v8160_v20  ;;  %v2397_v56 = vpop.f32.mrf.mxu1  ;;  %v6090_v39 = vor.u32 %v6839_v6, %v6087_v32  ;;  %v6215_v49 = vld [vmem:[#allocation5 + $0x558] sm:$0xf0] }
 0x293   : > { %v8190_v57 = vadd.f32 %v2493_v53, %v2445_v23  ;;  %v5831_v23 = vld [vmem:[#allocation5 + $0x258] sm:$0xf0]  ;;  %v6871_v53 = vld [vmem:[#allocation5 + $0x54c] sm:$0xf] }
 0x294   : > { %v2398_v45 = vadd.f32 %v2397_v56, %v2349_v34  ;;  %v5834_v56 = vor.u32 %v6775_v40, %v5831_v23  ;;  %v6218_v24 = vor.u32 %v6871_v53, %v6215_v49  ;;  %2822 = vmatpush.bf16.msrb.mxu2 %v6090_v39  ;;  %v6835_v49 = vld [vmem:[#allocation5 + $0x42c] sm:$0xf] }
 0x296   : > { %2724 = vmatpush.bf16.msrb.mxu0 %v5834_v56  ;;  %2871 = vmatpush.bf16.msrb.mxu3 %v6218_v24  ;;  %v6771_v56 = vld [vmem:[#allocation5 + $0x22c] sm:$0xf] }
 0x298   : > { %v2446_v12 = vpop.f32.mrf.mxu2 }
 0x299   : > { %v2447_v36 = vadd.f32 %v2446_v12, %v2398_v45  ;;  %v2495_v61 = vpop.f32.mrf.mxu3  ;;  %v2351_v3 = vpop.f32.mrf.mxu0 }
 0x29a   : > { %v2352_v7 = vadd.f32 %v2351_v3, %v8160_v20  ;;  %v2400_v17 = vpop.f32.mrf.mxu1 }
 0x29b   : > { %v8193_v13 = vadd.f32 %v2495_v61, %v2447_v36  ;;  %v5959_v61 = vld [vmem:[#allocation5 + $0x358] sm:$0xf0] }
 0x29c   : > { %v2401_v28 = vadd.f32 %v2400_v17, %v2352_v7  ;;  %2546 = vmatmul.bf16.gmra.mxu0 %v7892_v63  ;;  %2595 = vmatmul.bf16.gmra.mxu1 %v7894_v50 }
 0x29d   : > { %2644 = vmatmul.bf16.gmra.mxu2 %v9398_v8 }
 0x29e   : > { %2693 = vmatmul.bf16.gmra.mxu3 %v9399_v58  ;;  %v6807_v58 = vld [vmem:[#allocation5 + $0x34c] sm:$0xf] }
 0x29f   : > { %v5962_v7 = vor.u32 %v6807_v58, %v5959_v61 }
 0x2a0   : > { %v2449_v34 = vpop.f32.mrf.mxu2 }
 0x2a1   : > { %v2450_v2 = vadd.f32 %v2449_v34, %v2401_v28  ;;  %v2498_v45 = vpop.f32.mrf.mxu3  ;;  %v2353_v35 = vpop.f32.mrf.mxu0  ;;  %2773 = vmatpush.bf16.msrb.mxu1 %v5962_v7  ;;  %v6071_v34 = vld [vmem:[#allocation5 + $0x438] sm:$0xf0] }
 0x2a2   : > { %v2354_v12 = vadd.f32 %v2353_v35, %v8160_v20  ;;  %v2402_v36 = vpop.f32.mrf.mxu1  ;;  %v6074_v24 = vor.u32 %v6835_v49, %v6071_v34  ;;  %v6199_v35 = vld [vmem:[#allocation5 + $0x538] sm:$0xf0] }
 0x2a3   : > { %v8200_v8 = vadd.f32 %v2498_v45, %v2450_v2  ;;  %v5815_v2 = vld [vmem:[#allocation5 + $0x238] sm:$0xf0]  ;;  %v6867_v45 = vld [vmem:[#allocation5 + $0x52c] sm:$0xf] }
 0x2a4   : > { %v2403_v3 = vadd.f32 %v2402_v36, %v2354_v12  ;;  %v5818_v36 = vor.u32 %v6771_v56, %v5815_v2  ;;  %v6202_v58 = vor.u32 %v6867_v45, %v6199_v35  ;;  %2823 = vmatpush.bf16.msrb.mxu2 %v6074_v24  ;;  %v9414_v35 = vld [vmem:[#allocation39_spill] sm:$0xff] }
 0x2a6   : > { %2725 = vmatpush.bf16.msrb.mxu0 %v5818_v36  ;;  %2872 = vmatpush.bf16.msrb.mxu3 %v6202_v58  ;;  %v6831_v36 = vld [vmem:[#allocation5 + $0x40c] sm:$0xf]  ;;  %v6055_v58 = vld [vmem:[#allocation5 + $0x418] sm:$0xf0] }
 0x2a8   : > { %v2451_v17 = vpop.f32.mrf.mxu2 }
 0x2a9   : > { %v2452_v6 = vadd.f32 %v2451_v17, %v2403_v3  ;;  %v2500_v32 = vpop.f32.mrf.mxu3  ;;  %v2356_v40 = vpop.f32.mrf.mxu0 }
 0x2aa   : > { %v2357_v28 = vadd.f32 %v2356_v40, %v8160_v20  ;;  %v2405_v23 = vpop.f32.mrf.mxu1 }
 0x2ab   : > { %v8203_v39 = vadd.f32 %v2500_v32, %v2452_v6  ;;  %v5943_v32 = vld [vmem:[#allocation5 + $0x338] sm:$0xf0] }
 0x2ac   : > { %v2406_v53 = vadd.f32 %v2405_v23, %v2357_v28  ;;  %2551 = vmatmul.bf16.gmra.mxu0 %v7910_v55  ;;  %2600 = vmatmul.bf16.gmra.mxu1 %v7912_v25 }
 0x2ad   : > { %2649 = vmatmul.bf16.gmra.mxu2 %v9401_v22 }
 0x2ae   : > { %2698 = vmatmul.bf16.gmra.mxu3 %v9402_v4  ;;  %v6803_v4 = vld [vmem:[#allocation5 + $0x32c] sm:$0xf] }
 0x2af   : > { %v5946_v28 = vor.u32 %v6803_v4, %v5943_v32 }
 0x2b0   : > { %v2454_v12 = vpop.f32.mrf.mxu2 }
 0x2b1   : > { %v2455_v61 = vadd.f32 %v2454_v12, %v2406_v53  ;;  %v2503_v3 = vpop.f32.mrf.mxu3  ;;  %v2358_v7 = vpop.f32.mrf.mxu0  ;;  %2774 = vmatpush.bf16.msrb.mxu1 %v5946_v28  ;;  %v9415_v12 = vld [vmem:[#allocation40_spill] sm:$0xff] }
 0x2b2   : > { %v2359_v17 = vadd.f32 %v2358_v7, %v8160_v20  ;;  %v2407_v6 = vpop.f32.mrf.mxu1  ;;  %v5799_v7 = vld [vmem:[#allocation5 + $0x218] sm:$0xf0] }
 0x2b3   : > { %v8210_v22 = vadd.f32 %v2503_v3, %v2455_v61  ;;  %v6767_v61 = vld [vmem:[#allocation5 + $0x20c] sm:$0xf]  ;;  %v6058_v3 = vor.u32 %v6831_v36, %v6055_v58 }
 0x2b4   : > { %v2408_v40 = vadd.f32 %v2407_v6, %v2359_v17  ;;  %v6863_v17 = vld [vmem:[#allocation5 + $0x50c] sm:$0xf]  ;;  %v6183_v6 = vld [vmem:[#allocation5 + $0x518] sm:$0xf0]  ;;  %v5802_v32 = vor.u32 %v6767_v61, %v5799_v7 }
 0x2b5   : > { %2824 = vmatpush.bf16.msrb.mxu2 %v6058_v3 }
 0x2b6   : > { %2726 = vmatpush.bf16.msrb.mxu0 %v5802_v32  ;;  %v9417_v32 = vld [vmem:[#allocation42_spill] sm:$0xff] }
 0x2b8   : > { %v2456_v23 = vpop.f32.mrf.mxu2 }
 0x2b9   : > { %v2457_v49 = vadd.f32 %v2456_v23, %v2408_v40  ;;  %v2505_v34 = vpop.f32.mrf.mxu3  ;;  %v2361_v56 = vpop.f32.mrf.mxu0  ;;  %v6186_v40 = vor.u32 %v6863_v17, %v6183_v6 }
 0x2ba   : > { %v2362_v53 = vadd.f32 %v2361_v56, %v8160_v20  ;;  %v2410_v2 = vpop.f32.mrf.mxu1 }
 0x2bb   : > { %v8213_v24 = vadd.f32 %v2505_v34, %v2457_v49  ;;  %2873 = vmatpush.bf16.msrb.mxu3 %v6186_v40 }
 0x2bc   : > { %v2411_v45 = vadd.f32 %v2410_v2, %v2362_v53  ;;  %2556 = vmatmul.bf16.gmra.mxu0 %v9414_v35  ;;  %2605 = vmatmul.bf16.gmra.mxu1 %v9415_v12  ;;  %v5927_v53 = vld [vmem:[#allocation5 + $0x318] sm:$0xf0] }
 0x2bd   : > { %2654 = vmatmul.bf16.gmra.mxu2 %v9404_v60 }
 0x2be   : > { %2703 = vmatmul.bf16.gmra.mxu3 %v9405_v9  ;;  %v6799_v9 = vld [vmem:[#allocation5 + $0x30c] sm:$0xf] }
 0x2bf   : > { %v5930_v36 = vor.u32 %v6799_v9, %v5927_v53 }
 0x2c0   : > { %v2459_v4 = vpop.f32.mrf.mxu2 }
 0x2c1   : > { %v2460_v28 = vadd.f32 %v2459_v4, %v2411_v45  ;;  %v2508_v23 = vpop.f32.mrf.mxu3  ;;  %v2363_v49 = vpop.f32.mrf.mxu0  ;;  %2775 = vmatpush.bf16.msrb.mxu1 %v5930_v36  ;;  %v9416_v4 = vld [vmem:[#allocation41_spill] sm:$0xff] }
 0x2c2   : > { %v2364_v34 = vadd.f32 %v2363_v49, %v8160_v20  ;;  %v2412_v56 = vpop.f32.mrf.mxu1 }
 0x2c3   : > { %v8220_v60 = vadd.f32 %v2508_v23, %v2460_v28 }
 0x2c4   : > { %v2413_v2 = vadd.f32 %v2412_v56, %v2364_v34 }
 0x2c8   : > { %v2461_v58 = vpop.f32.mrf.mxu2 }
 0x2c9   : > { %v2462_v41 = vadd.f32 %v2461_v58, %v2413_v2  ;;  %v2510_v61 = vpop.f32.mrf.mxu3  ;;  %v2366_v7 = vpop.f32.mrf.mxu0 }
 0x2ca   : > { %v2367_v45 = vadd.f32 %v2366_v7, %v8160_v20  ;;  %v2415_v17 = vpop.f32.mrf.mxu1 }
 0x2cb   : > { %v8223_v3 = vadd.f32 %v2510_v61, %v2462_v41 }
 0x2cc   : > { %v2416_v6 = vadd.f32 %v2415_v17, %v2367_v45  ;;  %2561 = vmatmul.bf16.gmra.mxu0 %v9416_v4  ;;  %2610 = vmatmul.bf16.gmra.mxu1 %v9417_v32  ;;  %v9418_v45 = vld [vmem:[#allocation43_spill] sm:$0xff]  ;;  %v9419_v17 = vld [vmem:[#allocation44_spill] sm:$0xff] }
 0x2cd   : > { %2659 = vmatmul.bf16.gmra.mxu2 %v9407_v29 }
 0x2ce   : > { %2708 = vmatmul.bf16.gmra.mxu3 %v9408_v18 }
 0x2d0   : > { %v2464_v40 = vpop.f32.mrf.mxu2 }
 0x2d1   : > { %v2465_v28 = vadd.f32 %v2464_v40, %v2416_v6  ;;  %v2513_v23 = vpop.f32.mrf.mxu3  ;;  %v2368_v49 = vpop.f32.mrf.mxu0  ;;  %v6577_v6 = vld [vmem:[#allocation8 + $0x228] sm:$0xf]  ;;  %v6964_v40 = vld [vmem:[#allocation8 + $0x230] sm:$0xf0] }
 0x2d2   : > { %v2369_v34 = vadd.f32 %v2368_v49, %v8160_v20  ;;  %v2417_v56 = vpop.f32.mrf.mxu1 }
 0x2d3   : > { %v8230_v9 = vadd.f32 %v2513_v23, %v2465_v28  ;;  %v6578_v28 = vor.u32 %v6964_v40, %v6577_v6  ;;  %v6940_v6 = vld [vmem:[#allocation8 + $0x170] sm:$0xf0] }
 0x2d4   : > { %v2418_v41 = vadd.f32 %v2417_v56, %v2369_v34 }
 0x2d5   : > { %3757 = vmatpush.bf16.msra.mxu2 %v6578_v28 }
 0x2d8   : > { %v2466_v53 = vpop.f32.mrf.mxu2 }
 0x2d9   : > { %v2467_v2 = vadd.f32 %v2466_v53, %v2418_v41  ;;  %v2515_v36 = vpop.f32.mrf.mxu3  ;;  %v2371_v58 = vpop.f32.mrf.mxu0 }
 0x2da   : > { %v2372_v61 = vadd.f32 %v2371_v58, %v8160_v20  ;;  %v2420_v7 = vpop.f32.mrf.mxu1  ;;  %v6916_v58 = vld [vmem:[#allocation8 + $0xb0] sm:$0xf0] }
 0x2db   : > { %v8233_v29 = vadd.f32 %v2515_v36, %v2467_v2  ;;  %v6385_v36 = vld [vmem:[#allocation8 + $0xa8] sm:$0xf] }
 0x2dc   : > { %v2421_v18 = vadd.f32 %v2420_v7, %v2372_v61  ;;  %2566 = vmatmul.bf16.gmra.mxu0 %v9418_v45  ;;  %2615 = vmatmul.bf16.gmra.mxu1 %v9419_v17  ;;  %v6673_v61 = vld [vmem:[#allocation8 + $0x2e8] sm:$0xf] }
 0x2dd   : > { %2664 = vmatmul.bf16.gmra.mxu2 %v9410_v30  ;;  %v6386_v30 = vor.u32 %v6916_v58, %v6385_v36  ;;  %v6481_v17 = vld [vmem:[#allocation8 + $0x168] sm:$0xf] }
 0x2de   : > { %2713 = vmatmul.bf16.gmra.mxu3 %v9411_v38  ;;  %v6674_v38 = vor.u32 %v6988_v59, %v6673_v61  ;;  %v8249_v59 = vperm.slane %v8157_v52, 3  ;;  %v6661_v52 = vld [vmem:[#allocation8 + $0x2d0] sm:$0xf] }
 0x2df   : > { %3659 = vmatpush.bf16.msra.mxu0 %v6386_v30 }
 0x2e0   : > { %v2469_v23 = vpop.f32.mrf.mxu2  ;;  %3806 = vmatpush.bf16.msra.mxu3 %v6674_v38  ;;  %v6913_v38 = vld [vmem:[#allocation8 + $0x98] sm:$0xf0] }
 0x2e1   : > { %v2470_v49 = vadd.f32 %v2469_v23, %v2421_v18  ;;  %v2518_v34 = vpop.f32.mrf.mxu3  ;;  %v2373_v56 = vpop.f32.mrf.mxu0  ;;  %v6482_v18 = vor.u32 %v6940_v6, %v6481_v17  ;;  %v6565_v17 = vld [vmem:[#allocation8 + $0x210] sm:$0xf] }
 0x2e2   : > { %v2374_v41 = vadd.f32 %v2373_v56, %v8160_v20  ;;  %v2422_v53 = vpop.f32.mrf.mxu1 }
 0x2e3   : > { %v8240_v2 = vadd.f32 %v2518_v34, %v2470_v49  ;;  %3708 = vmatpush.bf16.msra.mxu1 %v6482_v18 }
 0x2e4   : > { %v2423_v7 = vadd.f32 %v2422_v53, %v2374_v41  ;;  %v9420_v41 = vld [vmem:[#allocation21_spill] sm:$0xff] }
 0x2e5   : > { %v6961_v53 = vld [vmem:[#allocation8 + $0x218] sm:$0xf0] }
 0x2e6   : > { %v6566_v36 = vor.u32 %v6961_v53, %v6565_v17 }
 0x2e8   : > { %v2471_v40 = vpop.f32.mrf.mxu2  ;;  %3758 = vmatpush.bf16.msra.mxu2 %v6566_v36 }
 0x2e9   : > { %v2472_v23 = vadd.f32 %v2471_v40, %v2423_v7  ;;  %v2520_v28 = vpop.f32.mrf.mxu3  ;;  %v2532_v45 = vpop.f32.mrf.mxu0 }
 0x2ea   : > { %v2533_v20 = vadd.f32 %v2532_v45, %v8170_v21  ;;  %v2581_v49 = vpop.f32.mrf.mxu1 }
 0x2eb   : > { %v8243_v34 = vadd.f32 %v2520_v28, %v2472_v23 }
 0x2ec   : > { %v2582_v56 = vadd.f32 %v2581_v49, %v2533_v20  ;;  %2727 = vmatmul.bf16.vlgmr.msrb.gmra.mxu0 %v7683_v54  ;;  %2776 = vmatmul.bf16.vlgmr.msrb.gmra.mxu1 %v9420_v41  ;;  %v6469_v20 = vld [vmem:[#allocation8 + $0x150] sm:$0xf]  ;;  %v6937_v49 = vld [vmem:[#allocation8 + $0x158] sm:$0xf0] }
 0x2ed   : > { %2825 = vmatmul.bf16.vlgmr.msrb.gmra.mxu2 %v7840_v62  ;;  %v6373_v62 = vld [vmem:[#allocation8 + $0x90] sm:$0xf]  ;;  %v6470_v41 = vor.u32 %v6937_v49, %v6469_v20 }
 0x2ee   : > { %2874 = vmatmul.bf16.vlgmr.msrb.gmra.mxu3 %v7842_v0  ;;  %v6374_v18 = vor.u32 %v6913_v38, %v6373_v62  ;;  %v6985_v0 = vld [vmem:[#allocation8 + $0x2d8] sm:$0xf0]  ;;  %v2917_v23 = vmax.f32 %v2582_v56, 0.0 }
 0x2ef   : > { %v6662_v40 = vor.u32 %v6985_v0, %v6661_v52  ;;  %3709 = vmatpush.bf16.msra.mxu1 %v6470_v41 }
 0x2f0   : > { %v2630_v58 = vpop.f32.mrf.mxu2  ;;  %3660 = vmatpush.bf16.msra.mxu0 %v6374_v18 }
 0x2f1   : > { %v2631_v21 = vadd.f32 %v2630_v58, %v8249_v59  ;;  %v2679_v45 = vpop.f32.mrf.mxu3  ;;  %v2534_v61 = vpop.f32.mrf.mxu0  ;;  %3807 = vmatpush.bf16.msra.mxu3 %v6662_v40 }
 0x2f2   : > { %v2535_v54 = vadd.f32 %v2534_v61, %v8173_v16  ;;  %v2583_v7 = vpop.f32.mrf.mxu1 }
 0x2f3   : > { %v8254_v30 = vadd.f32 %v2679_v45, %v2631_v21 }
 0x2f4   : > { %v2584_v6 = vadd.f32 %v2583_v7, %v2535_v54  ;;  %v6553_v54 = vld [vmem:[#allocation8 + $0x1f8] sm:$0xf]  ;;  %v6958_v7 = vld [vmem:[#allocation8 + $0x200] sm:$0xf0] }
 0x2f5   : > { %v6554_v62 = vor.u32 %v6958_v7, %v6553_v54 }
 0x2f6   : > { %v2921_v28 = vmax.f32 %v2584_v6, 0.0 }
 0x2f7   : > { %3759 = vmatpush.bf16.msra.mxu2 %v6554_v62 }
 0x2f8   : > { %v8256_v17 = vpack.c.bf16 %v2921_v28, %v2917_v23  ;;  %v2632_v16 = vpop.f32.mrf.mxu2  ;;  %v6649_v23 = vld [vmem:[#allocation8 + $0x2b8] sm:$0xf] }
 0x2f9   : > { %v2633_v53 = vadd.f32 %v2632_v16, %v8249_v59  ;;  %v2681_v36 = vpop.f32.mrf.mxu3  ;;  %v2537_v58 = vpop.f32.mrf.mxu0  ;;  %v6457_v16 = vld [vmem:[#allocation8 + $0x138] sm:$0xf] }
 0x2fa   : > { %v2538_v21 = vadd.f32 %v2537_v58, %v8180_v44  ;;  %v2586_v45 = vpop.f32.mrf.mxu1 }
 0x2fb   : > { %v8260_v61 = vadd.f32 %v2681_v36, %v2633_v53  ;;  %v6934_v53 = vld [vmem:[#allocation8 + $0x140] sm:$0xf0] }
 0x2fc   : > { %v2587_v56 = vadd.f32 %v2586_v45, %v2538_v21  ;;  %2732 = vmatmul.bf16.gmra.mxu0 %v7703_v26  ;;  %2781 = vmatmul.bf16.gmra.mxu1 %v7705_v27  ;;  %v6361_v26 = vld [vmem:[#allocation8 + $0x78] sm:$0xf]  ;;  %v6910_v27 = vld [vmem:[#allocation8 + $0x80] sm:$0xf0]  ;;  %v6458_v36 = vor.u32 %v6934_v53, %v6457_v16 }
 0x2fd   : > { %2830 = vmatmul.bf16.gmra.mxu2 %v7856_v1  ;;  %v6362_v28 = vor.u32 %v6910_v27, %v6361_v26 }
 0x2fe   : > { %2879 = vmatmul.bf16.gmra.mxu3 %v7858_v5  ;;  %v6982_v5 = vld [vmem:[#allocation8 + $0x2c0] sm:$0xf0]  ;;  %v2925_v49 = vmax.f32 %v2587_v56, 0.0  ;;  %3710 = vmatpush.bf16.msra.mxu1 %v6458_v36  ;;  %v6445_v36 = vld [vmem:[#allocation8 + $0x120] sm:$0xf] }
 0x2ff   : > { %v6650_v20 = vor.u32 %v6982_v5, %v6649_v23  ;;  %3661 = vmatpush.bf16.msra.mxu0 %v6362_v28  ;;  %v6907_v5 = vld [vmem:[#allocation8 + $0x68] sm:$0xf0] }
 0x300   : > { %v2635_v38 = vpop.f32.mrf.mxu2 }
 0x301   : > { %v2636_v52 = vadd.f32 %v2635_v38, %v8249_v59  ;;  %v2684_v6 = vpop.f32.mrf.mxu3  ;;  %v2539_v44 = vpop.f32.mrf.mxu0  ;;  %3808 = vmatpush.bf16.msra.mxu3 %v6650_v20  ;;  %v6637_v20 = vld [vmem:[#allocation8 + $0x2a0] sm:$0xf] }
 0x302   : > { %v2540_v18 = vadd.f32 %v2539_v44, %v8183_v33  ;;  %v2588_v0 = vpop.f32.mrf.mxu1  ;;  %v6955_v44 = vld [vmem:[#allocation8 + $0x1e8] sm:$0xf0] }
 0x303   : > { %v8268_v40 = vadd.f32 %v2684_v6, %v2636_v52  ;;  %v9421_v52 = vld [vmem:[#allocation26_spill] sm:$0xff] }
 0x304   : > { %v2589_v1 = vadd.f32 %v2588_v0, %v2540_v18  ;;  %v6541_v6 = vld [vmem:[#allocation8 + $0x1e0] sm:$0xf] }
 0x305   : > { %v6542_v18 = vor.u32 %v6955_v44, %v6541_v6 }
 0x306   : > { %v2929_v41 = vmax.f32 %v2589_v1, 0.0 }
 0x307   : > { %3760 = vmatpush.bf16.msra.mxu2 %v6542_v18  ;;  %v6529_v18 = vld [vmem:[#allocation8 + $0x1c8] sm:$0xf] }
 0x308   : > { %v2637_v58 = vpop.f32.mrf.mxu2  ;;  %v8270_v21 = vpack.c.bf16 %v2929_v41, %v2925_v49 }
 0x309   : > { %v2638_v33 = vadd.f32 %v2637_v58, %v8249_v59  ;;  %v2686_v45 = vpop.f32.mrf.mxu3  ;;  %v2542_v54 = vpop.f32.mrf.mxu0  ;;  %v6931_v58 = vld [vmem:[#allocation8 + $0x128] sm:$0xf0] }
 0x30a   : > { %v2543_v7 = vadd.f32 %v2542_v54, %v8190_v57  ;;  %v2591_v62 = vpop.f32.mrf.mxu1 }
 0x30b   : > { %v8274_v38 = vadd.f32 %v2686_v45, %v2638_v33  ;;  %v6446_v33 = vor.u32 %v6931_v58, %v6445_v36 }
 0x30c   : > { %v2592_v56 = vadd.f32 %v2591_v62, %v2543_v7  ;;  %2737 = vmatmul.bf16.gmra.mxu0 %v7723_v51  ;;  %2786 = vmatmul.bf16.gmra.mxu1 %v9421_v52  ;;  %v6349_v51 = vld [vmem:[#allocation8 + $0x60] sm:$0xf] }
 0x30d   : > { %2835 = vmatmul.bf16.gmra.mxu2 %v7874_v19  ;;  %v6350_v49 = vor.u32 %v6907_v5, %v6349_v51  ;;  %3711 = vmatpush.bf16.msra.mxu1 %v6446_v33 }
 0x30e   : > { %2884 = vmatmul.bf16.gmra.mxu3 %v7876_v31  ;;  %v6979_v31 = vld [vmem:[#allocation8 + $0x2a8] sm:$0xf0]  ;;  %v2933_v16 = vmax.f32 %v2592_v56, 0.0 }
 0x30f   : > { %v6638_v41 = vor.u32 %v6979_v31, %v6637_v20  ;;  %3662 = vmatpush.bf16.msra.mxu0 %v6350_v49  ;;  %v6625_v20 = vld [vmem:[#allocation8 + $0x288] sm:$0xf] }
 0x310   : > { %v2640_v0 = vpop.f32.mrf.mxu2 }
 0x311   : > { %v2641_v26 = vadd.f32 %v2640_v0, %v8249_v59  ;;  %v2689_v27 = vpop.f32.mrf.mxu3  ;;  %v2544_v57 = vpop.f32.mrf.mxu0  ;;  %3809 = vmatpush.bf16.msra.mxu3 %v6638_v41  ;;  %v6952_v0 = vld [vmem:[#allocation8 + $0x1d0] sm:$0xf0] }
 0x312   : > { %v2545_v23 = vadd.f32 %v2544_v57, %v8193_v13  ;;  %v2593_v1 = vpop.f32.mrf.mxu1 }
 0x313   : > { %v8282_v28 = vadd.f32 %v2689_v27, %v2641_v26  ;;  %v6530_v26 = vor.u32 %v6952_v0, %v6529_v18  ;;  %v6949_v18 = vld [vmem:[#allocation8 + $0x1b8] sm:$0xf0] }
 0x314   : > { %v2594_v19 = vadd.f32 %v2593_v1, %v2545_v23 }
 0x315   : > { %3761 = vmatpush.bf16.msra.mxu2 %v6530_v26 }
 0x316   : > { %v2937_v53 = vmax.f32 %v2594_v19, 0.0 }
 0x318   : > { %v2642_v45 = vpop.f32.mrf.mxu2  ;;  %v8284_v54 = vpack.c.bf16 %v2937_v53, %v2933_v16  ;;  %v6433_v16 = vld [vmem:[#allocation8 + $0x108] sm:$0xf]  ;;  %v6928_v53 = vld [vmem:[#allocation8 + $0x110] sm:$0xf0] }
 0x319   : > { %v2643_v13 = vadd.f32 %v2642_v45, %v8249_v59  ;;  %v2691_v7 = vpop.f32.mrf.mxu3  ;;  %v2547_v62 = vpop.f32.mrf.mxu0  ;;  %v6434_v36 = vor.u32 %v6928_v53, %v6433_v16 }
 0x31a   : > { %v2548_v52 = vadd.f32 %v2547_v62, %v8200_v8  ;;  %v2596_v6 = vpop.f32.mrf.mxu1 }
 0x31b   : > { %v8288_v44 = vadd.f32 %v2691_v7, %v2643_v13  ;;  %3712 = vmatpush.bf16.msra.mxu1 %v6434_v36 }
 0x31c   : > { %v2597_v56 = vadd.f32 %v2596_v6, %v2548_v52  ;;  %2742 = vmatmul.bf16.gmra.mxu0 %v7743_v14  ;;  %2791 = vmatmul.bf16.gmra.mxu1 %v7745_v15  ;;  %v6337_v14 = vld [vmem:[#allocation8 + $0x48] sm:$0xf]  ;;  %v6904_v15 = vld [vmem:[#allocation8 + $0x50] sm:$0xf0] }
 0x31d   : > { %2840 = vmatmul.bf16.gmra.mxu2 %v7892_v63  ;;  %v6338_v19 = vor.u32 %v6904_v15, %v6337_v14 }
 0x31e   : > { %2889 = vmatmul.bf16.gmra.mxu3 %v7894_v50  ;;  %v6976_v50 = vld [vmem:[#allocation8 + $0x290] sm:$0xf0]  ;;  %v2941_v31 = vmax.f32 %v2597_v56, 0.0  ;;  %v6517_v56 = vld [vmem:[#allocation8 + $0x1b0] sm:$0xf] }
 0x31f   : > { %v6626_v49 = vor.u32 %v6976_v50, %v6625_v20  ;;  %3663 = vmatpush.bf16.msra.mxu0 %v6338_v19  ;;  %v6518_v0 = vor.u32 %v6949_v18, %v6517_v56  ;;  %v6421_v19 = vld [vmem:[#allocation8 + $0xf0] sm:$0xf]  ;;  %v6925_v50 = vld [vmem:[#allocation8 + $0xf8] sm:$0xf0] }
 0x320   : > { %v2645_v27 = vpop.f32.mrf.mxu2 }
 0x321   : > { %v2646_v57 = vadd.f32 %v2645_v27, %v8249_v59  ;;  %v2694_v23 = vpop.f32.mrf.mxu3  ;;  %v2549_v8 = vpop.f32.mrf.mxu0  ;;  %3810 = vmatpush.bf16.msra.mxu3 %v6626_v49  ;;  %3762 = vmatpush.bf16.msra.mxu2 %v6518_v0  ;;  %v6422_v49 = vor.u32 %v6925_v50, %v6421_v19  ;;  %v6919_v19 = vld [vmem:[#allocation8 + $0xc8] sm:$0xf0]  ;;  %v6493_v50 = vld [vmem:[#allocation8 + $0x180] sm:$0xf] }
 0x322   : > { %v2550_v1 = vadd.f32 %v2549_v8, %v8203_v39  ;;  %v2598_v51 = vpop.f32.mrf.mxu1 }
 0x323   : > { %v8296_v5 = vadd.f32 %v2694_v23, %v2646_v57  ;;  %3713 = vmatpush.bf16.msra.mxu1 %v6422_v49  ;;  %v6943_v49 = vld [vmem:[#allocation8 + $0x188] sm:$0xf0] }
 0x324   : > { %v2599_v63 = vadd.f32 %v2598_v51, %v2550_v1  ;;  %v6613_v51 = vld [vmem:[#allocation8 + $0x270] sm:$0xf] }
 0x326   : > { %v2945_v41 = vmax.f32 %v2599_v63, 0.0 }
 0x328   : > { %v2647_v58 = vpop.f32.mrf.mxu2  ;;  %v8298_v33 = vpack.c.bf16 %v2945_v41, %v2941_v31 }
 0x329   : > { %v2648_v39 = vadd.f32 %v2647_v58, %v8249_v59  ;;  %v2696_v45 = vpop.f32.mrf.mxu3  ;;  %v2552_v13 = vpop.f32.mrf.mxu0 }
 0x32a   : > { %v2553_v7 = vadd.f32 %v2552_v13, %v8210_v22  ;;  %v2601_v62 = vpop.f32.mrf.mxu1 }
 0x32b   : > { %v8302_v52 = vadd.f32 %v2696_v45, %v2648_v39  ;;  %v6505_v39 = vld [vmem:[#allocation8 + $0x198] sm:$0xf]  ;;  %v6946_v45 = vld [vmem:[#allocation8 + $0x1a0] sm:$0xf0] }
 0x32c   : > { %v2602_v6 = vadd.f32 %v2601_v62, %v2553_v7  ;;  %2747 = vmatmul.bf16.gmra.mxu0 %v7763_v42  ;;  %2796 = vmatmul.bf16.gmra.mxu1 %v7765_v43  ;;  %v6325_v42 = vld [vmem:[#allocation8 + $0x30] sm:$0xf]  ;;  %v6901_v43 = vld [vmem:[#allocation8 + $0x38] sm:$0xf0]  ;;  %v6506_v13 = vor.u32 %v6946_v45, %v6505_v39 }
 0x32d   : > { %2845 = vmatmul.bf16.gmra.mxu2 %v7910_v55  ;;  %v6326_v14 = vor.u32 %v6901_v43, %v6325_v42 }
 0x32e   : > { %2894 = vmatmul.bf16.gmra.mxu3 %v7912_v25  ;;  %v6973_v25 = vld [vmem:[#allocation8 + $0x278] sm:$0xf0]  ;;  %v2949_v20 = vmax.f32 %v2602_v6, 0.0  ;;  %3763 = vmatpush.bf16.msra.mxu2 %v6506_v13 }
 0x32f   : > { %v6614_v15 = vor.u32 %v6973_v25, %v6613_v51  ;;  %3664 = vmatpush.bf16.msra.mxu0 %v6326_v14  ;;  %v6397_v14 = vld [vmem:[#allocation8 + $0xc0] sm:$0xf] }
 0x330   : > { %v2650_v26 = vpop.f32.mrf.mxu2 }
 0x331   : > { %v2651_v27 = vadd.f32 %v2650_v26, %v8249_v59  ;;  %v2699_v57 = vpop.f32.mrf.mxu3  ;;  %v2554_v22 = vpop.f32.mrf.mxu0  ;;  %3811 = vmatpush.bf16.msra.mxu3 %v6614_v15  ;;  %v6601_v26 = vld [vmem:[#allocation8 + $0x258] sm:$0xf] }
 0x332   : > { %v2555_v23 = vadd.f32 %v2554_v22, %v8213_v24  ;;  %v2603_v8 = vpop.f32.mrf.mxu1  ;;  %v6922_v22 = vld [vmem:[#allocation8 + $0xe0] sm:$0xf0] }
 0x333   : > { %v8310_v1 = vadd.f32 %v2699_v57, %v2651_v27  ;;  %v6409_v57 = vld [vmem:[#allocation8 + $0xd8] sm:$0xf] }
 0x334   : > { %v2604_v55 = vadd.f32 %v2603_v8, %v2555_v23  ;;  %v6410_v8 = vor.u32 %v6922_v22, %v6409_v57  ;;  %v9422_v57 = vld [vmem:[#allocation43_spill] sm:$0xff]  ;;  %v9423_v22 = vld [vmem:[#allocation44_spill] sm:$0xff] }
 0x336   : > { %v2953_v63 = vmax.f32 %v2604_v55, 0.0  ;;  %3714 = vmatpush.bf16.msra.mxu1 %v6410_v8  ;;  %v6895_v55 = vld [vmem:[#allocation8 + $0x8] sm:$0xf0]  ;;  %v6579_v8 = vld [vmem:[#allocation8 + $0x234] sm:$0xf0] }
 0x338   : > { %v8312_v31 = vpop.f32.mrf.mxu2  ;;  %v8314_v24 = vpack.c.bf16 %v2953_v63, %v2949_v20 }
 0x339   : > { %v8316_v41 = vpop.f32.mrf.mxu3  ;;  %v2557_v16 = vpop.f32.mrf.mxu0 }
 0x33a   : > { %v2558_v53 = vadd.f32 %v2557_v16, %v8220_v60  ;;  %v2606_v36 = vpop.f32.mrf.mxu1 }
 0x33c   : > { %v2607_v58 = vadd.f32 %v2606_v36, %v2558_v53  ;;  %2752 = vmatmul.bf16.gmra.mxu0 %v7783_v10  ;;  %2801 = vmatmul.bf16.gmra.mxu1 %v7785_v11  ;;  %v6313_v10 = vld [vmem:[#allocation8 + $0x18] sm:$0xf]  ;;  %v6898_v11 = vld [vmem:[#allocation8 + $0x20] sm:$0xf0]  ;;  %v6398_v36 = vor.u32 %v6919_v19, %v6397_v14 }
 0x33d   : > { %2850 = vmatmul.bf16.gmra.mxu2 %v9414_v35  ;;  %v6314_v27 = vor.u32 %v6898_v11, %v6313_v10  ;;  %v6387_v19 = vld [vmem:[#allocation8 + $0xb4] sm:$0xf0] }
 0x33e   : > { %2899 = vmatmul.bf16.gmra.mxu3 %v9415_v12  ;;  %v6970_v12 = vld [vmem:[#allocation8 + $0x260] sm:$0xf0]  ;;  %v2957_v42 = vmax.f32 %v2607_v58, 0.0  ;;  %v6494_v58 = vor.u32 %v6943_v49, %v6493_v50  ;;  %3715 = vmatpush.bf16.msra.mxu1 %v6398_v36  ;;  %v6987_v50 = vld [vmem:[#allocation8 + $0x2ec] sm:$0xf] }
 0x33f   : > { %v6602_v23 = vor.u32 %v6970_v12, %v6601_v26  ;;  %3665 = vmatpush.bf16.msra.mxu0 %v6314_v27  ;;  %v6675_v36 = vld [vmem:[#allocation8 + $0x2f4] sm:$0xf0] }
 0x340   : > { %v2655_v7 = vpop.f32.mrf.mxu2  ;;  %3764 = vmatpush.bf16.msra.mxu2 %v6494_v58  ;;  %v6939_v58 = vld [vmem:[#allocation8 + $0x16c] sm:$0xf] }
 0x341   : > { %v2656_v62 = vadd.f32 %v2655_v7, %v8249_v59  ;;  %v2704_v6 = vpop.f32.mrf.mxu3  ;;  %v2559_v56 = vpop.f32.mrf.mxu0  ;;  %3812 = vmatpush.bf16.msra.mxu3 %v6602_v23  ;;  %v6963_v23 = vld [vmem:[#allocation8 + $0x22c] sm:$0xf] }
 0x342   : > { %v2560_v60 = vadd.f32 %v2559_v56, %v8223_v3  ;;  %v2608_v18 = vpop.f32.mrf.mxu1  ;;  %v6301_v3 = vld [vmem:[#allocation8] sm:$0xf] }
 0x343   : > { %v8325_v0 = vadd.f32 %v2704_v6, %v2656_v62  ;;  %v6302_v63 = vor.u32 %v6895_v55, %v6301_v3 }
 0x344   : > { %v2609_v35 = vadd.f32 %v2608_v18, %v2560_v60  ;;  %v6967_v18 = vld [vmem:[#allocation8 + $0x248] sm:$0xf0] }
 0x345   : > { %3666 = vmatpush.bf16.msra.mxu0 %v6302_v63 }
 0x346   : > { %v2961_v43 = vmax.f32 %v2609_v35, 0.0 }
 0x348   : > { %v8327_v51 = vpop.f32.mrf.mxu2  ;;  %v8329_v25 = vpack.c.bf16 %v2961_v43, %v2957_v42  ;;  %v6582_v43 = vor.u32 %v6963_v23, %v6579_v8  ;;  %v6912_v8 = vld [vmem:[#allocation8 + $0x94] sm:$0xf] }
 0x349   : > { %v8331_v15 = vpop.f32.mrf.mxu3  ;;  %v2562_v20 = vpop.f32.mrf.mxu0 }
 0x34a   : > { %v2563_v16 = vadd.f32 %v2562_v20, %v8230_v9  ;;  %v2611_v53 = vpop.f32.mrf.mxu1  ;;  %3953 = vmatpush.bf16.msrb.mxu2 %v6582_v43 }
 0x34c   : > { %v2612_v39 = vadd.f32 %v2611_v53, %v2563_v16  ;;  %2757 = vmatmul.bf16.gmra.mxu0 %v7803_v46  ;;  %2806 = vmatmul.bf16.gmra.mxu1 %v7805_v47  ;;  %v6589_v46 = vld [vmem:[#allocation8 + $0x240] sm:$0xf] }
 0x34d   : > { %2855 = vmatmul.bf16.gmra.mxu2 %v9416_v4  ;;  %v6590_v11 = vor.u32 %v6967_v18, %v6589_v46  ;;  %v9425_v46 = vld [vmem:[#allocation38_spill] sm:$0xff]  ;;  %v6960_v18 = vld [vmem:[#allocation8 + $0x214] sm:$0xf] }
 0x34e   : > { %2904 = vmatmul.bf16.gmra.mxu3 %v9417_v32  ;;  %v2965_v10 = vmax.f32 %v2612_v39, 0.0  ;;  %v6678_v39 = vor.u32 %v6987_v50, %v6675_v36  ;;  %v9426_v36 = vld [vmem:[#allocation46_spill] sm:$0xff] }
 0x34f   : > { %3813 = vmatpush.bf16.msra.mxu3 %v6590_v11 }
 0x350   : > { %v2660_v45 = vpop.f32.mrf.mxu2 }
 0x351   : > { %v2661_v13 = vadd.f32 %v2660_v45, %v8249_v59  ;;  %v2709_v7 = vpop.f32.mrf.mxu3  ;;  %v2564_v9 = vpop.f32.mrf.mxu0  ;;  %v6483_v45 = vld [vmem:[#allocation8 + $0x174] sm:$0xf0] }
 0x352   : > { %v2565_v62 = vadd.f32 %v2564_v9, %v8233_v29  ;;  %v2613_v6 = vpop.f32.mrf.mxu1 }
 0x353   : > { %v8340_v56 = vadd.f32 %v2709_v7, %v2661_v13  ;;  %v6486_v7 = vor.u32 %v6939_v58, %v6483_v45  ;;  %4002 = vmatpush.bf16.msrb.mxu3 %v6678_v39  ;;  %v9427_v45 = vld [vmem:[#allocation19_spill] sm:$0xff] }
 0x354   : > { %v2614_v60 = vadd.f32 %v2613_v6, %v2565_v62 }
 0x355   : > { %3904 = vmatpush.bf16.msrb.mxu1 %v6486_v7  ;;  %v6957_v7 = vld [vmem:[#allocation8 + $0x1fc] sm:$0xf] }
 0x356   : > { %v2969_v47 = vmax.f32 %v2614_v60, 0.0  ;;  %v9424_v60 = vld [vmem:[#allocation45_spill] sm:$0xff] }
 0x358   : > { %v8342_v4 = vpop.f32.mrf.mxu2  ;;  %v8344_v32 = vpack.c.bf16 %v2969_v47, %v2965_v10  ;;  %v6567_v10 = vld [vmem:[#allocation8 + $0x21c] sm:$0xf0] }
 0x359   : > { %v8346_v26 = vpop.f32.mrf.mxu3  ;;  %v2567_v35 = vpop.f32.mrf.mxu0  ;;  %v6570_v47 = vor.u32 %v6960_v18, %v6567_v10 }
 0x35a   : > { %v2568_v27 = vadd.f32 %v2567_v35, %v8240_v2  ;;  %v2616_v29 = vpop.f32.mrf.mxu1 }
 0x35b   : > { %3954 = vmatpush.bf16.msrb.mxu2 %v6570_v47 }
 0x35c   : > { %v2617_v12 = vadd.f32 %v2616_v29, %v2568_v27  ;;  %2762 = vmatmul.bf16.gmra.mxu0 %v9385_v48  ;;  %2811 = vmatmul.bf16.gmra.mxu1 %v9386_v37  ;;  %v6915_v37 = vld [vmem:[#allocation8 + $0xac] sm:$0xf] }
 0x35d   : > { %2860 = vmatmul.bf16.gmra.mxu2 %v9422_v57  ;;  %v6390_v53 = vor.u32 %v6915_v37, %v6387_v19 }
 0x35e   : > { %2909 = vmatmul.bf16.gmra.mxu3 %v9423_v22  ;;  %v2973_v49 = vmax.f32 %v2617_v12, 0.0 }
 0x35f   : > { %3855 = vmatpush.bf16.msrb.mxu0 %v6390_v53 }
 0x360   : > { %v2665_v42 = vpop.f32.mrf.mxu2 }
 0x361   : > { %v2666_v3 = vadd.f32 %v2665_v42, %v8249_v59  ;;  %v2714_v55 = vpop.f32.mrf.mxu3  ;;  %v2569_v14 = vpop.f32.mrf.mxu0  ;;  %v6375_v42 = vld [vmem:[#allocation8 + $0x9c] sm:$0xf0] }
 0x362   : > { %v2570_v2 = vadd.f32 %v2569_v14, %v8243_v34  ;;  %v2618_v20 = vpop.f32.mrf.mxu1  ;;  %v6378_v43 = vor.u32 %v6912_v8, %v6375_v42  ;;  %v6936_v14 = vld [vmem:[#allocation8 + $0x154] sm:$0xf]  ;;  %v6981_v42 = vld [vmem:[#allocation8 + $0x2bc] sm:$0xf] }
 0x363   : > { %v8355_v63 = vadd.f32 %v2714_v55, %v2666_v3  ;;  %v6984_v3 = vld [vmem:[#allocation8 + $0x2d4] sm:$0xf]  ;;  %v6663_v55 = vld [vmem:[#allocation8 + $0x2dc] sm:$0xf0] }
 0x364   : > { %v2619_v48 = vadd.f32 %v2618_v20, %v2570_v2  ;;  %v6666_v20 = vor.u32 %v6984_v3, %v6663_v55  ;;  %3856 = vmatpush.bf16.msrb.mxu0 %v6378_v43  ;;  %v6651_v43 = vld [vmem:[#allocation8 + $0x2c4] sm:$0xf0]  ;;  %v6933_v3 = vld [vmem:[#allocation8 + $0x13c] sm:$0xf] }
 0x366   : > { %v2977_v16 = vmax.f32 %v2619_v48, 0.0  ;;  %v6471_v48 = vld [vmem:[#allocation8 + $0x15c] sm:$0xf0]  ;;  %4003 = vmatpush.bf16.msrb.mxu3 %v6666_v20 }
 0x368   : > { %v8357_v13 = vpop.f32.mrf.mxu2  ;;  %v8359_v34 = vpack.c.bf16 %v2977_v16, %v2973_v49 }
 0x369   : > { %v8361_v9 = vpop.f32.mrf.mxu3  ;;  %v2728_v62 = vpop.f32.mrf.mxu0 }
 0x36a   : > { %v2777_v6 = vpop.f32.mrf.mxu1  ;;  %v2729_v11 = vadd.f32 %v2728_v62, %v8254_v30  ;;  %v6474_v30 = vor.u32 %v6936_v14, %v6471_v48  ;;  %v6555_v62 = vld [vmem:[#allocation8 + $0x204] sm:$0xf0]  ;;  %v6654_v14 = vor.u32 %v6981_v42, %v6651_v43  ;;  %v6639_v42 = vld [vmem:[#allocation8 + $0x2ac] sm:$0xf0]  ;;  %v6930_v43 = vld [vmem:[#allocation8 + $0x124] sm:$0xf] }
 0x36c   : > { %3667 = vmatmul.bf16.vlgmr.msra.gmra.mxu0 %v9424_v60  ;;  %3716 = vmatmul.bf16.vlgmr.msra.gmra.mxu1 %v9425_v46  ;;  %v2778_v57 = vadd.f32 %v2777_v6, %v2729_v11  ;;  %v6558_v6 = vor.u32 %v6957_v7, %v6555_v62 }
 0x36d   : > { %3765 = vmatmul.bf16.vlgmr.msra.gmra.mxu2 %v8256_v17  ;;  %3905 = vmatpush.bf16.msrb.mxu1 %v6474_v30 }
 0x36e   : > { %3955 = vmatpush.bf16.msrb.mxu2 %v6558_v6  ;;  %4004 = vmatpush.bf16.msrb.mxu3 %v6654_v14 }
 0x370   : > { %v2826_v35 = vpop.f32.mrf.mxu2 }
 0x371   : > { %v2875_v27 = vpop.f32.mrf.mxu3  ;;  %v2730_v29 = vpop.f32.mrf.mxu0  ;;  %v2827_v23 = vadd.f32 %v2826_v35, %v2778_v57 }
 0x372   : > { %v2779_v12 = vpop.f32.mrf.mxu1  ;;  %v2731_v22 = vadd.f32 %v2730_v29, %v8260_v61 }
 0x373   : > { %v2876_v19 = vadd.f32 %v2875_v27, %v2827_v23  ;;  %v6363_v23 = vld [vmem:[#allocation8 + $0x84] sm:$0xf0] }
 0x374   : > { %v2780_v2 = vadd.f32 %v2779_v12, %v2731_v22  ;;  %v6909_v22 = vld [vmem:[#allocation8 + $0x7c] sm:$0xf] }
 0x375   : > { %v2918_v58 = vmax.f32 %v2876_v19, 0.0  ;;  %v6366_v8 = vor.u32 %v6909_v22, %v6363_v23  ;;  %v6351_v22 = vld [vmem:[#allocation8 + $0x6c] sm:$0xf0] }
 0x377   : > { %3857 = vmatpush.bf16.msrb.mxu0 %v6366_v8  ;;  %v6978_v8 = vld [vmem:[#allocation8 + $0x2a4] sm:$0xf] }
 0x378   : > { %v2828_v37 = vpop.f32.mrf.mxu2 }
 0x379   : > { %v2829_v50 = vadd.f32 %v2828_v37, %v2780_v2  ;;  %v2877_v49 = vpop.f32.mrf.mxu3  ;;  %v2733_v16 = vpop.f32.mrf.mxu0 }
 0x37a   : > { %v2782_v53 = vpop.f32.mrf.mxu1  ;;  %v2734_v10 = vadd.f32 %v2733_v16, %v8268_v40  ;;  %v6459_v40 = vld [vmem:[#allocation8 + $0x144] sm:$0xf0] }
 0x37b   : > { %v2878_v61 = vadd.f32 %v2877_v49, %v2829_v50  ;;  %v6462_v20 = vor.u32 %v6933_v3, %v6459_v40  ;;  %v9428_v49 = vld [vmem:[#allocation47_spill] sm:$0xff]  ;;  %v6642_v3 = vor.u32 %v6978_v8, %v6639_v42  ;;  %v6627_v42 = vld [vmem:[#allocation8 + $0x294] sm:$0xf0] }
 0x37c   : > { %3672 = vmatmul.bf16.gmra.mxu0 %v9426_v36  ;;  %3721 = vmatmul.bf16.gmra.mxu1 %v9427_v45  ;;  %v2783_v29 = vadd.f32 %v2782_v53, %v2734_v10  ;;  %v6975_v8 = vld [vmem:[#allocation8 + $0x28c] sm:$0xf] }
 0x37d   : > { %v2922_v39 = vmax.f32 %v2878_v61, 0.0  ;;  %3770 = vmatmul.bf16.gmra.mxu2 %v8270_v21  ;;  %3906 = vmatpush.bf16.msrb.mxu1 %v6462_v20  ;;  %v9429_v61 = vld [vmem:[#allocation20_spill] sm:$0xff] }
 0x37e   : > { %4005 = vmatpush.bf16.msrb.mxu3 %v6642_v3  ;;  %v6435_v3 = vld [vmem:[#allocation8 + $0x114] sm:$0xf0] }
 0x37f   : > { %v8371_v18 = vpack.c.bf16 %v2922_v39, %v2918_v58  ;;  %v6954_v58 = vld [vmem:[#allocation8 + $0x1e4] sm:$0xf]  ;;  %v6543_v39 = vld [vmem:[#allocation8 + $0x1ec] sm:$0xf0] }
 0x380   : > { %v2831_v47 = vpop.f32.mrf.mxu2  ;;  %v6546_v7 = vor.u32 %v6954_v58, %v6543_v39  ;;  %v6531_v58 = vld [vmem:[#allocation8 + $0x1d4] sm:$0xf0] }
 0x381   : > { %v2880_v11 = vpop.f32.mrf.mxu3  ;;  %3814 = vmatmul.bf16.vlgmr.msra.gmra.mxu3 %v8371_v18  ;;  %v2735_v35 = vpop.f32.mrf.mxu0  ;;  %v2832_v57 = vadd.f32 %v2831_v47, %v2783_v29 }
 0x382   : > { %v2784_v27 = vpop.f32.mrf.mxu1  ;;  %v2736_v12 = vadd.f32 %v2735_v35, %v8274_v38  ;;  %3956 = vmatpush.bf16.msrb.mxu2 %v6546_v7 }
 0x383   : > { %v2881_v48 = vadd.f32 %v2880_v11, %v2832_v57  ;;  %v6906_v57 = vld [vmem:[#allocation8 + $0x64] sm:$0xf] }
 0x384   : > { %v2785_v55 = vadd.f32 %v2784_v27, %v2736_v12  ;;  %v6354_v23 = vor.u32 %v6906_v57, %v6351_v22  ;;  %v6903_v57 = vld [vmem:[#allocation8 + $0x4c] sm:$0xf]  ;;  %v6339_v22 = vld [vmem:[#allocation8 + $0x54] sm:$0xf0] }
 0x385   : > { %v2926_v16 = vmax.f32 %v2881_v48, 0.0 }
 0x386   : > { %3858 = vmatpush.bf16.msrb.mxu0 %v6354_v23  ;;  %v6342_v23 = vor.u32 %v6903_v57, %v6339_v22 }
 0x388   : > { %v2833_v2 = vpop.f32.mrf.mxu2 }
 0x389   : > { %v2834_v37 = vadd.f32 %v2833_v2, %v2785_v55  ;;  %v2882_v30 = vpop.f32.mrf.mxu3  ;;  %v2738_v19 = vpop.f32.mrf.mxu0  ;;  %v6447_v55 = vld [vmem:[#allocation8 + $0x12c] sm:$0xf0] }
 0x38a   : > { %v2787_v50 = vpop.f32.mrf.mxu1  ;;  %v2739_v62 = vadd.f32 %v2738_v19, %v8282_v28  ;;  %v6450_v40 = vor.u32 %v6930_v43, %v6447_v55  ;;  %v9430_v19 = vld [vmem:[#allocation48_spill] sm:$0xff]  ;;  %3859 = vmatpush.bf16.msrb.mxu0 %v6342_v23 }
 0x38b   : > { %v2883_v38 = vadd.f32 %v2882_v30, %v2834_v37  ;;  %v6927_v43 = vld [vmem:[#allocation8 + $0x10c] sm:$0xf]  ;;  %v6900_v23 = vld [vmem:[#allocation8 + $0x34] sm:$0xf] }
 0x38c   : > { %3677 = vmatmul.bf16.gmra.mxu0 %v9428_v49  ;;  %3726 = vmatmul.bf16.gmra.mxu1 %v9429_v61  ;;  %v2788_v27 = vadd.f32 %v2787_v50, %v2739_v62 }
 0x38d   : > { %v2930_v53 = vmax.f32 %v2883_v38, 0.0  ;;  %3775 = vmatmul.bf16.gmra.mxu2 %v8284_v54  ;;  %3907 = vmatpush.bf16.msrb.mxu1 %v6450_v40 }
 0x38f   : > { %v8380_v6 = vpack.c.bf16 %v2930_v53, %v2926_v16  ;;  %v9431_v16 = vld [vmem:[#allocation22_spill] sm:$0xff]  ;;  %v6951_v53 = vld [vmem:[#allocation8 + $0x1cc] sm:$0xf] }
 0x390   : > { %v2836_v10 = vpop.f32.mrf.mxu2  ;;  %v6534_v39 = vor.u32 %v6951_v53, %v6531_v58  ;;  %v9433_v53 = vld [vmem:[#allocation23_spill] sm:$0xff]  ;;  %v6948_v58 = vld [vmem:[#allocation8 + $0x1b4] sm:$0xf] }
 0x391   : > { %v2885_v47 = vpop.f32.mrf.mxu3  ;;  %3819 = vmatmul.bf16.gmra.mxu3 %v8380_v6  ;;  %v2740_v11 = vpop.f32.mrf.mxu0  ;;  %v2837_v12 = vadd.f32 %v2836_v10, %v2788_v27 }
 0x392   : > { %v2789_v35 = vpop.f32.mrf.mxu1  ;;  %v2741_v29 = vadd.f32 %v2740_v11, %v8288_v44  ;;  %3957 = vmatpush.bf16.msrb.mxu2 %v6534_v39  ;;  %v6519_v39 = vld [vmem:[#allocation8 + $0x1bc] sm:$0xf0] }
 0x393   : > { %v2886_v2 = vadd.f32 %v2885_v47, %v2837_v12 }
 0x394   : > { %v2790_v28 = vadd.f32 %v2789_v35, %v2741_v29 }
 0x395   : > { %v2934_v50 = vmax.f32 %v2886_v2, 0.0 }
 0x398   : > { %v2838_v14 = vpop.f32.mrf.mxu2 }
 0x399   : > { %v2839_v20 = vadd.f32 %v2838_v14, %v2790_v28  ;;  %v2887_v48 = vpop.f32.mrf.mxu3  ;;  %v2743_v37 = vpop.f32.mrf.mxu0  ;;  %v6630_v28 = vor.u32 %v6975_v8, %v6627_v42  ;;  %v6438_v14 = vor.u32 %v6927_v43, %v6435_v3  ;;  %v6327_v8 = vld [vmem:[#allocation8 + $0x3c] sm:$0xf0]  ;;  %v6972_v43 = vld [vmem:[#allocation8 + $0x274] sm:$0xf] }
 0x39a   : > { %v2792_v30 = vpop.f32.mrf.mxu1  ;;  %v2744_v7 = vadd.f32 %v2743_v37, %v8296_v5  ;;  %v6330_v42 = vor.u32 %v6900_v23, %v6327_v8  ;;  %v6897_v8 = vld [vmem:[#allocation8 + $0x1c] sm:$0xf] }
 0x39b   : > { %v2888_v44 = vadd.f32 %v2887_v48, %v2839_v20  ;;  %4006 = vmatpush.bf16.msrb.mxu3 %v6630_v28  ;;  %3908 = vmatpush.bf16.msrb.mxu1 %v6438_v14 }
 0x39c   : > { %3682 = vmatmul.bf16.gmra.mxu0 %v9430_v19  ;;  %3731 = vmatmul.bf16.gmra.mxu1 %v9431_v16  ;;  %v2793_v27 = vadd.f32 %v2792_v30, %v2744_v7  ;;  %v9432_v30 = vld [vmem:[#allocation49_spill] sm:$0xff]  ;;  %v6522_v7 = vor.u32 %v6948_v58, %v6519_v39  ;;  %v9435_v39 = vld [vmem:[#allocation24_spill] sm:$0xff] }
 0x39d   : > { %v2938_v38 = vmax.f32 %v2888_v44, 0.0  ;;  %3780 = vmatmul.bf16.gmra.mxu2 %v8298_v33  ;;  %v2653_v44 = vadd.f32 %v8312_v31, %v8249_v59  ;;  %3860 = vmatpush.bf16.msrb.mxu0 %v6330_v42  ;;  %v6315_v42 = vld [vmem:[#allocation8 + $0x24] sm:$0xf0] }
 0x39e   : > { %3958 = vmatpush.bf16.msrb.mxu2 %v6522_v7  ;;  %v6945_v7 = vld [vmem:[#allocation8 + $0x19c] sm:$0xf] }
 0x39f   : > { %v8388_v62 = vpack.c.bf16 %v2938_v38, %v2934_v50 }
 0x3a0   : > { %v2841_v10 = vpop.f32.mrf.mxu2 }
 0x3a1   : > { %v2890_v47 = vpop.f32.mrf.mxu3  ;;  %3824 = vmatmul.bf16.gmra.mxu3 %v8388_v62  ;;  %v2745_v11 = vpop.f32.mrf.mxu0  ;;  %v2842_v12 = vadd.f32 %v2841_v10, %v2793_v27 }
 0x3a2   : > { %v2794_v35 = vpop.f32.mrf.mxu1  ;;  %v2746_v29 = vadd.f32 %v2745_v11, %v8302_v52 }
 0x3a3   : > { %v2891_v40 = vadd.f32 %v2890_v47, %v2842_v12 }
 0x3a4   : > { %v2795_v5 = vadd.f32 %v2794_v35, %v2746_v29  ;;  %v2702_v35 = vadd.f32 %v8316_v41, %v2653_v44  ;;  %v9434_v44 = vld [vmem:[#allocation50_spill] sm:$0xff] }
 0x3a5   : > { %v2942_v50 = vmax.f32 %v2891_v40, 0.0 }
 0x3a8   : > { %v2843_v55 = vpop.f32.mrf.mxu2 }
 0x3a9   : > { %v2844_v2 = vadd.f32 %v2843_v55, %v2795_v5  ;;  %v2892_v20 = vpop.f32.mrf.mxu3  ;;  %v2748_v48 = vpop.f32.mrf.mxu0  ;;  %v6615_v5 = vld [vmem:[#allocation8 + $0x27c] sm:$0xf0] }
 0x3aa   : > { %v2797_v37 = vpop.f32.mrf.mxu1  ;;  %v2749_v10 = vadd.f32 %v2748_v48, %v8310_v1  ;;  %v6924_v1 = vld [vmem:[#allocation8 + $0xf4] sm:$0xf]  ;;  %v6618_v3 = vor.u32 %v6972_v43, %v6615_v5  ;;  %v6423_v55 = vld [vmem:[#allocation8 + $0xfc] sm:$0xf0]  ;;  %v6921_v43 = vld [vmem:[#allocation8 + $0xdc] sm:$0xf] }
 0x3ab   : > { %v2893_v52 = vadd.f32 %v2892_v20, %v2844_v2  ;;  %v6426_v41 = vor.u32 %v6924_v1, %v6423_v55  ;;  %v6318_v1 = vor.u32 %v6897_v8, %v6315_v42  ;;  %v6411_v55 = vld [vmem:[#allocation8 + $0xe4] sm:$0xf0] }
 0x3ac   : > { %3687 = vmatmul.bf16.gmra.mxu0 %v9432_v30  ;;  %3736 = vmatmul.bf16.gmra.mxu1 %v9433_v53  ;;  %v2798_v12 = vadd.f32 %v2797_v37, %v2749_v10  ;;  %v6507_v10 = vld [vmem:[#allocation8 + $0x1a4] sm:$0xf0] }
 0x3ad   : > { %v2946_v38 = vmax.f32 %v2893_v52, 0.0  ;;  %3785 = vmatmul.bf16.gmra.mxu2 %v8314_v24  ;;  %4007 = vmatpush.bf16.msrb.mxu3 %v6618_v3 }
 0x3ae   : > { %3909 = vmatpush.bf16.msrb.mxu1 %v6426_v41  ;;  %3861 = vmatpush.bf16.msrb.mxu0 %v6318_v1  ;;  %v6414_v41 = vor.u32 %v6921_v43, %v6411_v55 }
 0x3af   : > { %v8398_v47 = vpack.c.bf16 %v2946_v38, %v2942_v50  ;;  %v2658_v50 = vadd.f32 %v8327_v51, %v8249_v59 }
 0x3b0   : > { %v2846_v11 = vpop.f32.mrf.mxu2 }
 0x3b1   : > { %v2895_v27 = vpop.f32.mrf.mxu3  ;;  %3829 = vmatmul.bf16.gmra.mxu3 %v8398_v47  ;;  %v2750_v31 = vpop.f32.mrf.mxu0  ;;  %v2847_v22 = vadd.f32 %v2846_v11, %v2798_v12  ;;  %v6510_v11 = vor.u32 %v6945_v7, %v6507_v10  ;;  %v6942_v7 = vld [vmem:[#allocation8 + $0x184] sm:$0xf] }
 0x3b2   : > { %v2799_v29 = vpop.f32.mrf.mxu1  ;;  %v2751_v57 = vadd.f32 %v2750_v31, %v2702_v35  ;;  %3910 = vmatpush.bf16.msrb.mxu1 %v6414_v41 }
 0x3b3   : > { %v2896_v40 = vadd.f32 %v2895_v27, %v2847_v22  ;;  %3959 = vmatpush.bf16.msrb.mxu2 %v6510_v11 }
 0x3b4   : > { %v2800_v28 = vadd.f32 %v2799_v29, %v2751_v57  ;;  %v2707_v29 = vadd.f32 %v8331_v15, %v2658_v50 }
 0x3b5   : > { %v2950_v38 = vmax.f32 %v2896_v40, 0.0  ;;  %v6894_v40 = vld [vmem:[#allocation8 + $0x4] sm:$0xf] }
 0x3b8   : > { %v2848_v14 = vpop.f32.mrf.mxu2 }
 0x3b9   : > { %v2849_v2 = vadd.f32 %v2848_v14, %v2800_v28  ;;  %v2897_v20 = vpop.f32.mrf.mxu3  ;;  %v2753_v48 = vpop.f32.mrf.mxu0  ;;  %v6969_v28 = vld [vmem:[#allocation8 + $0x25c] sm:$0xf] }
 0x3ba   : > { %v2802_v37 = vpop.f32.mrf.mxu1  ;;  %v2754_v35 = vadd.f32 %v2753_v48, %v8325_v0  ;;  %v6603_v0 = vld [vmem:[#allocation8 + $0x264] sm:$0xf0] }
 0x3bb   : > { %v2898_v52 = vadd.f32 %v2897_v20, %v2849_v2  ;;  %v6606_v3 = vor.u32 %v6969_v28, %v6603_v0  ;;  %v6303_v2 = vld [vmem:[#allocation8 + $0xc] sm:$0xf0]  ;;  %v6918_v20 = vld [vmem:[#allocation8 + $0xc4] sm:$0xf] }
 0x3bc   : > { %3692 = vmatmul.bf16.gmra.mxu0 %v9434_v44  ;;  %3741 = vmatmul.bf16.gmra.mxu1 %v9435_v39  ;;  %v2803_v22 = vadd.f32 %v2802_v37, %v2754_v35  ;;  %v6495_v35 = vld [vmem:[#allocation8 + $0x18c] sm:$0xf0] }
 0x3bd   : > { %v2954_v58 = vmax.f32 %v2898_v52, 0.0  ;;  %3790 = vmatmul.bf16.gmra.mxu2 %v8329_v25  ;;  %4008 = vmatpush.bf16.msrb.mxu3 %v6606_v3  ;;  %v6591_v0 = vld [vmem:[#allocation8 + $0x24c] sm:$0xf0] }
 0x3bf   : > { %v8408_v27 = vpack.c.bf16 %v2954_v58, %v2950_v38  ;;  %v6306_v38 = vor.u32 %v6894_v40, %v6303_v2  ;;  %v6399_v58 = vld [vmem:[#allocation8 + $0xcc] sm:$0xf0] }
 0x3c0   : > { %v2851_v31 = vpop.f32.mrf.mxu2  ;;  %v6402_v11 = vor.u32 %v6918_v20, %v6399_v58 }
 0x3c1   : > { %9436 = vst [vmem:[#allocation28_spill] sm:$0xff] %v8408_v27  ;;  %v2900_v12 = vpop.f32.mrf.mxu3  ;;  %3834 = vmatmul.bf16.gmra.mxu3 %v8408_v27  ;;  %v2755_v51 = vpop.f32.mrf.mxu0  ;;  %v2852_v5 = vadd.f32 %v2851_v31, %v2803_v22  ;;  %3862 = vmatpush.bf16.msrb.mxu0 %v6306_v38  ;;  %v2668_v38 = vadd.f32 %v8357_v13, %v8249_v59  ;;  %v8432_v13 = vld [vmem:[#allocation10] sm:$0x7] }
 0x3c2   : > { %v2804_v57 = vpop.f32.mrf.mxu1  ;;  %v2756_v23 = vadd.f32 %v2755_v51, %v2707_v29  ;;  %v6498_v29 = vor.u32 %v6942_v7, %v6495_v35  ;;  %v9437_v51 = vld [vmem:[#allocation51_spill] sm:$0xff]  ;;  %3911 = vmatpush.bf16.msrb.mxu1 %v6402_v11 }
 0x3c3   : > { %v2901_v48 = vadd.f32 %v2900_v12, %v2852_v5  ;;  %v9440_v11 = vld [vmem:[#allocation27_spill] sm:$0xff] }
 0x3c4   : > { %v2805_v14 = vadd.f32 %v2804_v57, %v2756_v23  ;;  %v2663_v57 = vadd.f32 %v8342_v4, %v8249_v59  ;;  %v9438_v23 = vld [vmem:[#allocation25_spill] sm:$0xff]  ;;  %3960 = vmatpush.bf16.msrb.mxu2 %v6498_v29  ;;  %v6966_v4 = vld [vmem:[#allocation8 + $0x244] sm:$0xf]  ;;  %v2717_v29 = vadd.f32 %v8361_v9, %v2668_v38 }
 0x3c5   : > { %v2958_v22 = vmax.f32 %v2901_v48, 0.0  ;;  %v6594_v55 = vor.u32 %v6966_v4, %v6591_v0 }
 0x3c6   : > { %v2712_v5 = vadd.f32 %v8346_v26, %v2663_v57 }
 0x3c7   : > { %4009 = vmatpush.bf16.msrb.mxu3 %v6594_v55 }
 0x3c8   : > { %v2853_v15 = vpop.f32.mrf.mxu2 }
 0x3c9   : > { %v2854_v37 = vadd.f32 %v2853_v15, %v2805_v14  ;;  %v2902_v52 = vpop.f32.mrf.mxu3  ;;  %v2758_v50 = vpop.f32.mrf.mxu0 }
 0x3ca   : > { %v2807_v10 = vpop.f32.mrf.mxu1  ;;  %v2759_v8 = vadd.f32 %v2758_v50, %v8340_v56  ;;  %v9439_v50 = vld [vmem:[#allocation37_spill] sm:$0xff] }
 0x3cb   : > { %v2903_v31 = vadd.f32 %v2902_v52, %v2854_v37 }
 0x3cc   : > { %3697 = vmatmul.bf16.gmra.mxu0 %v9437_v51  ;;  %3746 = vmatmul.bf16.gmra.mxu1 %v9438_v23  ;;  %v2808_v14 = vadd.f32 %v2807_v10, %v2759_v8 }
 0x3cd   : > { %v2962_v12 = vmax.f32 %v2903_v31, 0.0  ;;  %3795 = vmatmul.bf16.gmra.mxu2 %v8344_v32 }
 0x3cf   : > { %v8418_v42 = vpack.c.bf16 %v2962_v12, %v2958_v22 }
 0x3d0   : > { %v2856_v43 = vpop.f32.mrf.mxu2 }
 0x3d1   : > { %v2905_v1 = vpop.f32.mrf.mxu3  ;;  %3839 = vmatmul.bf16.gmra.mxu3 %v8418_v42  ;;  %v2760_v28 = vpop.f32.mrf.mxu0  ;;  %v2857_v15 = vadd.f32 %v2856_v43, %v2808_v14 }
 0x3d2   : > { %v2809_v3 = vpop.f32.mrf.mxu1  ;;  %v2761_v41 = vadd.f32 %v2760_v28, %v2712_v5  ;;  %v8435_v5 = vperm.slane %v8432_v13, 0 }
 0x3d3   : > { %v2906_v56 = vadd.f32 %v2905_v1, %v2857_v15 }
 0x3d4   : > { %v2810_v40 = vadd.f32 %v2809_v3, %v2761_v41 }
 0x3d5   : > { %v2966_v58 = vmax.f32 %v2906_v56, 0.0 }
 0x3d8   : > { %v2858_v2 = vpop.f32.mrf.mxu2 }
 0x3d9   : > { %v2859_v20 = vadd.f32 %v2858_v2, %v2810_v40  ;;  %v2907_v48 = vpop.f32.mrf.mxu3  ;;  %v2763_v37 = vpop.f32.mrf.mxu0 }
 0x3da   : > { %v2812_v52 = vpop.f32.mrf.mxu1  ;;  %v2764_v10 = vadd.f32 %v2763_v37, %v8355_v63 }
 0x3db   : > { %v2908_v26 = vadd.f32 %v2907_v48, %v2859_v20 }
 0x3dc   : > { %3702 = vmatmul.bf16.gmra.mxu0 %v9439_v50  ;;  %3751 = vmatmul.bf16.gmra.mxu1 %v9440_v11  ;;  %v2813_v8 = vadd.f32 %v2812_v52, %v2764_v10 }
 0x3dd   : > { %v2970_v7 = vmax.f32 %v2908_v26, 0.0  ;;  %3800 = vmatmul.bf16.gmra.mxu2 %v8359_v34 }
 0x3df   : > { %v8428_v35 = vpack.c.bf16 %v2970_v7, %v2966_v58 }
 0x3e0   : > { %v2861_v31 = vpop.f32.mrf.mxu2 }
 0x3e1   : > { %v2910_v57 = vpop.f32.mrf.mxu3  ;;  %3844 = vmatmul.bf16.gmra.mxu3 %v8428_v35  ;;  %v2765_v22 = vpop.f32.mrf.mxu0  ;;  %v2862_v43 = vadd.f32 %v2861_v31, %v2813_v8 }
 0x3e2   : > { %v2814_v12 = vpop.f32.mrf.mxu1  ;;  %v2766_v59 = vadd.f32 %v2765_v22, %v2717_v29 }
 0x3e3   : > { %v2911_v28 = vadd.f32 %v2910_v57, %v2862_v43 }
 0x3e4   : > { %v2815_v1 = vadd.f32 %v2814_v12, %v2766_v59 }
 0x3e5   : > { %v2974_v15 = vmax.f32 %v2911_v28, 0.0 }
 0x3e8   : > { %v2863_v63 = vpop.f32.mrf.mxu2 }
 0x3e9   : > { %v2864_v4 = vadd.f32 %v2863_v63, %v2815_v1  ;;  %v3668_v0 = vpop.f32.mrf.mxu0  ;;  %v2912_v3 = vpop.f32.mrf.mxu3 }
 0x3ea   : > { %v3669_v9 = vadd.f32 %v3668_v0, %v8435_v5  ;;  %v3717_v55 = vpop.f32.mrf.mxu1 }
 0x3eb   : > { %v2913_v14 = vadd.f32 %v2912_v3, %v2864_v4  ;;  %v6585_v3 = vld [vmem:[#allocation8 + $0x230] sm:$0xf] }
 0x3ec   : > { %v3718_v41 = vadd.f32 %v3717_v55, %v3669_v9  ;;  %3863 = vmatmul.bf16.vlgmr.msrb.gmra.mxu0 %v9424_v60  ;;  %3912 = vmatmul.bf16.vlgmr.msrb.gmra.mxu1 %v9425_v46  ;;  %v6965_v9 = vld [vmem:[#allocation8 + $0x238] sm:$0xf0] }
 0x3ed   : > { %v2978_v40 = vmax.f32 %v2913_v14, 0.0  ;;  %3961 = vmatmul.bf16.vlgmr.msrb.gmra.mxu2 %v8256_v17 }
 0x3ef   : > { %v8441_v2 = vpack.c.bf16 %v2978_v40, %v2974_v15 }
 0x3f0   : > { %v3766_v56 = vpop.f32.mrf.mxu2 }
 0x3f1   : > { %v3767_v20 = vadd.f32 %v3766_v56, %v3718_v41  ;;  %3849 = vmatmul.bf16.gmra.mxu3 %v8441_v2  ;;  %v3670_v48 = vpop.f32.mrf.mxu0  ;;  %v6586_v41 = vor.u32 %v6965_v9, %v6585_v3  ;;  %v6393_v56 = vld [vmem:[#allocation8 + $0xb0] sm:$0xf]  ;;  %v6573_v9 = vld [vmem:[#allocation8 + $0x218] sm:$0xf] }
 0x3f2   : > { %v3671_v37 = vadd.f32 %v3670_v48, %v8435_v5  ;;  %v3719_v52 = vpop.f32.mrf.mxu1  ;;  %v6917_v48 = vld [vmem:[#allocation8 + $0xb8] sm:$0xf0] }
 0x3f3   : > { %4149 = vmatpush.bf16.msra.mxu2 %v6586_v41 }
 0x3f4   : > { %v3720_v26 = vadd.f32 %v3719_v52, %v3671_v37  ;;  %v6681_v37 = vld [vmem:[#allocation8 + $0x2f0] sm:$0xf] }
 0x3f8   : > { %v3768_v38 = vpop.f32.mrf.mxu2 }
 0x3f9   : > { %v3769_v58 = vadd.f32 %v3768_v38, %v3720_v26  ;;  %v3673_v7 = vpop.f32.mrf.mxu0  ;;  %v6989_v26 = vld [vmem:[#allocation8 + $0x2f8] sm:$0xf0] }
 0x3fa   : > { %v3674_v10 = vadd.f32 %v3673_v7, %v8435_v5  ;;  %v3722_v31 = vpop.f32.mrf.mxu1  ;;  %v6682_v38 = vor.u32 %v6989_v26, %v6681_v37  ;;  %v6489_v7 = vld [vmem:[#allocation8 + $0x170] sm:$0xf]  ;;  %v6914_v37 = vld [vmem:[#allocation8 + $0xa0] sm:$0xf0] }
 0x3fc   : > { %v3723_v29 = vadd.f32 %v3722_v31, %v3674_v10  ;;  %3868 = vmatmul.bf16.gmra.mxu0 %v9426_v36  ;;  %3917 = vmatmul.bf16.gmra.mxu1 %v9427_v45  ;;  %v6941_v10 = vld [vmem:[#allocation8 + $0x178] sm:$0xf0] }
 0x3fd   : > { %3966 = vmatmul.bf16.gmra.mxu2 %v8270_v21  ;;  %4198 = vmatpush.bf16.msra.mxu3 %v6682_v38  ;;  %v6986_v38 = vld [vmem:[#allocation8 + $0x2e0] sm:$0xf0] }
 0x400   : > { %v3771_v57 = vpop.f32.mrf.mxu2 }
 0x401   : > { %v3772_v22 = vadd.f32 %v3771_v57, %v3723_v29  ;;  %4010 = vmatmul.bf16.vlgmr.msrb.gmra.mxu3 %v8371_v18  ;;  %v3675_v12 = vpop.f32.mrf.mxu0  ;;  %v6490_v29 = vor.u32 %v6941_v10, %v6489_v7  ;;  %v6477_v10 = vld [vmem:[#allocation8 + $0x158] sm:$0xf] }
 0x402   : > { %v3676_v8 = vadd.f32 %v3675_v12, %v8435_v5  ;;  %v3724_v59 = vpop.f32.mrf.mxu1 }
 0x403   : > { %4100 = vmatpush.bf16.msra.mxu1 %v6490_v29 }
 0x404   : > { %v3725_v43 = vadd.f32 %v3724_v59, %v3676_v8  ;;  %v3815_v1 = vpop.f32.mrf.mxu3 }
 0x405   : > { %v8451_v63 = vadd.f32 %v3815_v1, %v3767_v20  ;;  %v6394_v20 = vor.u32 %v6917_v48, %v6393_v56  ;;  %v6381_v48 = vld [vmem:[#allocation8 + $0x98] sm:$0xf] }
 0x407   : > { %4051 = vmatpush.bf16.msra.mxu0 %v6394_v20  ;;  %v6669_v20 = vld [vmem:[#allocation8 + $0x2d8] sm:$0xf] }
 0x408   : > { %v3773_v28 = vpop.f32.mrf.mxu2  ;;  %v6670_v7 = vor.u32 %v6986_v38, %v6669_v20  ;;  %v6911_v38 = vld [vmem:[#allocation8 + $0x88] sm:$0xf0] }
 0x409   : > { %v3774_v4 = vadd.f32 %v3773_v28, %v3725_v43  ;;  %v3678_v0 = vpop.f32.mrf.mxu0 }
 0x40a   : > { %v3679_v55 = vadd.f32 %v3678_v0, %v8435_v5  ;;  %v3727_v14 = vpop.f32.mrf.mxu1  ;;  %4199 = vmatpush.bf16.msra.mxu3 %v6670_v7  ;;  %v6657_v7 = vld [vmem:[#allocation8 + $0x2c0] sm:$0xf] }
 0x40c   : > { %v3728_v15 = vadd.f32 %v3727_v14, %v3679_v55  ;;  %v3817_v40 = vpop.f32.mrf.mxu3  ;;  %3873 = vmatmul.bf16.gmra.mxu0 %v9428_v49  ;;  %3922 = vmatmul.bf16.gmra.mxu1 %v9429_v61  ;;  %v6962_v55 = vld [vmem:[#allocation8 + $0x220] sm:$0xf0] }
 0x40d   : > { %v8455_v52 = vadd.f32 %v3817_v40, %v3769_v58  ;;  %3971 = vmatmul.bf16.gmra.mxu2 %v8284_v54 }
 0x410   : > { %v3776_v31 = vpop.f32.mrf.mxu2 }
 0x411   : > { %v3777_v57 = vadd.f32 %v3776_v31, %v3728_v15  ;;  %4015 = vmatmul.bf16.gmra.mxu3 %v8380_v6  ;;  %v3680_v12 = vpop.f32.mrf.mxu0  ;;  %v6574_v15 = vor.u32 %v6962_v55, %v6573_v9  ;;  %v6938_v31 = vld [vmem:[#allocation8 + $0x160] sm:$0xf0] }
 0x412   : > { %v3681_v58 = vadd.f32 %v3680_v12, %v8435_v5  ;;  %v3729_v8 = vpop.f32.mrf.mxu1  ;;  %v6478_v12 = vor.u32 %v6938_v31, %v6477_v10  ;;  %v6983_v31 = vld [vmem:[#allocation8 + $0x2c8] sm:$0xf0] }
 0x413   : > { %4150 = vmatpush.bf16.msra.mxu2 %v6574_v15  ;;  %v6959_v15 = vld [vmem:[#allocation8 + $0x208] sm:$0xf0] }
 0x414   : > { %v3730_v59 = vadd.f32 %v3729_v8, %v3681_v58  ;;  %v3820_v43 = vpop.f32.mrf.mxu3  ;;  %4101 = vmatpush.bf16.msra.mxu1 %v6478_v12  ;;  %v6465_v12 = vld [vmem:[#allocation8 + $0x140] sm:$0xf] }
 0x415   : > { %v8461_v1 = vadd.f32 %v3820_v43, %v3772_v22  ;;  %v6382_v22 = vor.u32 %v6914_v37, %v6381_v48 }
 0x417   : > { %4052 = vmatpush.bf16.msra.mxu0 %v6382_v22  ;;  %v6369_v22 = vld [vmem:[#allocation8 + $0x80] sm:$0xf] }
 0x418   : > { %v3778_v28 = vpop.f32.mrf.mxu2 }
 0x419   : > { %v3779_v0 = vadd.f32 %v3778_v28, %v3730_v59  ;;  %v3683_v3 = vpop.f32.mrf.mxu0 }
 0x41a   : > { %v3684_v14 = vadd.f32 %v3683_v3, %v8435_v5  ;;  %v3732_v41 = vpop.f32.mrf.mxu1 }
 0x41c   : > { %v3733_v40 = vadd.f32 %v3732_v41, %v3684_v14  ;;  %v3822_v56 = vpop.f32.mrf.mxu3  ;;  %3878 = vmatmul.bf16.gmra.mxu0 %v9430_v19  ;;  %3927 = vmatmul.bf16.gmra.mxu1 %v9431_v16  ;;  %v6561_v41 = vld [vmem:[#allocation8 + $0x200] sm:$0xf] }
 0x41d   : > { %v8465_v26 = vadd.f32 %v3822_v56, %v3774_v4  ;;  %3976 = vmatmul.bf16.gmra.mxu2 %v8298_v33 }
 0x420   : > { %v3781_v29 = vpop.f32.mrf.mxu2 }
 0x421   : > { %v3782_v58 = vadd.f32 %v3781_v29, %v3733_v40  ;;  %4020 = vmatmul.bf16.gmra.mxu3 %v8388_v62  ;;  %v3685_v8 = vpop.f32.mrf.mxu0  ;;  %v6562_v40 = vor.u32 %v6959_v15, %v6561_v41  ;;  %v6658_v29 = vor.u32 %v6983_v31, %v6657_v7  ;;  %v6908_v7 = vld [vmem:[#allocation8 + $0x70] sm:$0xf0] }
 0x422   : > { %v3686_v4 = vadd.f32 %v3685_v8, %v8435_v5  ;;  %v3734_v59 = vpop.f32.mrf.mxu1  ;;  %v6935_v8 = vld [vmem:[#allocation8 + $0x148] sm:$0xf0]  ;;  %v6932_v31 = vld [vmem:[#allocation8 + $0x130] sm:$0xf0] }
 0x423   : > { %4151 = vmatpush.bf16.msra.mxu2 %v6562_v40  ;;  %4200 = vmatpush.bf16.msra.mxu3 %v6658_v29  ;;  %v6956_v40 = vld [vmem:[#allocation8 + $0x1f0] sm:$0xf0] }
 0x424   : > { %v3735_v43 = vadd.f32 %v3734_v59, %v3686_v4  ;;  %v3825_v28 = vpop.f32.mrf.mxu3  ;;  %v6466_v59 = vor.u32 %v6935_v8, %v6465_v12 }
 0x425   : > { %v8471_v3 = vadd.f32 %v3825_v28, %v3777_v57  ;;  %v6370_v57 = vor.u32 %v6911_v38, %v6369_v22 }
 0x426   : > { %4102 = vmatpush.bf16.msra.mxu1 %v6466_v59 }
 0x427   : > { %4053 = vmatpush.bf16.msra.mxu0 %v6370_v57  ;;  %v6453_v57 = vld [vmem:[#allocation8 + $0x128] sm:$0xf] }
 0x428   : > { %v3783_v9 = vpop.f32.mrf.mxu2 }
 0x429   : > { %v3784_v55 = vadd.f32 %v3783_v9, %v3735_v43  ;;  %v3688_v14 = vpop.f32.mrf.mxu0 }
 0x42a   : > { %v3689_v56 = vadd.f32 %v3688_v14, %v8435_v5  ;;  %v3737_v48 = vpop.f32.mrf.mxu1 }
 0x42c   : > { %v3738_v37 = vadd.f32 %v3737_v48, %v3689_v56  ;;  %v3827_v20 = vpop.f32.mrf.mxu3  ;;  %3883 = vmatmul.bf16.gmra.mxu0 %v9432_v30  ;;  %3932 = vmatmul.bf16.gmra.mxu1 %v9433_v53  ;;  %v6549_v48 = vld [vmem:[#allocation8 + $0x1e8] sm:$0xf] }
 0x42d   : > { %v8475_v10 = vadd.f32 %v3827_v20, %v3779_v0  ;;  %3981 = vmatmul.bf16.gmra.mxu2 %v8314_v24  ;;  %v6357_v20 = vld [vmem:[#allocation8 + $0x68] sm:$0xf] }
 0x42e   : > { %v6358_v8 = vor.u32 %v6908_v7, %v6357_v20  ;;  %v6953_v7 = vld [vmem:[#allocation8 + $0x1d8] sm:$0xf0] }
 0x42f   : > { %9441 = vst [vmem:[#allocation29_spill] sm:$0xff] %v8475_v10  ;;  %v6947_v10 = vld [vmem:[#allocation8 + $0x1a8] sm:$0xf0] }
 0x430   : > { %v3786_v4 = vpop.f32.mrf.mxu2  ;;  %4054 = vmatpush.bf16.msra.mxu0 %v6358_v8  ;;  %v6950_v8 = vld [vmem:[#allocation8 + $0x1c0] sm:$0xf0] }
 0x431   : > { %v8479_v43 = vadd.f32 %v3786_v4, %v3738_v37  ;;  %4025 = vmatmul.bf16.gmra.mxu3 %v8398_v47  ;;  %v3690_v28 = vpop.f32.mrf.mxu0  ;;  %v6550_v37 = vor.u32 %v6956_v40, %v6549_v48  ;;  %v6454_v4 = vor.u32 %v6932_v31, %v6453_v57  ;;  %v6441_v48 = vld [vmem:[#allocation8 + $0x110] sm:$0xf]  ;;  %v6929_v40 = vld [vmem:[#allocation8 + $0x118] sm:$0xf0] }
 0x432   : > { %v3691_v0 = vadd.f32 %v3690_v28, %v8435_v5  ;;  %v3739_v9 = vpop.f32.mrf.mxu1  ;;  %v6645_v28 = vld [vmem:[#allocation8 + $0x2a8] sm:$0xf] }
 0x433   : > { %4152 = vmatpush.bf16.msra.mxu2 %v6550_v37  ;;  %4103 = vmatpush.bf16.msra.mxu1 %v6454_v4  ;;  %v6537_v37 = vld [vmem:[#allocation8 + $0x1d0] sm:$0xf] }
 0x434   : > { %v3740_v14 = vadd.f32 %v3739_v9, %v3691_v0  ;;  %v3830_v41 = vpop.f32.mrf.mxu3  ;;  %v6980_v0 = vld [vmem:[#allocation8 + $0x2b0] sm:$0xf0]  ;;  %v6345_v9 = vld [vmem:[#allocation8 + $0x50] sm:$0xf]  ;;  %v6538_v57 = vor.u32 %v6953_v7, %v6537_v37  ;;  %v6321_v7 = vld [vmem:[#allocation8 + $0x20] sm:$0xf] }
 0x435   : > { %v8483_v15 = vadd.f32 %v3830_v41, %v3782_v58  ;;  %v6646_v41 = vor.u32 %v6980_v0, %v6645_v28  ;;  %v6926_v28 = vld [vmem:[#allocation8 + $0x100] sm:$0xf0]  ;;  %v6525_v0 = vld [vmem:[#allocation8 + $0x1b8] sm:$0xf] }
 0x437   : > { %9442 = vst [vmem:[#allocation30_spill] sm:$0xff] %v8483_v15  ;;  %4201 = vmatpush.bf16.msra.mxu3 %v6646_v41  ;;  %4153 = vmatpush.bf16.msra.mxu2 %v6538_v57  ;;  %v6923_v57 = vld [vmem:[#allocation8 + $0xe8] sm:$0xf0]  ;;  %v6513_v15 = vld [vmem:[#allocation8 + $0x1a0] sm:$0xf] }
 0x438   : > { %v3788_v56 = vpop.f32.mrf.mxu2 }
 0x439   : > { %v8485_v22 = vadd.f32 %v3788_v56, %v3740_v14  ;;  %v3693_v38 = vpop.f32.mrf.mxu0  ;;  %v6905_v56 = vld [vmem:[#allocation8 + $0x58] sm:$0xf0] }
 0x43a   : > { %v3694_v29 = vadd.f32 %v3693_v38, %v8435_v5  ;;  %v3742_v12 = vpop.f32.mrf.mxu1  ;;  %v6346_v20 = vor.u32 %v6905_v56, %v6345_v9  ;;  %v6442_v38 = vor.u32 %v6929_v40, %v6441_v48  ;;  %v6526_v40 = vor.u32 %v6950_v8, %v6525_v0 }
 0x43c   : > { %v3743_v59 = vadd.f32 %v3742_v12, %v3694_v29  ;;  %v3832_v58 = vpop.f32.mrf.mxu3  ;;  %3888 = vmatmul.bf16.gmra.mxu0 %v9434_v44  ;;  %3937 = vmatmul.bf16.gmra.mxu1 %v9435_v39  ;;  %v6333_v29 = vld [vmem:[#allocation8 + $0x38] sm:$0xf] }
 0x43d   : > { %v8489_v14 = vadd.f32 %v3832_v58, %v3784_v55  ;;  %3986 = vmatmul.bf16.gmra.mxu2 %v8329_v25  ;;  %4104 = vmatpush.bf16.msra.mxu1 %v6442_v38  ;;  %v6902_v55 = vld [vmem:[#allocation8 + $0x40] sm:$0xf0]  ;;  %v6429_v12 = vld [vmem:[#allocation8 + $0xf8] sm:$0xf] }
 0x43e   : > { %4055 = vmatpush.bf16.msra.mxu0 %v6346_v20  ;;  %v6334_v41 = vor.u32 %v6902_v55, %v6333_v29  ;;  %v6430_v48 = vor.u32 %v6926_v28, %v6429_v12  ;;  %4154 = vmatpush.bf16.msra.mxu2 %v6526_v40  ;;  %v6514_v20 = vor.u32 %v6947_v10, %v6513_v15  ;;  %v6309_v55 = vld [vmem:[#allocation8 + $0x8] sm:$0xf]  ;;  %v6896_v12 = vld [vmem:[#allocation8 + $0x10] sm:$0xf0]  ;;  %v6977_v15 = vld [vmem:[#allocation8 + $0x298] sm:$0xf0] }
 0x43f   : > { %9443 = vst [vmem:[#allocation31_spill] sm:$0xff] %v8489_v14  ;;  %v6405_v28 = vld [vmem:[#allocation8 + $0xc8] sm:$0xf]  ;;  %v6310_v40 = vor.u32 %v6896_v12, %v6309_v55 }
 0x440   : > { %v3791_v31 = vpop.f32.mrf.mxu2 }
 0x441   : > { %v8493_v4 = vadd.f32 %v3791_v31, %v3743_v59  ;;  %4030 = vmatmul.bf16.gmra.mxu3 %v8408_v27  ;;  %v3695_v58 = vpop.f32.mrf.mxu0  ;;  %4105 = vmatpush.bf16.msra.mxu1 %v6430_v48  ;;  %v6899_v59 = vld [vmem:[#allocation8 + $0x28] sm:$0xf0]  ;;  %v6417_v31 = vld [vmem:[#allocation8 + $0xe0] sm:$0xf] }
 0x442   : > { %v3696_v9 = vadd.f32 %v3695_v58, %v8435_v5  ;;  %v3744_v56 = vpop.f32.mrf.mxu1  ;;  %4056 = vmatpush.bf16.msra.mxu0 %v6334_v41  ;;  %v6322_v58 = vor.u32 %v6899_v59, %v6321_v7  ;;  %v6418_v27 = vor.u32 %v6923_v57, %v6417_v31  ;;  %4155 = vmatpush.bf16.msra.mxu2 %v6514_v20  ;;  %v6944_v41 = vld [vmem:[#allocation8 + $0x190] sm:$0xf0] }
 0x444   : > { %v3745_v38 = vadd.f32 %v3744_v56, %v3696_v9  ;;  %v3835_v37 = vpop.f32.mrf.mxu3  ;;  %v6920_v9 = vld [vmem:[#allocation8 + $0xd0] sm:$0xf0]  ;;  %v6501_v56 = vld [vmem:[#allocation8 + $0x188] sm:$0xf] }
 0x445   : > { %v8498_v14 = vadd.f32 %v3835_v37, %v8479_v43  ;;  %4106 = vmatpush.bf16.msra.mxu1 %v6418_v27  ;;  %v6406_v37 = vor.u32 %v6920_v9, %v6405_v28  ;;  %v6502_v7 = vor.u32 %v6944_v41, %v6501_v56  ;;  %v6633_v27 = vld [vmem:[#allocation8 + $0x290] sm:$0xf] }
 0x446   : > { %4057 = vmatpush.bf16.msra.mxu0 %v6322_v58  ;;  %v6634_v31 = vor.u32 %v6977_v15, %v6633_v27 }
 0x447   : > { %4156 = vmatpush.bf16.msra.mxu2 %v6502_v7 }
 0x448   : > { %v3793_v29 = vpop.f32.mrf.mxu2  ;;  %4202 = vmatpush.bf16.msra.mxu3 %v6634_v31  ;;  %v6597_v31 = vld [vmem:[#allocation8 + $0x248] sm:$0xf] }
 0x449   : > { %v3794_v0 = vadd.f32 %v3793_v29, %v3745_v38  ;;  %v3698_v8 = vpop.f32.mrf.mxu0  ;;  %4107 = vmatpush.bf16.msra.mxu1 %v6406_v37 }
 0x44a   : > { %v3699_v43 = vadd.f32 %v3698_v8, %v8435_v5  ;;  %v3747_v48 = vpop.f32.mrf.mxu1  ;;  %4058 = vmatpush.bf16.msra.mxu0 %v6310_v40  ;;  %v6974_v8 = vld [vmem:[#allocation8 + $0x280] sm:$0xf0]  ;;  %v6971_v40 = vld [vmem:[#allocation8 + $0x268] sm:$0xf0] }
 0x44c   : > { %v3748_v59 = vadd.f32 %v3747_v48, %v3699_v43  ;;  %v3837_v10 = vpop.f32.mrf.mxu3  ;;  %3893 = vmatmul.bf16.gmra.mxu0 %v9437_v51  ;;  %3942 = vmatmul.bf16.gmra.mxu1 %v9438_v23  ;;  %v6609_v48 = vld [vmem:[#allocation8 + $0x260] sm:$0xf] }
 0x44d   : > { %v8503_v38 = vadd.f32 %v3837_v10, %v8485_v22  ;;  %3991 = vmatmul.bf16.gmra.mxu2 %v8344_v32  ;;  %v6621_v22 = vld [vmem:[#allocation8 + $0x278] sm:$0xf]  ;;  %v6610_v7 = vor.u32 %v6971_v40, %v6609_v48 }
 0x44e   : > { %v6622_v56 = vor.u32 %v6974_v8, %v6621_v22 }
 0x450   : > { %v3796_v57 = vpop.f32.mrf.mxu2  ;;  %4203 = vmatpush.bf16.msra.mxu3 %v6622_v56 }
 0x451   : > { %v3797_v58 = vadd.f32 %v3796_v57, %v3748_v59  ;;  %4035 = vmatmul.bf16.gmra.mxu3 %v8418_v42  ;;  %v3700_v20 = vpop.f32.mrf.mxu0  ;;  %v6968_v57 = vld [vmem:[#allocation8 + $0x250] sm:$0xf0] }
 0x452   : > { %v3701_v29 = vadd.f32 %v3700_v20, %v8435_v5  ;;  %v3749_v55 = vpop.f32.mrf.mxu1  ;;  %v6598_v20 = vor.u32 %v6968_v57, %v6597_v31  ;;  %v8531_v57 = vperm.slane %v8432_v13, 1 }
 0x454   : > { %v3750_v12 = vadd.f32 %v3749_v55, %v3701_v29  ;;  %v3840_v28 = vpop.f32.mrf.mxu3  ;;  %4204 = vmatpush.bf16.msra.mxu3 %v6610_v7 }
 0x455   : > { %v8510_v9 = vadd.f32 %v3840_v28, %v8493_v4 }
 0x458   : > { %v3798_v43 = vpop.f32.mrf.mxu2  ;;  %4205 = vmatpush.bf16.msra.mxu3 %v6598_v20 }
 0x459   : > { %v3799_v37 = vadd.f32 %v3798_v43, %v3750_v12  ;;  %v3703_v41 = vpop.f32.mrf.mxu0 }
 0x45a   : > { %v3704_v59 = vadd.f32 %v3703_v41, %v8435_v5  ;;  %v3752_v10 = vpop.f32.mrf.mxu1 }
 0x45c   : > { %v3753_v27 = vadd.f32 %v3752_v10, %v3704_v59  ;;  %v3842_v15 = vpop.f32.mrf.mxu3  ;;  %3898 = vmatmul.bf16.gmra.mxu0 %v9439_v50  ;;  %3947 = vmatmul.bf16.gmra.mxu1 %v9440_v11 }
 0x45d   : > { %v8514_v4 = vadd.f32 %v3842_v15, %v3794_v0  ;;  %3996 = vmatmul.bf16.gmra.mxu2 %v8359_v34 }
 0x460   : > { %v3801_v29 = vpop.f32.mrf.mxu2 }
 0x461   : > { %v3802_v55 = vadd.f32 %v3801_v29, %v3753_v27  ;;  %4040 = vmatmul.bf16.gmra.mxu3 %v8428_v35  ;;  %v3705_v12 = vpop.f32.mrf.mxu0 }
 0x462   : > { %v3706_v28 = vadd.f32 %v3705_v12, %v8435_v5  ;;  %v3754_v22 = vpop.f32.mrf.mxu1 }
 0x464   : > { %v3755_v8 = vadd.f32 %v3754_v22, %v3706_v28  ;;  %v3845_v56 = vpop.f32.mrf.mxu3 }
 0x465   : > { %v8520_v43 = vadd.f32 %v3845_v56, %v3797_v58 }
 0x468   : > { %v3803_v0 = vpop.f32.mrf.mxu2 }
 0x469   : > { %v3804_v48 = vadd.f32 %v3803_v0, %v3755_v8  ;;  %v3864_v40 = vpop.f32.mrf.mxu0 }
 0x46a   : > { %v3913_v41 = vpop.f32.mrf.mxu1 }
 0x46c   : > { %v3847_v7 = vpop.f32.mrf.mxu3  ;;  %4059 = vmatmul.bf16.vlgmr.msra.gmra.mxu0 %v9424_v60  ;;  %4108 = vmatmul.bf16.vlgmr.msra.gmra.mxu1 %v9425_v46  ;;  %v3865_v46 = vadd.f32 %v3864_v40, %v8531_v57 }
 0x46d   : > { %v8523_v59 = vadd.f32 %v3847_v7, %v3799_v37  ;;  %4157 = vmatmul.bf16.vlgmr.msra.gmra.mxu2 %v8256_v17 }
 0x470   : > { %v3962_v10 = vpop.f32.mrf.mxu2 }
 0x471   : > { %4045 = vmatmul.bf16.gmra.mxu3 %v8441_v2  ;;  %v3866_v5 = vpop.f32.mrf.mxu0 }
 0x472   : > { %v3915_v27 = vpop.f32.mrf.mxu1  ;;  %v3867_v8 = vadd.f32 %v3866_v5, %v8531_v57 }
 0x474   : > { %v3850_v58 = vpop.f32.mrf.mxu3  ;;  %v3916_v40 = vadd.f32 %v3915_v27, %v3867_v8 }
 0x475   : > { %v8528_v15 = vadd.f32 %v3850_v58, %v3802_v55  ;;  %v3914_v55 = vadd.f32 %v3913_v41, %v3865_v46 }
 0x477   : > { %v3963_v28 = vadd.f32 %v3962_v10, %v3914_v55 }
 0x478   : > { %v3964_v31 = vpop.f32.mrf.mxu2 }
 0x479   : > { %v3869_v20 = vpop.f32.mrf.mxu0 }
 0x47a   : > { %v3918_v60 = vpop.f32.mrf.mxu1 }
 0x47c   : > { %v3852_v37 = vpop.f32.mrf.mxu3  ;;  %4064 = vmatmul.bf16.gmra.mxu0 %v9426_v36  ;;  %4113 = vmatmul.bf16.gmra.mxu1 %v9427_v45  ;;  %v3965_v45 = vadd.f32 %v3964_v31, %v3916_v40 }
 0x47d   : > { %v8535_v17 = vadd.f32 %v3852_v37, %v3804_v48  ;;  %4162 = vmatmul.bf16.gmra.mxu2 %v8270_v21  ;;  %v3870_v21 = vadd.f32 %v3869_v20, %v8531_v57 }
 0x47f   : > { %v3919_v46 = vadd.f32 %v3918_v60, %v3870_v21 }
 0x480   : > { %v3967_v29 = vpop.f32.mrf.mxu2 }
 0x481   : > { %4206 = vmatmul.bf16.vlgmr.msra.gmra.mxu3 %v8371_v18  ;;  %v3871_v12 = vpop.f32.mrf.mxu0 }
 0x482   : > { %v3920_v13 = vpop.f32.mrf.mxu1  ;;  %v3872_v20 = vadd.f32 %v3871_v12, %v8531_v57 }
 0x484   : > { %v4011_v22 = vpop.f32.mrf.mxu3  ;;  %v3921_v60 = vadd.f32 %v3920_v13, %v3872_v20  ;;  %v8570_v20 = vld [vmem:[#allocation11 + $0x1] ss:$0 sm:$0xff] }
 0x485   : > { %v4012_v56 = vadd.f32 %v4011_v22, %v3963_v28 }
 0x487   : > { %v6683_v36 = vmul.f32 -1.442695, %v4012_v56 }
 0x488   : > { %v3969_v0 = vpop.f32.mrf.mxu2 }
 0x489   : > { %7102 = vpow2.f32 %v6683_v36  ;;  %v3874_v48 = vpop.f32.mrf.mxu0 }
 0x48a   : > { %v3923_v7 = vpop.f32.mrf.mxu1  ;;  %v3875_v12 = vadd.f32 %v3874_v48, %v8531_v57 }
 0x48c   : > { %v4013_v58 = vpop.f32.mrf.mxu3  ;;  %4069 = vmatmul.bf16.gmra.mxu0 %v9428_v49  ;;  %4118 = vmatmul.bf16.gmra.mxu1 %v9429_v61  ;;  %v3968_v49 = vadd.f32 %v3967_v29, %v3919_v46  ;;  %v3970_v29 = vadd.f32 %v3969_v0, %v3921_v60 }
 0x48d   : > { %v4014_v18 = vadd.f32 %v4013_v58, %v3965_v45  ;;  %4167 = vmatmul.bf16.gmra.mxu2 %v8284_v54 }
 0x48f   : > { %v7103_v41 = vpop.eup %7102  ;;  %v6684_v10 = vmul.f32 -1.442695, %v4014_v18 }
 0x490   : > { %v4311_v5 = vadd.f32 1.0, %v7103_v41  ;;  %v3972_v37 = vpop.f32.mrf.mxu2 }
 0x491   : > { %7104 = vpow2.f32 %v6684_v10  ;;  %4211 = vmatmul.bf16.gmra.mxu3 %v8380_v6  ;;  %v3876_v27 = vpop.f32.mrf.mxu0 }
 0x492   : > { %7106 = vrcp.f32 %v4311_v5  ;;  %v8546_v31 = vpop.f32.mrf.mxu1  ;;  %v4338_v21 = vand.u32 2147483648, %v4311_v5  ;;  %v4336_v41 = vand.u32 2147483647, %v4311_v5  ;;  %vm4332_vm1 = vweird.f32 %v4311_v5 }
 0x494   : > { %v4016_v55 = vpop.f32.mrf.mxu3  ;;  %vm4337_vm3 = vcmp.eq.f32.partialorder %v4336_v41, 8.507059e+37 }
 0x495   : > { %v4017_v28 = vadd.f32 %v4016_v55, %v3968_v49 }
 0x497   : > { %v7105_v61 = vpop.eup %7104  ;;  %v6685_v22 = vmul.f32 -1.442695, %v4017_v28  ;;  %v8572_v28 = vld [vmem:[#allocation11] ss:$0 sm:$0xff] }
 0x498   : > { %v7107_v54 = vpop.eup %7106  ;;  %v8549_v8 = vadd.f32 1.0, %v7105_v61  ;;  %v8551_v56 = vpop.f32.mrf.mxu2 }
 0x499   : > { %7108 = vpow2.f32 %v6685_v22  ;;  %v8553_v36 = vpop.f32.mrf.mxu0  ;;  %v4328_v6 = vmul.f32 %v7107_v54, %v4311_v5  ;;  %vm4333_vm0 = vweird.f32 %v7107_v54 }
 0x49a   : > { %7110 = vrcp.f32 %v8549_v8  ;;  %v8556_v40 = vpop.f32.mrf.mxu1  ;;  %vm4334_vm2 = vmor %vm4332_vm1, %vm4333_vm0  ;;  %vm4347_vm5 = vweird.f32 %v8549_v8 }
 0x49b   : > { %v4329_v45 = vsub.f32 1.0, %v4328_v6  ;;  %7112 = vtanh.f32 %v8451_v63  ;;  %v3924_v63 = vadd.f32 %v3923_v7, %v3875_v12  ;;  %v4353_v12 = vand.u32 2147483648, %v8549_v8 }
 0x49c   : > { %v4018_v58 = vpop.f32.mrf.mxu3  ;;  %4074 = vmatmul.bf16.gmra.mxu0 %v9430_v19  ;;  %4123 = vmatmul.bf16.gmra.mxu1 %v9431_v16  ;;  %v4339_v19 = vor.u32 1.1754944e-38, %v4338_v21 }
 0x49d   : > { %v4019_v18 = vadd.f32 %v4018_v58, %v3970_v29  ;;  %4172 = vmatmul.bf16.gmra.mxu2 %v8298_v33  ;;  %v4330_v13 = vmul.f32 %v7107_v54, %v4329_v45  ;;  %v3973_v60 = vadd.f32 %v3972_v37, %v3924_v63  ;;  %v4351_v45 = vand.u32 2147483647, %v8549_v8 }
 0x49e   : > { %v4354_v63 = vor.u32 1.1754944e-38, %v4353_v12 }
 0x49f   : > { %v7109_v10 = vpop.eup %7108  ;;  %v6686_v46 = vmul.f32 -1.442695, %v4019_v18  ;;  %v4331_v0 = vadd.f32 %v7107_v54, %v4330_v13  ;;  %vm4352_vm7 = vcmp.eq.f32.partialorder %v4351_v45, 8.507059e+37 }
 0x4a0   : > { %v7111_v49 = vpop.eup %7110  ;;  %v8563_v55 = vadd.f32 1.0, %v7109_v10  ;;  %v8565_v48 = vpop.f32.mrf.mxu2 }
 0x4a1   : > { %7114 = vpow2.f32 %v6686_v46  ;;  %4216 = vmatmul.bf16.gmra.mxu3 %v8388_v62  ;;  %v8568_v16 = vpop.f32.mrf.mxu0  ;;  %v4335_v33 = vsel %vm4334_vm2, %v7107_v54, %v4331_v0  ;;  %v4343_v5 = vmul.f32 %v7111_v49, %v8549_v8  ;;  %v7113_v7 = vpop.eup %7112  ;;  %v3877_v54 = vadd.f32 %v3876_v27, %v8531_v57 }
 0x4a2   : > { %7116 = vrcp.f32 %v8563_v55  ;;  %v8576_v61 = vpop.f32.mrf.mxu1  ;;  %v4340_v22 = vsel %vm4337_vm3, %v4339_v19, %v4335_v33  ;;  %vm4348_vm4 = vweird.f32 %v7111_v49  ;;  %vm4362_vm9 = vweird.f32 %v8563_v55 }
 0x4a3   : > { %7118 = vtanh.f32 %v8455_v52  ;;  %v4567_v62 = vmul.f32 %v7113_v7, %v4340_v22  ;;  %v4344_v6 = vsub.f32 1.0, %v4343_v5  ;;  %v3926_v27 = vadd.f32 %v8546_v31, %v3877_v54  ;;  %vm4349_vm6 = vmor %vm4347_vm5, %vm4348_vm4 }
 0x4a4   : > { %v4021_v29 = vpop.f32.mrf.mxu3 }
 0x4a5   : > { %v4022_v58 = vadd.f32 %v4021_v29, %v3973_v60  ;;  %v4653_v21 = vmul.f32 %v8570_v20, %v4567_v62  ;;  %v4585_v18 = vmul.f32 %v8572_v28, %v4567_v62  ;;  %v4345_v13 = vmul.f32 %v7111_v49, %v4344_v6 }
 0x4a6   : > { %v3975_v22 = vadd.f32 %v8551_v56, %v3926_v27  ;;  %v3880_v6 = vadd.f32 %v8553_v36, %v8531_v57  ;;  %v4368_v56 = vand.u32 2147483648, %v8563_v55 }
 0x4a7   : > { %v7115_v41 = vpop.eup %7114  ;;  %v6687_v10 = vmul.f32 -1.442695, %v4022_v58  ;;  %4669 = vadd.xlane.f32.xlu1 %v4653_v21  ;;  %4601 = vadd.xlane.f32.xlu0 %v4585_v18  ;;  %v4346_v52 = vadd.f32 %v7111_v49, %v4345_v13 }
 0x4a8   : > { %v7117_v37 = vpop.eup %7116  ;;  %v8586_v46 = vadd.f32 1.0, %v7115_v41  ;;  %v8588_v0 = vpop.f32.mrf.mxu2  ;;  %v3929_v18 = vadd.f32 %v8556_v40, %v3880_v6  ;;  %v4369_v41 = vor.u32 1.1754944e-38, %v4368_v56 }
 0x4a9   : > { %v7119_v19 = vpop.eup %7118  ;;  %7120 = vpow2.f32 %v6687_v10  ;;  %v8591_v33 = vpop.f32.mrf.mxu0  ;;  %v4350_v5 = vsel %vm4349_vm6, %v7111_v49, %v4346_v52  ;;  %v4358_v7 = vmul.f32 %v7117_v37, %v8563_v55  ;;  %vm4363_vm8 = vweird.f32 %v7117_v37 }
 0x4aa   : > { %7122 = vrcp.f32 %v8586_v46  ;;  %v8595_v8 = vpop.f32.mrf.mxu1  ;;  %v4355_v31 = vsel %vm4352_vm7, %v4354_v63, %v4350_v5  ;;  %vm4364_vm10 = vmor %vm4362_vm9, %vm4363_vm8  ;;  %vm4377_vm13 = vweird.f32 %v8586_v46 }
 0x4ab   : > { %v4568_v60 = vmul.f32 %v7119_v19, %v4355_v31  ;;  %v4359_v62 = vsub.f32 1.0, %v4358_v7  ;;  %7124 = vtanh.f32 %v8461_v1  ;;  %v4366_v1 = vand.u32 2147483647, %v8563_v55 }
 0x4ac   : > { %v4023_v54 = vpop.f32.mrf.mxu3  ;;  %4079 = vmatmul.bf16.gmra.mxu0 %v9432_v30  ;;  %4128 = vmatmul.bf16.gmra.mxu1 %v9433_v53  ;;  %v3978_v55 = vadd.f32 %v8565_v48, %v3929_v18  ;;  %v4383_v31 = vand.u32 2147483648, %v8586_v46 }
 0x4ad   : > { %v4024_v49 = vadd.f32 %v4023_v54, %v3975_v22  ;;  %4177 = vmatmul.bf16.gmra.mxu2 %v8314_v24  ;;  %v4654_v29 = vmul.f32 %v8570_v20, %v4568_v60  ;;  %v4586_v45 = vmul.f32 %v8572_v28, %v4568_v60  ;;  %v4360_v12 = vmul.f32 %v7117_v37, %v4359_v62 }
 0x4ae   : > { %vm4367_vm11 = vcmp.eq.f32.partialorder %v4366_v1, 8.507059e+37  ;;  %v4381_v62 = vand.u32 2147483647, %v8586_v46  ;;  %v4384_v56 = vor.u32 1.1754944e-38, %v4383_v31 }
 0x4af   : > { %v7121_v58 = vpop.eup %7120  ;;  %v6688_v36 = vmul.f32 -1.442695, %v4024_v49  ;;  %4671 = vadd.xlane.f32.xlu2 %v4654_v29  ;;  %4603 = vadd.xlane.f32.xlu0 %v4586_v45  ;;  %v4361_v24 = vadd.f32 %v7117_v37, %v4360_v12 }
 0x4b0   : > { %v7123_v30 = vpop.eup %7122  ;;  %v8608_v21 = vadd.f32 1.0, %v7121_v58  ;;  %v8610_v53 = vpop.f32.mrf.mxu2  ;;  %vm4382_vm15 = vcmp.eq.f32.partialorder %v4381_v62, 8.507059e+37 }
 0x4b1   : > { %7126 = vpow2.f32 %v6688_v36  ;;  %4221 = vmatmul.bf16.gmra.mxu3 %v8398_v47  ;;  %v8615_v13 = vpop.f32.mrf.mxu0  ;;  %v4373_v10 = vmul.f32 %v7123_v30, %v8586_v46  ;;  %v7125_v52 = vpop.eup %7124  ;;  %v4365_v63 = vsel %vm4364_vm10, %v7117_v37, %v4361_v24  ;;  %v3882_v47 = vadd.f32 %v8568_v16, %v8531_v57 }
 0x4b2   : > { %7128 = vrcp.f32 %v8608_v21  ;;  %v8620_v27 = vpop.f32.mrf.mxu1  ;;  %v4370_v40 = vsel %vm4367_vm11, %v4369_v41, %v4365_v63  ;;  %vm4378_vm12 = vweird.f32 %v7123_v30  ;;  %v4398_v63 = vand.u32 2147483648, %v8608_v21 }
 0x4b3   : > { %v4374_v19 = vsub.f32 1.0, %v4373_v10  ;;  %7130 = vtanh.f32 %v8465_v26  ;;  %v4569_v7 = vmul.f32 %v7125_v52, %v4370_v40  ;;  %v3931_v16 = vadd.f32 %v8576_v61, %v3882_v47  ;;  %vm4379_vm14 = vmor %vm4377_vm13, %vm4378_vm12 }
 0x4b4   : > { %v4026_v5 = vpop.f32.mrf.mxu3  ;;  %v3885_v10 = vadd.f32 %v8591_v33, %v8531_v57  ;;  %vm4392_vm1 = vweird.f32 %v8608_v21 }
 0x4b5   : > { %v4027_v22 = vadd.f32 %v4026_v5, %v3978_v55  ;;  %v4375_v60 = vmul.f32 %v7123_v30, %v4374_v19  ;;  %v4587_v37 = vmul.f32 %v8572_v28, %v4569_v7  ;;  %v4655_v48 = vmul.f32 %v8570_v20, %v4569_v7 }
 0x4b6   : > { %v3980_v24 = vadd.f32 %v8588_v0, %v3931_v16 }
 0x4b7   : > { %v7127_v6 = vpop.eup %7126  ;;  %v6689_v54 = vmul.f32 -1.442695, %v4027_v22  ;;  %v4376_v49 = vadd.f32 %v7123_v30, %v4375_v60  ;;  %4605 = vadd.xlane.f32.xlu1 %v4587_v37  ;;  %4673 = vadd.xlane.f32.xlu0 %v4655_v48 }
 0x4b8   : > { %v7129_v26 = vpop.eup %7128  ;;  %v8632_v29 = vadd.f32 1.0, %v7127_v6  ;;  %v8634_v45 = vpop.f32.mrf.mxu2 }
 0x4b9   : > { %7132 = vpow2.f32 %v6689_v54  ;;  %v8636_v12 = vpop.f32.mrf.mxu0  ;;  %v4380_v1 = vsel %vm4379_vm14, %v7123_v30, %v4376_v49  ;;  %v4388_v58 = vmul.f32 %v7129_v26, %v8608_v21  ;;  %v7131_v36 = vpop.eup %7130  ;;  %v4396_v30 = vand.u32 2147483647, %v8608_v21  ;;  %v9445_v54 = vld [vmem:[#allocation29_spill] sm:$0xff] }
 0x4ba   : > { %7134 = vrcp.f32 %v8632_v29  ;;  %v8640_v46 = vpop.f32.mrf.mxu1  ;;  %v4385_v61 = vsel %vm4382_vm15, %v4384_v56, %v4380_v1  ;;  %vm4393_vm0 = vweird.f32 %v7129_v26  ;;  %v3887_v49 = vadd.f32 %v8615_v13, %v8531_v57 }
 0x4bb   : > { %v4570_v18 = vmul.f32 %v7131_v36, %v4385_v61  ;;  %v4389_v41 = vsub.f32 1.0, %v4388_v58  ;;  %7136 = vtanh.f32 %v8471_v3  ;;  %vm4394_vm2 = vmor %vm4392_vm1, %vm4393_vm0  ;;  %vm4397_vm3 = vcmp.eq.f32.partialorder %v4396_v30, 8.507059e+37 }
 0x4bc   : > { %v4028_v52 = vpop.f32.mrf.mxu3  ;;  %4084 = vmatmul.bf16.gmra.mxu0 %v9434_v44  ;;  %4133 = vmatmul.bf16.gmra.mxu1 %v9435_v39  ;;  %v3934_v44 = vadd.f32 %v8595_v8, %v3885_v10  ;;  %v4399_v39 = vor.u32 1.1754944e-38, %v4398_v63  ;;  %v4413_v56 = vand.u32 2147483648, %v8632_v29  ;;  %vm4407_vm5 = vweird.f32 %v8632_v29 }
 0x4bd   : > { %v4029_v55 = vadd.f32 %v4028_v52, %v3980_v24  ;;  %4182 = vmatmul.bf16.gmra.mxu2 %v8329_v25  ;;  %v4588_v0 = vmul.f32 %v8572_v28, %v4570_v18  ;;  %v4390_v40 = vmul.f32 %v7129_v26, %v4389_v41  ;;  %v9444_v25 = vld [vmem:[#allocation28_spill] sm:$0xff]  ;;  %v4656_v61 = vmul.f32 %v8570_v20, %v4570_v18 }
 0x4be   : > { %v3983_v37 = vadd.f32 %v8610_v53, %v3934_v44  ;;  %v3936_v13 = vadd.f32 %v8620_v27, %v3887_v49  ;;  %v4414_v63 = vor.u32 1.1754944e-38, %v4413_v56  ;;  %v9446_v44 = vld [vmem:[#allocation30_spill] sm:$0xff] }
 0x4bf   : > { %v7133_v3 = vpop.eup %7132  ;;  %v6690_v19 = vmul.f32 -1.442695, %v4029_v55  ;;  %v4391_v47 = vadd.f32 %v7129_v26, %v4390_v40  ;;  %4607 = vadd.xlane.f32.xlu1 %v4588_v0 }
 0x4c0   : > { %v7135_v33 = vpop.eup %7134  ;;  %v8654_v5 = vadd.f32 1.0, %v7133_v3  ;;  %v8656_v7 = vpop.f32.mrf.mxu2  ;;  %v3985_v3 = vadd.f32 %v8634_v45, %v3936_v13 }
 0x4c1   : > { %7138 = vpow2.f32 %v6690_v19  ;;  %4226 = vmatmul.bf16.gmra.mxu3 %v9444_v25  ;;  %v8659_v31 = vpop.f32.mrf.mxu0  ;;  %v4395_v22 = vsel %vm4394_vm2, %v7129_v26, %v4391_v47  ;;  %v4403_v60 = vmul.f32 %v7135_v33, %v8632_v29  ;;  %v7137_v21 = vpop.eup %7136  ;;  %v4411_v26 = vand.u32 2147483647, %v8632_v29 }
 0x4c2   : > { %7140 = vrcp.f32 %v8654_v5  ;;  %v8663_v8 = vpop.f32.mrf.mxu1  ;;  %v4400_v62 = vsel %vm4397_vm3, %v4399_v39, %v4395_v22  ;;  %vm4408_vm4 = vweird.f32 %v7135_v33  ;;  %v3890_v39 = vadd.f32 %v8636_v12, %v8531_v57 }
 0x4c3   : > { %v4571_v48 = vmul.f32 %v7137_v21, %v4400_v62  ;;  %v4404_v6 = vsub.f32 1.0, %v4403_v60  ;;  %7142 = vtanh.f32 %v9445_v54  ;;  %vm4409_vm6 = vmor %vm4407_vm5, %vm4408_vm4  ;;  %vm4412_vm7 = vcmp.eq.f32.partialorder %v4411_v26, 8.507059e+37 }
 0x4c4   : > { %v4031_v16 = vpop.f32.mrf.mxu3  ;;  %v4428_v45 = vand.u32 2147483648, %v8654_v5  ;;  %v4426_v62 = vand.u32 2147483647, %v8654_v5  ;;  %vm4422_vm9 = vweird.f32 %v8654_v5 }
 0x4c5   : > { %v4032_v1 = vadd.f32 %v4031_v16, %v3983_v37  ;;  %v4589_v58 = vmul.f32 %v8572_v28, %v4571_v48  ;;  %v4405_v36 = vmul.f32 %v7135_v33, %v4404_v6  ;;  %v4657_v22 = vmul.f32 %v8570_v20, %v4571_v48 }
 0x4c6   : > { %v3939_v48 = vadd.f32 %v8640_v46, %v3890_v39  ;;  %v4429_v49 = vor.u32 1.1754944e-38, %v4428_v45  ;;  %vm4427_vm11 = vcmp.eq.f32.partialorder %v4426_v62, 8.507059e+37 }
 0x4c7   : > { %v7139_v53 = vpop.eup %7138  ;;  %v6691_v24 = vmul.f32 -1.442695, %v4032_v1  ;;  %4609 = vadd.xlane.f32.xlu2 %v4589_v58  ;;  %v4406_v41 = vadd.f32 %v7135_v33, %v4405_v36  ;;  %4675 = vadd.xlane.f32.xlu1 %v4656_v61  ;;  %v3892_v36 = vadd.f32 %v8659_v31, %v8531_v57 }
 0x4c8   : > { %v7141_v10 = vpop.eup %7140  ;;  %v8675_v52 = vadd.f32 1.0, %v7139_v53  ;;  %v8677_v30 = vpop.f32.mrf.mxu2  ;;  %v3988_v46 = vadd.f32 %v8656_v7, %v3939_v48 }
 0x4c9   : > { %7144 = vpow2.f32 %v6691_v24  ;;  %v8679_v55 = vpop.f32.mrf.mxu0  ;;  %v4410_v18 = vsel %vm4409_vm6, %v7135_v33, %v4406_v41  ;;  %v4418_v0 = vmul.f32 %v7141_v10, %v8654_v5  ;;  %v7143_v40 = vpop.eup %7142  ;;  %vm4423_vm8 = vweird.f32 %v7141_v10  ;;  %v9447_v5 = vld [vmem:[#allocation31_spill] sm:$0xff] }
 0x4ca   : > { %7146 = vrcp.f32 %v8675_v52  ;;  %v8683_v29 = vpop.f32.mrf.mxu1  ;;  %v4415_v27 = vsel %vm4412_vm7, %v4414_v63, %v4410_v18  ;;  %vm4424_vm10 = vmor %vm4422_vm9, %vm4423_vm8  ;;  %v4441_v24 = vand.u32 2147483647, %v8675_v52  ;;  %v4443_v41 = vand.u32 2147483648, %v8675_v52 }
 0x4cb   : > { %v4572_v19 = vmul.f32 %v7143_v40, %v4415_v27  ;;  %v4419_v47 = vsub.f32 1.0, %v4418_v0  ;;  %7148 = vtanh.f32 %v9446_v44  ;;  %vm4437_vm13 = vweird.f32 %v8675_v52 }
 0x4cc   : > { %v4033_v25 = vpop.f32.mrf.mxu3  ;;  %4089 = vmatmul.bf16.gmra.mxu0 %v9437_v51  ;;  %4138 = vmatmul.bf16.gmra.mxu1 %v9438_v23  ;;  %v4444_v44 = vor.u32 1.1754944e-38, %v4443_v41  ;;  %vm4442_vm15 = vcmp.eq.f32.partialorder %v4441_v24, 8.507059e+37  ;;  %v3895_v62 = vadd.f32 %v8679_v55, %v8531_v57 }
 0x4cd   : > { %v4034_v33 = vadd.f32 %v4033_v25, %v3985_v3  ;;  %4187 = vmatmul.bf16.gmra.mxu2 %v8344_v32  ;;  %v4658_v60 = vmul.f32 %v8570_v20, %v4572_v19  ;;  %v4420_v21 = vmul.f32 %v7141_v10, %v4419_v47  ;;  %v4590_v63 = vmul.f32 %v8572_v28, %v4572_v19 }
 0x4ce   : > { %v3941_v3 = vadd.f32 %v8663_v8, %v3892_v36 }
 0x4cf   : > { %v7145_v37 = vpop.eup %7144  ;;  %v6692_v12 = vmul.f32 -1.442695, %v4034_v33  ;;  %4677 = vadd.xlane.f32.xlu2 %v4657_v22  ;;  %4679 = vadd.xlane.f32.xlu0 %v4658_v60  ;;  %v4421_v32 = vadd.f32 %v7141_v10, %v4420_v21 }
 0x4d0   : > { %v7147_v51 = vpop.eup %7146  ;;  %v8696_v6 = vadd.f32 1.0, %v7145_v37  ;;  %v8698_v23 = vpop.f32.mrf.mxu2  ;;  %v3990_v60 = vadd.f32 %v8677_v30, %v3941_v3 }
 0x4d1   : > { %7150 = vpow2.f32 %v6692_v12  ;;  %4231 = vmatmul.bf16.gmra.mxu3 %v8418_v42  ;;  %v8703_v54 = vpop.f32.mrf.mxu0  ;;  %v4433_v16 = vmul.f32 %v7147_v51, %v8675_v52  ;;  %v7149_v26 = vpop.eup %7148  ;;  %v4425_v1 = vsel %vm4424_vm10, %v7141_v10, %v4421_v32  ;;  %vm4438_vm12 = vweird.f32 %v7147_v51 }
 0x4d2   : > { %7152 = vrcp.f32 %v8696_v6  ;;  %v8708_v56 = vpop.f32.mrf.mxu1  ;;  %v4430_v58 = vsel %vm4427_vm11, %v4429_v49, %v4425_v1  ;;  %vm4439_vm14 = vmor %vm4437_vm13, %vm4438_vm12  ;;  %v4458_v30 = vand.u32 2147483648, %v8696_v6  ;;  %vm4452_vm1 = vweird.f32 %v8696_v6 }
 0x4d3   : > { %7154 = vtanh.f32 %v9447_v5  ;;  %v4434_v42 = vsub.f32 1.0, %v4433_v16  ;;  %v4573_v53 = vmul.f32 %v7149_v26, %v4430_v58  ;;  %v3944_v26 = vadd.f32 %v8683_v29, %v3895_v62 }
 0x4d4   : > { %v4036_v61 = vpop.f32.mrf.mxu3  ;;  %v4459_v5 = vor.u32 1.1754944e-38, %v4458_v30 }
 0x4d5   : > { %v4037_v13 = vadd.f32 %v4036_v61, %v3988_v46  ;;  %v4435_v10 = vmul.f32 %v7147_v51, %v4434_v42  ;;  %v4659_v18 = vmul.f32 %v8570_v20, %v4573_v53  ;;  %v4591_v7 = vmul.f32 %v8572_v28, %v4573_v53 }
 0x4d7   : > { %v7151_v0 = vpop.eup %7150  ;;  %v6693_v40 = vmul.f32 -1.442695, %v4037_v13  ;;  %4611 = vadd.xlane.f32.xlu2 %v4590_v63  ;;  %v4436_v27 = vadd.f32 %v7147_v51, %v4435_v10  ;;  %4681 = vadd.xlane.f32.xlu1 %v4659_v18 }
 0x4d8   : > { %v7153_v31 = vpop.eup %7152  ;;  %v8721_v47 = vadd.f32 1.0, %v7151_v0  ;;  %4613 = vadd.xlane.f32.xlu0 %v4591_v7  ;;  %v8723_v19 = vpop.f32.mrf.mxu2 }
 0x4d9   : > { %v7155_v39 = vpop.eup %7154  ;;  %7156 = vpow2.f32 %v6693_v40  ;;  %v8725_v25 = vpop.f32.mrf.mxu0  ;;  %v4440_v33 = vsel %vm4439_vm14, %v7147_v51, %v4436_v27  ;;  %v4448_v22 = vmul.f32 %v7153_v31, %v8696_v6  ;;  %vm4453_vm0 = vweird.f32 %v7153_v31 }
 0x4da   : > { %7158 = vrcp.f32 %v8721_v47  ;;  %v8729_v52 = vpop.f32.mrf.mxu1  ;;  %v4445_v8 = vsel %vm4442_vm15, %v4444_v44, %v4440_v33  ;;  %vm4454_vm2 = vmor %vm4452_vm1, %vm4453_vm0  ;;  %v4473_v41 = vand.u32 2147483648, %v8721_v47  ;;  %v4471_v10 = vand.u32 2147483647, %v8721_v47 }
 0x4db   : > { %v4574_v45 = vmul.f32 %v7155_v39, %v4445_v8  ;;  %v4449_v21 = vsub.f32 1.0, %v4448_v22  ;;  %7160 = vtanh.f32 %v8498_v14  ;;  %v4456_v14 = vand.u32 2147483647, %v8696_v6 }
 0x4dc   : > { %v4038_v37 = vpop.f32.mrf.mxu3  ;;  %4094 = vmatmul.bf16.gmra.mxu0 %v9439_v50  ;;  %4143 = vmatmul.bf16.gmra.mxu1 %v9440_v11  ;;  %v3993_v6 = vadd.f32 %v8698_v23, %v3944_v26  ;;  %vm4467_vm5 = vweird.f32 %v8721_v47  ;;  %v4474_v3 = vor.u32 1.1754944e-38, %v4473_v41  ;;  %vm4472_vm7 = vcmp.eq.f32.partialorder %v4471_v10, 8.507059e+37 }
 0x4dd   : > { %v4039_v12 = vadd.f32 %v4038_v37, %v3990_v60  ;;  %4192 = vmatmul.bf16.gmra.mxu2 %v8359_v34  ;;  %v4660_v51 = vmul.f32 %v8570_v20, %v4574_v45  ;;  %v4592_v32 = vmul.f32 %v8572_v28, %v4574_v45  ;;  %v4450_v48 = vmul.f32 %v7153_v31, %v4449_v21 }
 0x4de   : > { %vm4457_vm3 = vcmp.eq.f32.partialorder %v4456_v14, 8.507059e+37  ;;  %v3900_v21 = vadd.f32 %v8725_v25, %v8531_v57 }
 0x4df   : > { %v7157_v49 = vpop.eup %7156  ;;  %v6694_v55 = vmul.f32 -1.442695, %v4039_v12  ;;  %4683 = vadd.xlane.f32.xlu2 %v4660_v51  ;;  %4615 = vadd.xlane.f32.xlu1 %v4592_v32  ;;  %v4451_v34 = vadd.f32 %v7153_v31, %v4450_v48 }
 0x4e0   : > { %v7159_v16 = vpop.eup %7158  ;;  %v8742_v50 = vadd.f32 1.0, %v7157_v49  ;;  %v8744_v11 = vpop.f32.mrf.mxu2  ;;  %v3949_v25 = vadd.f32 %v8729_v52, %v3900_v21 }
 0x4e1   : > { %7162 = vpow2.f32 %v6694_v55  ;;  %4236 = vmatmul.bf16.gmra.mxu3 %v8428_v35  ;;  %v8749_v1 = vpop.f32.mrf.mxu0  ;;  %v4463_v46 = vmul.f32 %v7159_v16, %v8721_v47  ;;  %v7161_v58 = vpop.eup %7160  ;;  %v4455_v36 = vsel %vm4454_vm2, %v7153_v31, %v4451_v34  ;;  %v3897_v35 = vadd.f32 %v8703_v54, %v8531_v57 }
 0x4e2   : > { %7164 = vrcp.f32 %v8742_v50  ;;  %v8754_v42 = vpop.f32.mrf.mxu1  ;;  %v4460_v29 = vsel %vm4457_vm3, %v4459_v5, %v4455_v36  ;;  %vm4468_vm4 = vweird.f32 %v7159_v16  ;;  %v4486_v37 = vand.u32 2147483647, %v8742_v50 }
 0x4e3   : > { %v4464_v61 = vsub.f32 1.0, %v4463_v46  ;;  %7166 = vtanh.f32 %v8503_v38  ;;  %v4575_v24 = vmul.f32 %v7161_v58, %v4460_v29  ;;  %v3946_v54 = vadd.f32 %v8708_v56, %v3897_v35  ;;  %vm4469_vm6 = vmor %vm4467_vm5, %vm4468_vm4 }
 0x4e4   : > { %v4041_v53 = vpop.f32.mrf.mxu3  ;;  %v4488_v12 = vand.u32 2147483648, %v8742_v50  ;;  %vm4482_vm9 = vweird.f32 %v8742_v50  ;;  %vm4487_vm11 = vcmp.eq.f32.partialorder %v4486_v37, 8.507059e+37  ;;  %v3998_v36 = vadd.f32 %v8744_v11, %v3949_v25 }
 0x4e5   : > { %v4042_v13 = vadd.f32 %v4041_v53, %v3993_v6  ;;  %v4465_v63 = vmul.f32 %v7159_v16, %v4464_v61  ;;  %v4593_v18 = vmul.f32 %v8572_v28, %v4575_v24  ;;  %v4661_v23 = vmul.f32 %v8570_v20, %v4575_v24 }
 0x4e6   : > { %v3995_v8 = vadd.f32 %v8723_v19, %v3946_v54  ;;  %v4489_v34 = vor.u32 1.1754944e-38, %v4488_v12 }
 0x4e7   : > { %v7163_v7 = vpop.eup %7162  ;;  %v6695_v0 = vmul.f32 -1.442695, %v4042_v13  ;;  %v4466_v40 = vadd.f32 %v7159_v16, %v4465_v63  ;;  %4617 = vadd.xlane.f32.xlu2 %v4593_v18  ;;  %4685 = vadd.xlane.f32.xlu0 %v4661_v23 }
 0x4e8   : > { %v7165_v38 = vpop.eup %7164  ;;  %v8766_v27 = vadd.f32 1.0, %v7163_v7  ;;  %v8768_v31 = vpop.f32.mrf.mxu2 }
 0x4e9   : > { %7168 = vpow2.f32 %v6695_v0  ;;  %v8770_v44 = vpop.f32.mrf.mxu0  ;;  %v4470_v39 = vsel %vm4469_vm6, %v7159_v16, %v4466_v40  ;;  %v4478_v33 = vmul.f32 %v7165_v38, %v8742_v50  ;;  %v7167_v22 = vpop.eup %7166  ;;  %vm4483_vm8 = vweird.f32 %v7165_v38 }
 0x4ea   : > { %7170 = vrcp.f32 %v8766_v27  ;;  %v8774_v47 = vpop.f32.mrf.mxu1  ;;  %v4475_v56 = vsel %vm4472_vm7, %v4474_v3, %v4470_v39  ;;  %vm4484_vm10 = vmor %vm4482_vm9, %vm4483_vm8  ;;  %v4501_v35 = vand.u32 2147483647, %v8766_v27  ;;  %v4503_v53 = vand.u32 2147483648, %v8766_v27 }
 0x4eb   : > { %7172 = vtanh.f32 %v8510_v9  ;;  %v4576_v60 = vmul.f32 %v7167_v22, %v4475_v56  ;;  %v4479_v45 = vsub.f32 1.0, %v4478_v33  ;;  %vm4497_vm13 = vweird.f32 %v8766_v27 }
 0x4ec   : > { %v4043_v62 = vpop.f32.mrf.mxu3  ;;  %v4504_v7 = vor.u32 1.1754944e-38, %v4503_v53  ;;  %vm4502_vm15 = vcmp.eq.f32.partialorder %v4501_v35, 8.507059e+37 }
 0x4ed   : > { %v4044_v51 = vadd.f32 %v4043_v62, %v3995_v8  ;;  %v4662_v32 = vmul.f32 %v8570_v20, %v4576_v60  ;;  %v4594_v30 = vmul.f32 %v8572_v28, %v4576_v60  ;;  %v4480_v48 = vmul.f32 %v7165_v38, %v4479_v45 }
 0x4ef   : > { %v7169_v9 = vpop.eup %7168  ;;  %v6696_v14 = vmul.f32 -1.442695, %v4044_v51  ;;  %4687 = vadd.xlane.f32.xlu1 %v4662_v32  ;;  %v4481_v19 = vadd.f32 %v7165_v38, %v4480_v48  ;;  %4619 = vadd.xlane.f32.xlu0 %v4594_v30 }
 0x4f0   : > { %v7171_v49 = vpop.eup %7170  ;;  %v8786_v55 = vadd.f32 1.0, %v7169_v9  ;;  %v8788_v16 = vpop.f32.mrf.mxu2 }
 0x4f1   : > { %v7173_v26 = vpop.eup %7172  ;;  %7174 = vpow2.f32 %v6696_v14  ;;  %4241 = vmatmul.bf16.gmra.mxu3 %v8441_v2  ;;  %v8792_v5 = vpop.f32.mrf.mxu0  ;;  %v4485_v46 = vsel %vm4484_vm10, %v7165_v38, %v4481_v19  ;;  %v4493_v50 = vmul.f32 %v7171_v49, %v8766_v27  ;;  %v3902_v2 = vadd.f32 %v8749_v1, %v8531_v57 }
 0x4f2   : > { %7176 = vrcp.f32 %v8786_v55  ;;  %v8796_v52 = vpop.f32.mrf.mxu1  ;;  %v4490_v58 = vsel %vm4487_vm11, %v4489_v34, %v4485_v46  ;;  %vm4498_vm12 = vweird.f32 %v7171_v49  ;;  %v4516_v56 = vand.u32 2147483647, %v8786_v55 }
 0x4f3   : > { %7178 = vtanh.f32 %v8514_v4  ;;  %v4577_v6 = vmul.f32 %v7173_v26, %v4490_v58  ;;  %v4494_v29 = vsub.f32 1.0, %v4493_v50  ;;  %v3951_v1 = vadd.f32 %v8754_v42, %v3902_v2  ;;  %vm4499_vm14 = vmor %vm4497_vm13, %vm4498_vm12 }
 0x4f4   : > { %v4046_v61 = vpop.f32.mrf.mxu3  ;;  %v4518_v8 = vand.u32 2147483648, %v8786_v55  ;;  %vm4512_vm1 = vweird.f32 %v8786_v55  ;;  %vm4517_vm3 = vcmp.eq.f32.partialorder %v4516_v56, 8.507059e+37 }
 0x4f5   : > { %v4047_v24 = vadd.f32 %v4046_v61, %v3998_v36  ;;  %v4663_v41 = vmul.f32 %v8570_v20, %v4577_v6  ;;  %v4595_v13 = vmul.f32 %v8572_v28, %v4577_v6  ;;  %v4495_v63 = vmul.f32 %v7171_v49, %v4494_v29 }
 0x4f6   : > { %v4000_v3 = vadd.f32 %v8768_v31, %v3951_v1  ;;  %v4519_v30 = vor.u32 1.1754944e-38, %v4518_v8 }
 0x4f7   : > { %v7175_v4 = vpop.eup %7174  ;;  %v6697_v10 = vmul.f32 -1.442695, %v4047_v24  ;;  %4689 = vadd.xlane.f32.xlu2 %v4663_v41  ;;  %4621 = vadd.xlane.f32.xlu1 %v4595_v13  ;;  %v4496_v11 = vadd.f32 %v7171_v49, %v4495_v63 }
 0x4f8   : > { %v7177_v57 = vpop.eup %7176  ;;  %v8808_v18 = vadd.f32 1.0, %v7175_v4  ;;  %v8810_v23 = vpop.f32.mrf.mxu2 }
 0x4f9   : > { %v7179_v0 = vpop.eup %7178  ;;  %7180 = vpow2.f32 %v6697_v10  ;;  %v8813_v40 = vpop.f32.mrf.mxu0  ;;  %v4500_v38 = vsel %vm4499_vm14, %v7171_v49, %v4496_v11  ;;  %v4508_v54 = vmul.f32 %v7177_v57, %v8786_v55  ;;  %vm4513_vm0 = vweird.f32 %v7177_v57 }
 0x4fa   : > { %7182 = vrcp.f32 %v8808_v18  ;;  %v8817_v27 = vpop.f32.mrf.mxu1  ;;  %v4505_v42 = vsel %vm4502_vm15, %v4504_v7, %v4500_v38  ;;  %vm4514_vm2 = vmor %vm4512_vm1, %vm4513_vm0  ;;  %v4531_v46 = vand.u32 2147483647, %v8808_v18  ;;  %v4533_v50 = vand.u32 2147483648, %v8808_v18 }
 0x4fb   : > { %v4578_v39 = vmul.f32 %v7179_v0, %v4505_v42  ;;  %v4509_v33 = vsub.f32 1.0, %v4508_v54  ;;  %7184 = vtanh.f32 %v8520_v43  ;;  %vm4527_vm5 = vweird.f32 %v8808_v18 }
 0x4fc   : > { %v4048_v22 = vpop.f32.mrf.mxu3  ;;  %v4534_v53 = vor.u32 1.1754944e-38, %v4533_v50  ;;  %vm4532_vm7 = vcmp.eq.f32.partialorder %v4531_v46, 8.507059e+37  ;;  %v4735_v50 = vlaneseq  ;;  %vm4740_vm0 = vcmask 130112  }
 0x4fd   : > { %v4049_v60 = vadd.f32 %v4048_v22, %v4000_v3  ;;  %v4596_v45 = vmul.f32 %v8572_v28, %v4578_v39  ;;  %v4664_v21 = vmul.f32 %v8570_v20, %v4578_v39  ;;  %v4510_v62 = vmul.f32 %v7177_v57, %v4509_v33 }
 0x4fe   : > { %vm4819_vm1 = vcmask 1040384  }
 0x4ff   : > { %v7181_v37 = vpop.eup %7180  ;;  %v6698_v12 = vmul.f32 -1.442695, %v4049_v60  ;;  %4623 = vadd.xlane.f32.xlu2 %v4596_v45  ;;  %4691 = vadd.xlane.f32.xlu0 %v4664_v21  ;;  %v4511_v31 = vadd.f32 %v7177_v57, %v4510_v62 }
 0x500   : > { %v7183_v43 = vpop.eup %7182  ;;  %v4325_v51 = vadd.f32 1.0, %v7181_v37  ;;  %v8826_v32 = vpop.f32.mrf.mxu2 }
 0x501   : > { %7186 = vpow2.f32 %v6698_v12  ;;  %v8829_v48 = vpop.f32.mrf.mxu0  ;;  %v4515_v9 = vsel %vm4514_vm2, %v7177_v57, %v4511_v31  ;;  %v4523_v14 = vmul.f32 %v7183_v43, %v8808_v18  ;;  %v7185_v19 = vpop.eup %7184  ;;  %vm4528_vm4 = vweird.f32 %v7183_v43 }
 0x502   : > { %7188 = vrcp.f32 %v4325_v51  ;;  %v8832_v49 = vpop.f32.mrf.mxu1  ;;  %v4520_v25 = vsel %vm4517_vm3, %v4519_v30, %v4515_v9  ;;  %vm4529_vm6 = vmor %vm4527_vm5, %vm4528_vm4  ;;  %v4546_v18 = vand.u32 2147483647, %v4325_v51  ;;  %v4548_v7 = vand.u32 2147483648, %v4325_v51  ;;  %v7231_v30 = vld [vmem:[#allocation10] sm:$0x7] }
 0x503   : > { %v4579_v55 = vmul.f32 %v7185_v19, %v4520_v25  ;;  %v4524_v34 = vsub.f32 1.0, %v4523_v14  ;;  %7190 = vtanh.f32 %v8523_v59  ;;  %vm4542_vm9 = vweird.f32 %v4325_v51 }
 0x504   : > { %v8835_v26 = vpop.f32.mrf.mxu3  ;;  %v4549_v33 = vor.u32 1.1754944e-38, %v4548_v7  ;;  %vm4547_vm11 = vcmp.eq.f32.partialorder %v4546_v18, 8.507059e+37  ;;  %v8866_v9 = vperm.slane %v7231_v30, 2  ;;  %vm4828_vm2 = vcmask 123904  }
 0x505   : > { %v4665_v58 = vmul.f32 %v8570_v20, %v4579_v55  ;;  %v4597_v36 = vmul.f32 %v8572_v28, %v4579_v55  ;;  %v4525_v6 = vmul.f32 %v7183_v43, %v4524_v34 }
 0x507   : > { %v7187_v29 = vpop.eup %7186  ;;  %4693 = vadd.xlane.f32.xlu1 %v4665_v58  ;;  %4625 = vadd.xlane.f32.xlu0 %v4597_v36  ;;  %v4526_v2 = vadd.f32 %v7183_v43, %v4525_v6 }
 0x508   : > { %v7189_v61 = vpop.eup %7188  ;;  %v4326_v59 = vadd.f32 1.0, %v7187_v29  ;;  %v8842_v35 = vpop.f32.mrf.mxu2 }
 0x509   : > { %v8844_v24 = vpop.f32.mrf.mxu0  ;;  %v4530_v41 = vsel %vm4529_vm6, %v7183_v43, %v4526_v2  ;;  %v4538_v13 = vmul.f32 %v7189_v61, %v4325_v51  ;;  %v7191_v63 = vpop.eup %7190  ;;  %vm4543_vm8 = vweird.f32 %v7189_v61  ;;  %v8875_v2 = vld [vmem:[#allocation11 + $0x1] ss:$0 sm:$0xff] }
 0x50a   : > { %7192 = vrcp.f32 %v4326_v59  ;;  %v8846_v4 = vpop.f32.mrf.mxu1  ;;  %v4535_v10 = vsel %vm4532_vm7, %v4534_v53, %v4530_v41  ;;  %vm4544_vm10 = vmor %vm4542_vm9, %vm4543_vm8  ;;  %v4563_v37 = vand.u32 2147483648, %v4326_v59  ;;  %v4561_v43 = vand.u32 2147483647, %v4326_v59 }
 0x50b   : > { %v4580_v11 = vmul.f32 %v7191_v63, %v4535_v10  ;;  %v4539_v57 = vsub.f32 1.0, %v4538_v13  ;;  %7194 = vtanh.f32 %v8528_v15  ;;  %vm4557_vm13 = vweird.f32 %v4326_v59 }
 0x50c   : > { %v8849_v1 = vpop.f32.mrf.mxu3  ;;  %7196 = vtanh.f32 %v8535_v17  ;;  %v4564_v17 = vor.u32 1.1754944e-38, %v4563_v37  ;;  %vm4562_vm15 = vcmp.eq.f32.partialorder %v4561_v43, 8.507059e+37  ;;  %v8881_v41 = vand.u32 127, %v4735_v50 }
 0x50d   : > { %v4666_v0 = vmul.f32 %v8570_v20, %v4580_v11  ;;  %v4598_v38 = vmul.f32 %v8572_v28, %v4580_v11  ;;  %v4540_v54 = vmul.f32 %v7189_v61, %v4539_v57  ;;  %v8883_v13 = vstv %s4633_s20 }
 0x50e   : > { %v8887_v18 = vadd.s32 4294967288, %v8881_v41 }
 0x50f   : > { %4695 = vadd.xlane.f32.xlu2 %v4666_v0  ;;  %4627 = vadd.xlane.f32.xlu1 %v4598_v38  ;;  %v4541_v42 = vadd.f32 %v7189_v61, %v4540_v54 }
 0x510   : > { %v7193_v3 = vpop.eup %7192  ;;  %v8853_v39 = vpop.f32.mrf.mxu2 }
 0x511   : > { %v8855_v15 = vpop.f32.mrf.mxu0  ;;  %v4545_v22 = vsel %vm4544_vm10, %v7189_v61, %v4541_v42  ;;  %v4553_v56 = vmul.f32 %v7193_v3, %v4326_v59  ;;  %v7195_v8 = vpop.eup %7194  ;;  %vm4558_vm12 = vweird.f32 %v7193_v3  ;;  %v8879_v59 = vstv %s6699_s13 }
 0x512   : > { %v8857_v20 = vpop.f32.mrf.mxu1  ;;  %v4550_v60 = vsel %vm4547_vm11, %v4549_v33, %v4545_v22  ;;  %vm4559_vm14 = vmor %vm4557_vm13, %vm4558_vm12  ;;  %v7197_v55 = vpop.eup %7196 }
 0x513   : > { %v8859_v45 = vmul.f32 %v7195_v8, %v4550_v60  ;;  %v4554_v21 = vsub.f32 1.0, %v4553_v56 }
 0x514   : > { %v8862_v62 = vpop.f32.mrf.mxu3 }
 0x515   : > { %v4599_v12 = vmul.f32 %v8572_v28, %v8859_v45  ;;  %v4555_v31 = vmul.f32 %v7193_v3, %v4554_v21  ;;  %v4061_v21 = vadd.f32 %v8770_v44, %v8866_v9 }
 0x517   : > { %4629 = vadd.xlane.f32.xlu2 %v4599_v12  ;;  %v4556_v51 = vadd.f32 %v7193_v3, %v4555_v31 }
 0x518   : > { %v8868_v14 = vpop.f32.mrf.mxu2 }
 0x519   : > { %v4075_v19 = vpop.f32.mrf.mxu0  ;;  %v4560_v25 = vsel %vm4559_vm14, %v7193_v3, %v4556_v51 }
 0x51a   : > { %v4076_v28 = vadd.f32 %v4075_v19, %v8866_v9  ;;  %v4124_v34 = vpop.f32.mrf.mxu1  ;;  %v4565_v46 = vsel %vm4562_vm15, %v4564_v17, %v4560_v25  ;;  %v4602_v58 = vpop.xlane.xlu0 %4601  ;;  %v4110_v25 = vadd.f32 %v8774_v47, %v4061_v21 }
 0x51b   : > { %v8871_v36 = vmul.f32 %v7197_v55, %v4565_v46  ;;  %v4670_v53 = vpop.xlane.xlu1 %4669  ;;  %v4635_v7 = vadd.f32 %v8883_v13, %v4602_v58  ;;  %v4063_v46 = vadd.f32 %v8792_v5, %v8866_v9 }
 0x51c   : > { %v4125_v6 = vadd.f32 %v4124_v34, %v4076_v28  ;;  %v8873_v29 = vpop.f32.mrf.mxu3  ;;  %v4703_v10 = vadd.f32 %v8879_v59, %v4670_v53  ;;  %v4159_v28 = vadd.f32 %v8788_v16, %v4110_v25 }
 0x51d   : > { %v4668_v61 = vmul.f32 %v8875_v2, %v8871_v36  ;;  %v4737_v37 = vperm.slane %v4635_v7, %v8881_v41  ;;  %v4112_v47 = vadd.f32 %v8796_v52, %v4063_v46 }
 0x51e   : > { %v4787_v8 = vperm.slane %v4703_v10, %v8881_v41  ;;  %v4208_v50 = vadd.f32 %v8835_v26, %v4159_v28 }
 0x51f   : > { %4699 = vadd.xlane.f32.xlu1 %v4668_v61  ;;  %v4161_v53 = vadd.f32 %v8810_v23, %v4112_v47 }
 0x520   : > { %v4173_v63 = vpop.f32.mrf.mxu2 }
 0x521   : > { %v4174_v11 = vadd.f32 %v4173_v63, %v4125_v6  ;;  %v4077_v57 = vpop.f32.mrf.mxu0  ;;  %v4210_v5 = vadd.f32 %v8849_v1, %v4161_v53 }
 0x522   : > { %v4078_v0 = vadd.f32 %v4077_v57, %v8866_v9  ;;  %v4126_v38 = vpop.f32.mrf.mxu1  ;;  %v4672_v54 = vpop.xlane.xlu2 %4671 }
 0x523   : > { %v4704_v42 = vadd.f32 %v8879_v59, %v4672_v54  ;;  %v4604_v3 = vpop.xlane.xlu0 %4603 }
 0x524   : > { %v4127_v33 = vadd.f32 %v4126_v38, %v4078_v0  ;;  %v4636_v22 = vadd.f32 %v8883_v13, %v4604_v3  ;;  %v8893_v56 = vpop.f32.mrf.mxu3 }
 0x525   : > { %v4788_v60 = vperm.slane %v4704_v42, %v8887_v18 }
 0x526   : > { %v4739_v12 = vperm.slane %v4636_v22, %v8887_v18 }
 0x527   : > { %v4789_v31 = vsel %vm4740_vm0, %v4788_v60, %v4787_v8 }
 0x528   : > { %v4175_v43 = vpop.f32.mrf.mxu2  ;;  %v4741_v51 = vsel %vm4740_vm0, %v4739_v12, %v4737_v37  ;;  %v4071_v37 = vadd.f32 %v8844_v24, %v8866_v9  ;;  %v4073_v24 = vadd.f32 %v8855_v15, %v8866_v9  ;;  %v4068_v15 = vadd.f32 %v8829_v48, %v8866_v9 }
 0x529   : > { %v4176_v30 = vadd.f32 %v4175_v43, %v4127_v33  ;;  %v8903_v17 = vpop.f32.mrf.mxu0  ;;  %v8906_v19 = vsel %vm4819_vm1, %v4741_v51, %v4789_v31 }
 0x52a   : > { %v8909_v44 = vpop.f32.mrf.mxu1  ;;  %v4829_v55 = vsel %vm4828_vm2, %v8906_v19, -inf  ;;  %v8927_v63 = vpop.xlane.xlu1 %4605  ;;  %v4120_v25 = vadd.f32 %v8846_v4, %v4071_v37 }
 0x52b   : > { %4830 = vmax.xlane.f32.xlu2 %v4829_v55  ;;  %v4066_v55 = vadd.f32 %v8813_v40, %v8866_v9 }
 0x52c   : > { %v8914_v34 = vpop.f32.mrf.mxu3  ;;  %v4169_v28 = vadd.f32 %v8853_v39, %v4120_v25 }
 0x530   : > { %v8919_v58 = vpop.f32.mrf.mxu2  ;;  %5021 = vxpose.xlu0.b32.start [1/2] (short) (narrow) %v4208_v50, 8 }
 0x531   : > { %v8921_v6 = vpop.f32.mrf.mxu0 }
 0x532   : > { %v8924_v61 = vpop.f32.mrf.mxu1  ;;  %v8942_v23 = vpop.xlane.xlu1 %4607 }
 0x534   : > { %v4222_v16 = vpop.f32.mrf.mxu3 }
 0x535   : > { %v8929_v10 = vadd.f32 %v4222_v16, %v4174_v11  ;;  %v8946_v11 = vpop.xlane.xlu0 %4673  ;;  %v4218_v16 = vadd.f32 %v8893_v56, %v4169_v28 }
 0x538   : > { %v8932_v57 = vpop.f32.mrf.mxu2  ;;  %5022 = vxpose.xlu0.b32.end [2/2] (short) (narrow) %v4210_v5, 8 }
 0x539   : > { %v8934_v26 = vpop.f32.mrf.mxu0 }
 0x53a   : > { %v8936_v7 = vpop.f32.mrf.mxu1  ;;  %v8938_v0 = vpop.xlane.xlu2 %4609 }
 0x53b   : > { %v8954_v22 = vpop.xlane.xlu1 %4675 }
 0x53c   : > { %v4224_v52 = vpop.f32.mrf.mxu3 }
 0x53d   : > { %v8940_v38 = vadd.f32 %v4224_v52, %v4176_v30  ;;  %v4115_v52 = vadd.f32 %v8817_v27, %v4066_v55  ;;  %v4081_v55 = vadd.f32 %v8903_v17, %v8866_v9 }
 0x53f   : > { %v4164_v37 = vadd.f32 %v8826_v32, %v4115_v52 }
 0x540   : > { %v8944_v54 = vpop.f32.mrf.mxu2 }
 0x541   : > { %v8948_v42 = vpop.f32.mrf.mxu0  ;;  %v4213_v56 = vadd.f32 %v8862_v62, %v4164_v37  ;;  %v4130_v62 = vadd.f32 %v8909_v44, %v4081_v55 }
 0x542   : > { %v8950_v1 = vpop.f32.mrf.mxu1  ;;  %v8952_v3 = vpop.xlane.xlu2 %4677 }
 0x543   : > { %v8958_v60 = vpop.xlane.xlu0 %4679 }
 0x544   : > { %v4227_v33 = vpop.f32.mrf.mxu3 }
 0x548   : > { %v8956_v8 = vpop.f32.mrf.mxu2 }
 0x549   : > { %v4090_v21 = vpop.f32.mrf.mxu0 }
 0x54a   : > { %v4091_v12 = vadd.f32 %v4090_v21, %v8866_v9  ;;  %v4139_v31 = vpop.f32.mrf.mxu1  ;;  %v8963_v43 = vpop.xlane.xlu2 %4611 }
 0x54b   : > { %v8969_v46 = vpop.xlane.xlu1 %4681  ;;  %v8976_v4 = vpop.xlane.xlu0 %4613 }
 0x54c   : > { %v4140_v51 = vadd.f32 %v4139_v31, %v4091_v12  ;;  %v4229_v30 = vpop.f32.mrf.mxu3  ;;  %v4122_v31 = vadd.f32 %v8857_v20, %v4073_v24 }
 0x54e   : > { %v4171_v27 = vadd.f32 %v8868_v14, %v4122_v31 }
 0x550   : > { %v4188_v50 = vpop.f32.mrf.mxu2  ;;  %v4220_v28 = vadd.f32 %v8914_v34, %v4171_v27  ;;  %v4083_v34 = vadd.f32 %v8921_v6, %v8866_v9 }
 0x551   : > { %v4189_v47 = vadd.f32 %v4188_v50, %v4140_v51  ;;  %v4092_v53 = vpop.f32.mrf.mxu0  ;;  %v4117_v50 = vadd.f32 %v8832_v49, %v4068_v15 }
 0x552   : > { %v4093_v5 = vadd.f32 %v4092_v53, %v8866_v9  ;;  %v4141_v21 = vpop.f32.mrf.mxu1  ;;  %v8981_v12 = vpop.xlane.xlu2 %4683  ;;  %v4132_v31 = vadd.f32 %v8924_v61, %v4083_v34 }
 0x553   : > { %v8991_v32 = vpop.xlane.xlu1 %4615  ;;  %v4166_v48 = vadd.f32 %v8842_v35, %v4117_v50 }
 0x554   : > { %v4142_v40 = vadd.f32 %v4141_v21, %v4093_v5  ;;  %5085 = vxpose.xlu2.b32.start [1/2] (short) (narrow) %v4218_v16, 8  ;;  %v8978_v39 = vpop.f32.mrf.mxu3  ;;  %v4179_v16 = vadd.f32 %v8919_v58, %v4130_v62  ;;  %v4705_v62 = vadd.f32 %v8879_v59, %v8946_v11  ;;  %v4640_v11 = vadd.f32 %v8883_v13, %v8963_v43 }
 0x555   : > { %v4215_v14 = vadd.f32 %v8873_v29, %v4166_v48  ;;  %v4706_v48 = vadd.f32 %v8879_v59, %v8954_v22 }
 0x556   : > { %v4228_v49 = vadd.f32 %v4227_v33, %v4179_v16  ;;  %v4746_v43 = vperm.slane %v4640_v11, %v8887_v18 }
 0x558   : > { %v4190_v51 = vpop.f32.mrf.mxu2 }
 0x559   : > { %v4191_v25 = vadd.f32 %v4190_v51, %v4142_v40  ;;  %5053 = vxpose.xlu1.b32.start [1/2] (short) (narrow) %v4213_v56, 8  ;;  %v4181_v56 = vadd.f32 %v8932_v57, %v4132_v31 }
 0x55a   : > { %v4686_v20 = vpop.xlane.xlu0 %4685  ;;  %v4618_v24 = vpop.xlane.xlu2 %4617 }
 0x55b   : > { %v4711_v17 = vadd.f32 %v8879_v59, %v4686_v20  ;;  %v4643_v5 = vadd.f32 %v8883_v13, %v4618_v24  ;;  %v4230_v55 = vadd.f32 %v4229_v30, %v4181_v56  ;;  %v4667_v20 = vmul.f32 %v8875_v2, %v8859_v45  ;;  %v7233_v24 = vld [vmem:[#allocation11] ss:$0 sm:$0xff] }
 0x55c   : > { %5086 = vxpose.xlu2.b32.end [2/2] (short) (narrow) %v4220_v28, 8  ;;  %v8994_v53 = vpop.f32.mrf.mxu3  ;;  %v4638_v30 = vadd.f32 %v8883_v13, %v8942_v23  ;;  %v4600_v45 = vmul.f32 %v7233_v24, %v8871_v36  ;;  %v4790_v2 = vperm.slane %v4705_v62, %v8881_v41  ;;  %v4708_v36 = vadd.f32 %v8879_v59, %v8958_v60 }
 0x55d   : > { %v4799_v40 = vperm.slane %v4711_v17, %v8881_v41  ;;  %v4751_v6 = vperm.slane %v4643_v5, %v8881_v41  ;;  %v4707_v17 = vadd.f32 %v8879_v59, %v8952_v3  ;;  %v4710_v24 = vadd.f32 %v8879_v59, %v8981_v12 }
 0x55e   : > { %v4743_v22 = vperm.slane %v4638_v30, %v8887_v18 }
 0x55f   : > { %v4797_v11 = vperm.slane %v4710_v24, %v8887_v18 }
 0x561   : > { %5054 = vxpose.xlu1.b32.end [2/2] (short) (narrow) %v4215_v14, 8  ;;  %v4791_v14 = vperm.slane %v4706_v48, %v8887_v18 }
 0x562   : > { %v4688_v52 = vpop.xlane.xlu1 %4687  ;;  %v4620_v35 = vpop.xlane.xlu0 %4619 }
 0x563   : > { %v4712_v21 = vadd.f32 %v8879_v59, %v4688_v52  ;;  %v4644_v44 = vadd.f32 %v8883_v13, %v4620_v35  ;;  %v4792_v23 = vsel %vm4740_vm0, %v4791_v14, %v4790_v2  ;;  %v4794_v35 = vperm.slane %v4708_v36, %v8887_v18 }
 0x564   : > { %5149 = vxpose.xlu2.b32.start [1/2] (short) (narrow) %v4228_v49, 8  ;;  %v4237_v29 = vpop.f32.mrf.mxu3  ;;  %v4709_v2 = vadd.f32 %v8879_v59, %v8969_v46 }
 0x565   : > { %v4800_v58 = vperm.slane %v4712_v21, %v8887_v18  ;;  %v9008_v37 = vadd.f32 %v4237_v29, %v4189_v47  ;;  %v4752_v33 = vperm.slane %v4644_v44, %v8887_v18 }
 0x566   : > { %v4796_v12 = vperm.slane %v4709_v2, %v8881_v41 }
 0x567   : > { %v4801_v15 = vsel %vm4740_vm0, %v4800_v58, %v4799_v40  ;;  %v4753_v27 = vsel %vm4740_vm0, %v4752_v33, %v4751_v6 }
 0x568   : > { %v9017_v51 = vsel %vm4819_vm1, %v4753_v27, %v4801_v15 }
 0x56a   : > { %v4690_v50 = vpop.xlane.xlu2 %4689  ;;  %v4622_v60 = vpop.xlane.xlu1 %4621 }
 0x56b   : > { %v4713_v58 = vadd.f32 %v8879_v59, %v4690_v50  ;;  %v4645_v31 = vadd.f32 %v8883_v13, %v4622_v60 }
 0x56c   : > { %5150 = vxpose.xlu2.b32.end [2/2] (short) (narrow) %v4230_v55, 8  ;;  %v4239_v28 = vpop.f32.mrf.mxu3 }
 0x56d   : > { %v9019_v47 = vadd.f32 %v4239_v28, %v4191_v25  ;;  %v4637_v25 = vadd.f32 %v8883_v13, %v8927_v63  ;;  %v4639_v63 = vadd.f32 %v8883_v13, %v8938_v0  ;;  %v4793_v0 = vperm.slane %v4707_v17, %v8881_v41 }
 0x56e   : > { %v4802_v28 = vperm.slane %v4713_v58, %v8881_v41 }
 0x56f   : > { %v4742_v16 = vperm.slane %v4637_v25, %v8881_v41  ;;  %v4745_v21 = vperm.slane %v4639_v63, %v8881_v41  ;;  %v4795_v33 = vsel %vm4740_vm0, %v4794_v35, %v4793_v0 }
 0x571   : > { %v4744_v49 = vsel %vm4740_vm0, %v4743_v22, %v4742_v16  ;;  %v4747_v40 = vsel %vm4740_vm0, %v4746_v43, %v4745_v21  ;;  %v4641_v22 = vadd.f32 %v8883_v13, %v8976_v4 }
 0x572   : > { %v4624_v61 = vpop.xlane.xlu2 %4623  ;;  %v9051_v5 = vsel %vm4819_vm1, %v4744_v49, %v4792_v23  ;;  %v4692_v52 = vpop.xlane.xlu0 %4691  ;;  %v9066_v15 = vsel %vm4819_vm1, %v4747_v40, %v4795_v33  ;;  %v4798_v49 = vsel %vm4740_vm0, %v4797_v11, %v4796_v12 }
 0x573   : > { %v4832_v3 = vsel %vm4828_vm2, %v9051_v5, -inf  ;;  %v4646_v44 = vadd.f32 %v8883_v13, %v4624_v61  ;;  %v4714_v29 = vadd.f32 %v8879_v59, %v4692_v52  ;;  %v4754_v61 = vperm.slane %v4645_v31, %v8881_v41 }
 0x574   : > { %v4835_v50 = vsel %vm4828_vm2, %v9066_v15, -inf  ;;  %v4748_v17 = vperm.slane %v4641_v22, %v8881_v41 }
 0x575   : > { %v4755_v56 = vperm.slane %v4646_v44, %v8887_v18  ;;  %v4803_v27 = vperm.slane %v4714_v29, %v8887_v18 }
 0x577   : > { %v4804_v48 = vsel %vm4740_vm0, %v4803_v27, %v4802_v28 }
 0x57a   : > { %v4694_v25 = vpop.xlane.xlu1 %4693 }
 0x57b   : > { %v4715_v43 = vadd.f32 %v8879_v59, %v4694_v25 }
 0x582   : > { %v9025_v57 = vpop.xlane.xlu2 %4695  ;;  %v4628_v63 = vpop.xlane.xlu1 %4627 }
 0x583   : > { %v4716_v46 = vadd.f32 %v8879_v59, %v9025_v57  ;;  %v4648_v36 = vadd.f32 %v8883_v13, %v4628_v63 }
 0x585   : > { %v4806_v0 = vperm.slane %v4716_v46, %v8887_v18  ;;  %v4758_v35 = vperm.slane %v4648_v36, %v8887_v18 }
 0x58a   : > { %v9047_v34 = vpop.xlane.xlu2 %4629 }
 0x58b   : > { %v4649_v36 = vadd.f32 %v8883_v13, %v9047_v34  ;;  %v4841_v34 = vsel %vm4828_vm2, %v9017_v51, -inf }
 0x592   : > { %v4700_v33 = vpop.xlane.xlu1 %4699 }
 0x59e   : > { %v4831_v6 = vpop.xlane.xlu2 %4830 }
 0x59f   : > { %v4853_v55 = vsub.f32 %v8906_v19, %v4831_v6 }
 0x5a1   : > { %v4861_v62 = vmul.f32 1.442695, %v4853_v55 }
 0x5a3   : > { %7198 = vpow2.f32 %v4861_v62 }
 0x5a9   : > { %4697 = vadd.xlane.f32.xlu0 %v4667_v20  ;;  %v4756_v20 = vsel %vm4740_vm0, %v4755_v56, %v4754_v61  ;;  %v9082_v14 = vpop.eup %7198 }
 0x5aa   : > { %v9078_v30 = vsel %vm4819_vm1, %v4756_v20, %v4804_v48  ;;  %v4877_v16 = vsel %vm4828_vm2, %v9082_v14, 0.0 }
 0x5ab   : > { %v4844_v19 = vsel %vm4828_vm2, %v9078_v30, -inf }
 0x5b1   : > { %4631 = vadd.xlane.f32.xlu0 %v4600_v45  ;;  %v4642_v45 = vadd.f32 %v8883_v13, %v8991_v32  ;;  %v4626_v32 = vpop.xlane.xlu0 %4625 }
 0x5b2   : > { %v4647_v52 = vadd.f32 %v8883_v13, %v4626_v32 }
 0x5b3   : > { %v4749_v23 = vperm.slane %v4642_v45, %v8887_v18 }
 0x5b4   : > { %v4757_v57 = vperm.slane %v4647_v52, %v8881_v41 }
 0x5b5   : > { %v4750_v4 = vsel %vm4740_vm0, %v4749_v23, %v4748_v17 }
 0x5b6   : > { %v4823_v21 = vsel %vm4819_vm1, %v4750_v4, %v4798_v49  ;;  %v4759_v44 = vsel %vm4740_vm0, %v4758_v35, %v4757_v57  ;;  %v4760_v57 = vperm.slane %v4649_v36, %v8881_v41 }
 0x5b7   : > { %v4838_v60 = vsel %vm4828_vm2, %v4823_v21, -inf }
 0x5b9   : > { %4833 = vmax.xlane.f32.xlu0 %v4832_v3  ;;  %v4805_v3 = vperm.slane %v4715_v43, %v8881_v41  ;;  %v4718_v43 = vadd.f32 %v8879_v59, %v4700_v33 }
 0x5bb   : > { %v4807_v29 = vsel %vm4740_vm0, %v4806_v0, %v4805_v3 }
 0x5bc   : > { %v4826_v40 = vsel %vm4819_vm1, %v4759_v44, %v4807_v29 }
 0x5bd   : > { %v4847_v58 = vsel %vm4828_vm2, %v4826_v40, -inf }
 0x5c1   : > { %4836 = vmax.xlane.f32.xlu1 %v4835_v50 }
 0x5c9   : > { %4845 = vmax.xlane.f32.xlu1 %v4844_v19 }
 0x5d1   : > { %4878 = vadd.xlane.f32.xlu1 %v4877_v16 }
 0x5d4   : > { %v5037_v31 = vpop.trf.xlu0 }
 0x5dd   : > { %4839 = vmax.xlane.f32.xlu2 %v4838_v60  ;;  %v4809_v60 = vperm.slane %v4718_v43, %v8887_v18 }
 0x5e2   : > { %5117 = vxpose.xlu0.b32.start [1/2] (short) (narrow) %v8929_v10, 8 }
 0x5e5   : > { %4848 = vmax.xlane.f32.xlu2 %v4847_v58 }
 0x5ea   : > { %5118 = vxpose.xlu0.b32.end [2/2] (short) (narrow) %v8940_v38, 8 }
 0x5ed   : > { %v9124_v48 = vpop.trf.xlu2 }
 0x5fd   : > { %v9117_v27 = vpop.trf.xlu1  ;;  %v9126_v19 = vpop.trf.xlu2 }
 0x61c   : > { %v4698_v6 = vpop.xlane.xlu0 %4697 }
 0x61d   : > { %v4717_v4 = vadd.f32 %v8879_v59, %v4698_v6 }
 0x624   : > { %v4632_v56 = vpop.xlane.xlu0 %4631 }
 0x625   : > { %v4650_v17 = vadd.f32 %v8883_v13, %v4632_v56  ;;  %v4808_v13 = vperm.slane %v4717_v4, %v8881_v41 }
 0x627   : > { %v4761_v52 = vperm.slane %v4650_v17, %v8887_v18 }
 0x629   : > { %v4762_v29 = vsel %vm4740_vm0, %v4761_v52, %v4760_v57 }
 0x62c   : > { %v4834_v55 = vpop.xlane.xlu0 %4833 }
 0x62d   : > { %v4854_v28 = vsub.f32 %v9051_v5, %v4834_v55 }
 0x62f   : > { %v4863_v61 = vmul.f32 1.442695, %v4854_v28 }
 0x631   : > { %7200 = vpow2.f32 %v4863_v61 }
 0x634   : > { %v4837_v50 = vpop.xlane.xlu1 %4836 }
 0x635   : > { %v4855_v35 = vsub.f32 %v9066_v15, %v4837_v50  ;;  %v4095_v50 = vpop.f32.mrf.mxu0 }
 0x637   : > { %v9120_v20 = vpop.eup %7200  ;;  %v4865_v15 = vmul.f32 1.442695, %v4855_v35 }
 0x638   : > { %v4880_v10 = vsel %vm4828_vm2, %v9120_v20, 0.0 }
 0x639   : > { %4881 = vadd.xlane.f32.xlu2 %v4880_v10  ;;  %v4086_v10 = vadd.f32 %v8934_v26, %v8866_v9 }
 0x63c   : > { %v4846_v38 = vpop.xlane.xlu1 %4845 }
 0x644   : > { %v4879_v62 = vpop.xlane.xlu1 %4878 }
 0x645   : > { %7202 = vrcp.f32 %v4879_v62  ;;  %v4912_v45 = vand.u32 2147483648, %v4879_v62  ;;  %v4910_v16 = vand.u32 2147483647, %v4879_v62  ;;  %vm4906_vm4 = vweird.f32 %v4879_v62 }
 0x647   : > { %v4913_v63 = vor.u32 1.1754944e-38, %v4912_v45  ;;  %vm4911_vm6 = vcmp.eq.f32.partialorder %v4910_v16, 8.507059e+37  ;;  %v4242_v45 = vpop.f32.mrf.mxu3 }
 0x64b   : > { %v7203_v25 = vpop.eup %7202 }
 0x64c   : > { %v4902_v5 = vmul.f32 %v7203_v25, %v4879_v62  ;;  %vm4907_vm3 = vweird.f32 %v7203_v25  ;;  %v4135_v62 = vadd.f32 %v8936_v7, %v4086_v10 }
 0x64d   : > { %vm4908_vm5 = vmor %vm4906_vm4, %vm4907_vm3 }
 0x64e   : > { %v4903_v24 = vsub.f32 1.0, %v4902_v5  ;;  %v4193_v5 = vpop.f32.mrf.mxu2 }
 0x64f   : > { %v4244_v36 = vpop.f32.mrf.mxu3 }
 0x650   : > { %v4904_v2 = vmul.f32 %v7203_v25, %v4903_v24  ;;  %v4840_v22 = vpop.xlane.xlu2 %4839  ;;  %v4184_v24 = vadd.f32 %v8944_v54, %v4135_v62 }
 0x651   : > { %v4856_v11 = vsub.f32 %v4823_v21, %v4840_v22  ;;  %v4088_v22 = vadd.f32 %v8948_v42, %v8866_v9 }
 0x652   : > { %v4905_v23 = vadd.f32 %v7203_v25, %v4904_v2  ;;  %v4233_v16 = vadd.f32 %v8978_v39, %v4184_v24 }
 0x653   : > { %v4867_v12 = vmul.f32 1.442695, %v4856_v11  ;;  %v4097_v11 = vpop.f32.mrf.mxu0 }
 0x654   : > { %v4909_v32 = vsel %vm4908_vm5, %v7203_v25, %v4905_v23  ;;  %v4144_v25 = vpop.f32.mrf.mxu1  ;;  %v4098_v26 = vadd.f32 %v4097_v11, %v8866_v9 }
 0x655   : > { %7204 = vpow2.f32 %v4867_v12  ;;  %v4914_v46 = vsel %vm4911_vm6, %v4913_v63, %v4909_v32  ;;  %v4137_v12 = vadd.f32 %v8950_v1, %v4088_v22 }
 0x656   : > { %v4915_v49 = vmul.f32 %v9082_v14, %v4914_v46  ;;  %v4195_v54 = vpop.f32.mrf.mxu2 }
 0x657   : > { %v4186_v7 = vadd.f32 %v8956_v8, %v4137_v12 }
 0x658   : > { %v4849_v21 = vpop.xlane.xlu2 %4848  ;;  %v9141_v0 = vmul.f32 %v5037_v31, %v4915_v49  ;;  %5342 = vst.msk [vmem:[%s9133_s9] sm:$0x3] %vm4828_vm2, %v4915_v49  ;;  %v4858_v31 = vsub.f32 %v9078_v30, %v4846_v38  ;;  %v4096_v38 = vadd.f32 %v4095_v50, %v8866_v9 }
 0x659   : > { %v4859_v3 = vsub.f32 %v4826_v40, %v4849_v21  ;;  %v4810_v40 = vsel %vm4740_vm0, %v4809_v60, %v4808_v13  ;;  %v4235_v46 = vadd.f32 %v8994_v53, %v4186_v7 }
 0x65a   : > { %v9158_v58 = vsel %vm4819_vm1, %v4762_v29, %v4810_v40  ;;  %v4871_v56 = vmul.f32 1.442695, %v4858_v31  ;;  %v4145_v2 = vadd.f32 %v4144_v25, %v4096_v38 }
 0x65b   : > { %v9150_v14 = vpop.eup %7204  ;;  %v4873_v59 = vmul.f32 1.442695, %v4859_v3  ;;  %4842 = vmax.xlane.f32.xlu0 %v4841_v34  ;;  %v4850_v6 = vsel %vm4828_vm2, %v9158_v58, -inf }
 0x65c   : > { %v4886_v44 = vsel %vm4828_vm2, %v9150_v14, 0.0  ;;  %v4194_v23 = vadd.f32 %v4193_v5, %v4145_v2  ;;  %v4146_v17 = vpop.f32.mrf.mxu1 }
 0x65d   : > { %7206 = vpow2.f32 %v4873_v59  ;;  %4887 = vadd.xlane.f32.xlu1 %v4886_v44  ;;  %v4147_v32 = vadd.f32 %v4146_v17, %v4098_v26 }
 0x65e   : > { %7208 = vpow2.f32 %v4865_v15  ;;  %v4243_v63 = vadd.f32 %v4242_v45, %v4194_v23 }
 0x65f   : > { %7210 = vpow2.f32 %v4871_v56  ;;  %v4196_v42 = vadd.f32 %v4195_v54, %v4147_v32 }
 0x661   : > { %v4245_v39 = vadd.f32 %v4244_v36, %v4196_v42 }
 0x663   : > { %v9163_v18 = vpop.eup %7206  ;;  %4851 = vmax.xlane.f32.xlu0 %v4850_v6 }
 0x664   : > { %v4895_v33 = vsel %vm4828_vm2, %v9163_v18, 0.0  ;;  %v9167_v55 = vpop.eup %7208 }
 0x665   : > { %4896 = vadd.xlane.f32.xlu1 %v4895_v33  ;;  %v4883_v28 = vsel %vm4828_vm2, %v9167_v55, 0.0  ;;  %v9171_v61 = vpop.eup %7210 }
 0x666   : > { %v4892_v30 = vsel %vm4828_vm2, %v9171_v61, 0.0 }
 0x66b   : > { %4884 = vadd.xlane.f32.xlu0 %v4883_v28 }
 0x673   : > { %4893 = vadd.xlane.f32.xlu0 %v4892_v30 }
 0x686   : > { %v9193_v13 = vpop.trf.xlu0 }
 0x69c   : > { %5181 = vxpose.xlu0.b32.start [1/2] (short) (narrow) %v4233_v16, 8 }
 0x69f   : > { %5245 = vxpose.xlu1.b32.start [1/2] (short) (narrow) %v4243_v63, 8 }
 0x6a4   : > { %5182 = vxpose.xlu0.b32.end [2/2] (short) (narrow) %v4235_v46, 8 }
 0x6a7   : > { %5246 = vxpose.xlu1.b32.end [2/2] (short) (narrow) %v4245_v39, 8 }
 0x6ac   : > { %v4882_v4 = vpop.xlane.xlu2 %4881 }
 0x6ad   : > { %7212 = vrcp.f32 %v4882_v4  ;;  %v4927_v1 = vand.u32 2147483648, %v4882_v4  ;;  %v4925_v8 = vand.u32 2147483647, %v4882_v4  ;;  %vm4921_vm8 = vweird.f32 %v4882_v4 }
 0x6af   : > { %v4928_v35 = vor.u32 1.1754944e-38, %v4927_v1  ;;  %vm4926_vm10 = vcmp.eq.f32.partialorder %v4925_v8, 8.507059e+37 }
 0x6b3   : > { %v7213_v9 = vpop.eup %7212 }
 0x6b4   : > { %v4917_v49 = vmul.f32 %v7213_v9, %v4882_v4  ;;  %vm4922_vm7 = vweird.f32 %v7213_v9 }
 0x6b5   : > { %vm4923_vm9 = vmor %vm4921_vm8, %vm4922_vm7 }
 0x6b6   : > { %v4918_v43 = vsub.f32 1.0, %v4917_v49 }
 0x6b8   : > { %v4919_v52 = vmul.f32 %v7213_v9, %v4918_v43 }
 0x6ba   : > { %v4920_v21 = vadd.f32 %v7213_v9, %v4919_v52 }
 0x6bc   : > { %v4924_v53 = vsel %vm4923_vm9, %v7213_v9, %v4920_v21 }
 0x6bd   : > { %v4929_v3 = vsel %vm4926_vm10, %v4928_v35, %v4924_v53 }
 0x6be   : > { %v9188_v57 = vmul.f32 %v9120_v20, %v4929_v3 }
 0x6c0   : > { %5343 = vst.msk [vmem:[%s9133_s9 + $0x2] sm:$0x3] %vm4828_vm2, %v9188_v57 }
 0x6ce   : > { %v4843_v34 = vpop.xlane.xlu0 %4842 }
 0x6cf   : > { %v4857_v59 = vsub.f32 %v9017_v51, %v4843_v34 }
 0x6d0   : > { %v4888_v60 = vpop.xlane.xlu1 %4887 }
 0x6d1   : > { %v4869_v44 = vmul.f32 1.442695, %v4857_v59  ;;  %7214 = vrcp.f32 %v4888_v60  ;;  %v4957_v30 = vand.u32 2147483648, %v4888_v60  ;;  %v4955_v50 = vand.u32 2147483647, %v4888_v60 }
 0x6d2   : > { %vm4951_vm12 = vweird.f32 %v4888_v60 }
 0x6d3   : > { %7216 = vpow2.f32 %v4869_v44  ;;  %v4958_v62 = vor.u32 1.1754944e-38, %v4957_v30  ;;  %vm4956_vm14 = vcmp.eq.f32.partialorder %v4955_v50, 8.507059e+37 }
 0x6d6   : > { %v4852_v29 = vpop.xlane.xlu0 %4851 }
 0x6d7   : > { %v7215_v15 = vpop.eup %7214  ;;  %v4860_v40 = vsub.f32 %v9158_v58, %v4852_v29 }
 0x6d8   : > { %v4947_v31 = vmul.f32 %v7215_v15, %v4888_v60  ;;  %v4897_v6 = vpop.xlane.xlu1 %4896  ;;  %vm4952_vm11 = vweird.f32 %v7215_v15 }
 0x6d9   : > { %v9197_v20 = vpop.eup %7216  ;;  %v4875_v33 = vmul.f32 1.442695, %v4860_v40  ;;  %7218 = vrcp.f32 %v4897_v6  ;;  %vm4953_vm13 = vmor %vm4951_vm12, %vm4952_vm11  ;;  %v5002_v11 = vand.u32 2147483648, %v4897_v6  ;;  %v5000_v26 = vand.u32 2147483647, %v4897_v6 }
 0x6da   : > { %v4948_v56 = vsub.f32 1.0, %v4947_v31  ;;  %v4889_v28 = vsel %vm4828_vm2, %v9197_v20, 0.0  ;;  %vm4996_vm0 = vweird.f32 %v4897_v6 }
 0x6db   : > { %7220 = vpow2.f32 %v4875_v33  ;;  %4890 = vadd.xlane.f32.xlu2 %v4889_v28  ;;  %v5003_v54 = vor.u32 1.1754944e-38, %v5002_v11  ;;  %vm5001_vm3 = vcmp.eq.f32.partialorder %v5000_v26, 8.507059e+37 }
 0x6dc   : > { %v4949_v51 = vmul.f32 %v7215_v15, %v4948_v56 }
 0x6de   : > { %v4885_v10 = vpop.xlane.xlu0 %4884  ;;  %v4950_v38 = vadd.f32 %v7215_v15, %v4949_v51 }
 0x6df   : > { %v7219_v58 = vpop.eup %7218  ;;  %7222 = vrcp.f32 %v4885_v10  ;;  %v4940_v39 = vand.u32 2147483647, %v4885_v10  ;;  %vm4936_vm5 = vweird.f32 %v4885_v10 }
 0x6e0   : > { %v4992_v25 = vmul.f32 %v7219_v58, %v4897_v6  ;;  %v4954_v5 = vsel %vm4953_vm13, %v7215_v15, %v4950_v38  ;;  %vm4997_vm15 = vweird.f32 %v7219_v58  ;;  %v5285_v6 = vsel %vm4828_vm2, %v9141_v0, 0.0 }
 0x6e1   : > { %v9201_v24 = vpop.eup %7220  ;;  %v4959_v45 = vsel %vm4956_vm14, %v4958_v62, %v4954_v5  ;;  %vm4998_vm1 = vmor %vm4996_vm0, %vm4997_vm15  ;;  %vm4941_vm7 = vcmp.eq.f32.partialorder %v4940_v39, 8.507059e+37 }
 0x6e2   : > { %v4993_v2 = vsub.f32 1.0, %v4992_v25  ;;  %v4898_v22 = vsel %vm4828_vm2, %v9201_v24, 0.0  ;;  %v4960_v16 = vmul.f32 %v9150_v14, %v4959_v45  ;;  %v4942_v14 = vand.u32 2147483648, %v4885_v10 }
 0x6e3   : > { %4899 = vadd.xlane.f32.xlu2 %v4898_v22 }
 0x6e4   : > { %v4994_v23 = vmul.f32 %v7219_v58, %v4993_v2  ;;  %5345 = vst.msk [vmem:[%s9133_s9 + $0x6] sm:$0x3] %vm4828_vm2, %v4960_v16  ;;  %v4943_v43 = vor.u32 1.1754944e-38, %v4942_v14  ;;  %v5280_v40 = vmul.f32 %v9193_v13, %v4960_v16 }
 0x6e5   : > { %v7223_v63 = vpop.eup %7222 }
 0x6e6   : > { %v4932_v12 = vmul.f32 %v7223_v63, %v4885_v10  ;;  %v4894_v7 = vpop.xlane.xlu0 %4893  ;;  %v4995_v17 = vadd.f32 %v7219_v58, %v4994_v23  ;;  %vm4937_vm4 = vweird.f32 %v7223_v63  ;;  %v5294_v31 = vsel %vm4828_vm2, %v5280_v40, 0.0 }
 0x6e7   : > { %7224 = vrcp.f32 %v4894_v7  ;;  %vm4938_vm6 = vmor %vm4936_vm5, %vm4937_vm4  ;;  %v4987_v53 = vand.u32 2147483648, %v4894_v7  ;;  %vm4981_vm9 = vweird.f32 %v4894_v7  ;;  %vm5325_vm5 = vcmask 1041409  }
 0x6e8   : > { %v4933_v32 = vsub.f32 1.0, %v4932_v12  ;;  %v4999_v46 = vsel %vm4998_vm1, %v7219_v58, %v4995_v17 }
 0x6e9   : > { %v5004_v36 = vsel %vm5001_vm3, %v5003_v54, %v4999_v46  ;;  %v4988_v59 = vor.u32 1.1754944e-38, %v4987_v53 }
 0x6ea   : > { %v4934_v42 = vmul.f32 %v7223_v63, %v4933_v32  ;;  %v9209_v4 = vmul.f32 %v9163_v18, %v5004_v36  ;;  %v4985_v18 = vand.u32 2147483647, %v4894_v7 }
 0x6ec   : > { %v4935_v9 = vadd.f32 %v7223_v63, %v4934_v42  ;;  %5348 = vst.msk [vmem:[%s9133_s9 + $0xc] sm:$0x3] %vm4828_vm2, %v9209_v4  ;;  %vm4986_vm11 = vcmp.eq.f32.partialorder %v4985_v18, 8.507059e+37 }
 0x6ed   : > { %v7225_v49 = vpop.eup %7224 }
 0x6ee   : > { %v4977_v1 = vmul.f32 %v7225_v49, %v4894_v7  ;;  %v4939_v52 = vsel %vm4938_vm6, %v7223_v63, %v4935_v9  ;;  %vm4982_vm8 = vweird.f32 %v7225_v49  ;;  %vm5327_vm6 = vcmask 1042434  }
 0x6ef   : > { %v4944_v8 = vsel %vm4941_vm7, %v4943_v43, %v4939_v52  ;;  %vm4983_vm10 = vmor %vm4981_vm9, %vm4982_vm8  ;;  %vm5329_vm7 = vcmask 1043459   ;;  %vm5333_vm8 = vcmask 1045509   ;;  %vm5335_vm9 = vcmask 1046534  }
 0x6f0   : > { %v4978_v21 = vsub.f32 1.0, %v4977_v1  ;;  %v4945_v35 = vmul.f32 %v9167_v55, %v4944_v8 }
 0x6f2   : > { %v4979_v3 = vmul.f32 %v7225_v49, %v4978_v21  ;;  %5344 = vst.msk [vmem:[%s9133_s9 + $0x4] sm:$0x3] %vm4828_vm2, %v4945_v35  ;;  %v5279_v15 = vmul.f32 %v9124_v48, %v4945_v35 }
 0x6f4   : > { %v4980_v34 = vadd.f32 %v7225_v49, %v4979_v3  ;;  %v5291_v55 = vsel %vm4828_vm2, %v5279_v15, 0.0 }
 0x6f6   : > { %v4984_v60 = vsel %vm4983_vm10, %v7225_v49, %v4980_v34  ;;  %vm5337_vm10 = vcmask 1047559  }
 0x6f7   : > { %v4989_v44 = vsel %vm4986_vm11, %v4988_v59, %v4984_v60  ;;  %vm5340_vm11 = vcmask 15360  }
 0x6f8   : > { %v4990_v29 = vmul.f32 %v9171_v61, %v4989_v44 }
 0x6fa   : > { %5347 = vst.msk [vmem:[%s9133_s9 + $0xa] sm:$0x3] %vm4828_vm2, %v4990_v29 }
 0x707   : > { %5292 = vadd.xlane.f32.xlu1 %v5291_v55 }
 0x70c   : > { %5213 = vxpose.xlu2.b32.start [1/2] (short) (narrow) %v9008_v37, 8 }
 0x70f   : > { %5295 = vadd.xlane.f32.xlu1 %v5294_v31 }
 0x714   : > { %5214 = vxpose.xlu2.b32.end [2/2] (short) (narrow) %v9019_v47, 8 }
 0x715   : > { %5286 = vadd.xlane.f32.xlu0 %v5285_v6 }
 0x740   : > { %v5197_v61 = vpop.trf.xlu0 }
 0x741   : > { %v5282_v33 = vmul.f32 %v5197_v61, %v4990_v29 }
 0x743   : > { %v5300_v48 = vsel %vm4828_vm2, %v5282_v33, 0.0  ;;  %v5261_v54 = vpop.trf.xlu1 }
 0x744   : > { %5301 = vadd.xlane.f32.xlu0 %v5300_v48 }
 0x74e   : > { %v4891_v56 = vpop.xlane.xlu2 %4890 }
 0x74f   : > { %7226 = vrcp.f32 %v4891_v56  ;;  %v4972_v51 = vand.u32 2147483648, %v4891_v56  ;;  %v4970_v47 = vand.u32 2147483647, %v4891_v56  ;;  %vm4966_vm13 = vweird.f32 %v4891_v56 }
 0x751   : > { %v4973_v38 = vor.u32 1.1754944e-38, %v4972_v51  ;;  %vm4971_vm15 = vcmp.eq.f32.partialorder %v4970_v47, 8.507059e+37 }
 0x755   : > { %v7227_v28 = vpop.eup %7226 }
 0x756   : > { %v4962_v13 = vmul.f32 %v7227_v28, %v4891_v56  ;;  %v4900_v30 = vpop.xlane.xlu2 %4899  ;;  %vm4967_vm12 = vweird.f32 %v7227_v28 }
 0x757   : > { %7228 = vrcp.f32 %v4900_v30  ;;  %vm4968_vm14 = vmor %vm4966_vm13, %vm4967_vm12  ;;  %v5017_v2 = vand.u32 2147483648, %v4900_v30  ;;  %v5015_v11 = vand.u32 2147483647, %v4900_v30  ;;  %vm5011_vm1 = vweird.f32 %v4900_v30 }
 0x758   : > { %v4963_v37 = vsub.f32 1.0, %v4962_v13 }
 0x759   : > { %v5018_v63 = vor.u32 1.1754944e-38, %v5017_v2  ;;  %vm5016_vm4 = vcmp.eq.f32.partialorder %v5015_v11, 8.507059e+37 }
 0x75a   : > { %v4964_v50 = vmul.f32 %v7227_v28, %v4963_v37 }
 0x75c   : > { %v4965_v0 = vadd.f32 %v7227_v28, %v4964_v50 }
 0x75d   : > { %v7229_v10 = vpop.eup %7228 }
 0x75e   : > { %v5007_v58 = vmul.f32 %v7229_v10, %v4900_v30  ;;  %v4969_v62 = vsel %vm4968_vm14, %v7227_v28, %v4965_v0  ;;  %vm5012_vm0 = vweird.f32 %v7229_v10 }
 0x75f   : > { %v4974_v25 = vsel %vm4971_vm15, %v4973_v38, %v4969_v62  ;;  %vm5013_vm3 = vmor %vm5011_vm1, %vm5012_vm0 }
 0x760   : > { %v5008_v5 = vsub.f32 1.0, %v5007_v58  ;;  %v4975_v45 = vmul.f32 %v9197_v20, %v4974_v25 }
 0x762   : > { %v5009_v22 = vmul.f32 %v7229_v10, %v5008_v5  ;;  %v5281_v16 = vmul.f32 %v9126_v19, %v4975_v45  ;;  %5346 = vst.msk [vmem:[%s9133_s9 + $0x8] sm:$0x3] %vm4828_vm2, %v4975_v45  ;;  %v5278_v19 = vmul.f32 %v9117_v27, %v9188_v57 }
 0x764   : > { %v5297_v23 = vsel %vm4828_vm2, %v5281_v16, 0.0  ;;  %v5010_v26 = vadd.f32 %v7229_v10, %v5009_v22  ;;  %v5288_v17 = vsel %vm4828_vm2, %v5278_v19, 0.0 }
 0x765   : > { %5298 = vadd.xlane.f32.xlu1 %v5297_v23 }
 0x766   : > { %v5014_v12 = vsel %vm5013_vm3, %v7229_v10, %v5010_v26 }
 0x767   : > { %v5019_v7 = vsel %vm5016_vm4, %v5018_v63, %v5014_v12 }
 0x768   : > { %v5020_v20 = vmul.f32 %v9201_v24, %v5019_v7 }
 0x76a   : > { %5349 = vst.msk [vmem:[%s9133_s9 + $0xe] sm:$0x3] %vm4828_vm2, %v5020_v20  ;;  %v5284_v32 = vmul.f32 %v5261_v54, %v5020_v20 }
 0x76c   : > { %v5306_v46 = vsel %vm4828_vm2, %v5284_v32, 0.0 }
 0x77a   : > { %v5293_v24 = vpop.xlane.xlu1 %5292 }
 0x77b   : > { %v5319_v1 = vperm.slane %v5293_v24, %v8881_v41 }
 0x782   : > { %v5296_v9 = vpop.xlane.xlu1 %5295 }
 0x783   : > { %v5320_v8 = vperm.slane %v5296_v9, %v8881_v41 }
 0x785   : > { %5289 = vadd.xlane.f32.xlu2 %v5288_v17 }
 0x788   : > { %v5287_v27 = vpop.xlane.xlu0 %5286 }
 0x789   : > { %v5317_v49 = vperm.slane %v5287_v27, %v8881_v41 }
 0x78d   : > { %5307 = vadd.xlane.f32.xlu2 %v5306_v46 }
 0x7a5   : > { %v5229_v14 = vpop.trf.xlu2 }
 0x7a6   : > { %v5283_v36 = vmul.f32 %v5229_v14, %v9209_v4 }
 0x7a8   : > { %v5303_v42 = vsel %vm4828_vm2, %v5283_v36, 0.0  ;;  %vm5331_vm2 = vcmask 1044484  }
 0x7a9   : > { %5304 = vadd.xlane.f32.xlu1 %v5303_v42 }
 0x7b7   : > { %v5302_v35 = vpop.xlane.xlu0 %5301 }
 0x7b8   : > { %v5322_v34 = vperm.slane %v5302_v35, %v8881_v41 }
 0x7d8   : > { %v5299_v52 = vpop.xlane.xlu1 %5298 }
 0x7d9   : > { %v5321_v53 = vperm.slane %v5299_v52, %v8881_v41 }
 0x7f8   : > { %v5290_v39 = vpop.xlane.xlu2 %5289 }
 0x7f9   : > { %v5318_v57 = vperm.slane %v5290_v39, %v8881_v41 }
 0x7fb   : > { %v5326_v43 = vsel %vm5325_vm5, %v5318_v57, %v5317_v49 }
 0x7fc   : > { %v5328_v4 = vsel %vm5327_vm6, %v5319_v1, %v5326_v43 }
 0x7fd   : > { %v5330_v21 = vsel %vm5329_vm7, %v5320_v8, %v5328_v4 }
 0x7fe   : > { %v5332_v18 = vsel %vm5331_vm2, %v5321_v53, %v5330_v21 }
 0x7ff   : > { %v5334_v29 = vsel %vm5333_vm8, %v5322_v34, %v5332_v18 }
 0x800   : > { %v5308_v3 = vpop.xlane.xlu2 %5307 }
 0x801   : > { %v5324_v44 = vperm.slane %v5308_v3, %v8881_v41 }
 0x81c   : > { %v5305_v59 = vpop.xlane.xlu1 %5304 }
 0x81d   : > { %v5323_v60 = vperm.slane %v5305_v59, %v8881_v41 }
 0x81f   : > { %v5336_v15 = vsel %vm5335_vm9, %v5323_v60, %v5334_v29 }
 0x820   : > { %v5338_v55 = vsel %vm5337_vm10, %v5324_v44, %v5336_v15 }
 0x821   : > { %5341 = vst.msk [vmem:[%s426_s11] sm:$0xff] %vm5340_vm11, %v5338_v55 }
 0x822 PF: > { %p23_p10 = scmp.ge.s32.totalorder %s7607_s14, 6   ;;  %s9448_s27 = smov %s7471_s28 }
 0x823   : > { %s9449_s28 = smov %s7475_s29  ;;  %s9450_s29 = smov %s7619_s17 }
 0x824   : > { %s9451_s30 = smov %s7607_s14  ;;  %25 = sbr.rel (!%p23_p10) target bundleno = 9 (0x9), region = 125 }
 0x829   :  { %5386 = vsyncpa [#allocation3], 1 }
 0x82a   :  { %5388 = vsyncpa [#allocation3 + $0x1], 1 }
 0x82b   :  { %5389 = vsyncpa [#allocation6], 1 }
 0x82c   :  { %5390 = vsyncpa [#allocation9], 1 }
 0x82d   :  { %5391 = vsyncpa [#allocation12], 1 }
 0x82e   :  { %5392 = vsyncpa [#allocation4], 1 }
 0x82f   :  { %5394 = vsyncpa [#allocation4 + $0x1], 1 }

</bundles_post_ra>
